<compile_context>
chip_gen: v7x
topology: tpu7x:2x2x1
jax: 0.10.0
libtpu: 0.0.40
codegen_flags: <defaults>
</compile_context>

<pallas_src>
import jax
import jax.numpy as jnp
from jax.experimental import pallas as pl
from jax.experimental.pallas import tpu as pltpu

MAXV = 2.0  # activation quant range: [-2, 2] signed, [0, 2] for ReLU (module config)


# ------------------------------- quantizers --------------------------------
def _quant_signed(x, bits):
    """QuantHardTanh / QuantIdentity (INT): symmetric signed grid over [-MAXV, MAXV]."""
    n = float(2 ** (bits - 1) - 1)
    inv_s = n / MAXV  # multiply, never divide, in the per-element epilogue
    return jnp.clip(jnp.floor(x * inv_s + 0.5), -n, n) * (MAXV / n)


def _quant_relu(x, bits):
    """QuantReLU (INT): unsigned grid over [0, MAXV]."""
    n = float(2 ** bits - 1)
    inv_s = n / MAXV
    return jnp.clip(jnp.floor(jnp.maximum(x, 0.0) * inv_s + 0.5), 0.0, n) * (MAXV / n)


# --------------------------- fused Pallas kernel ----------------------------
def _make_fused_kernel(n_conv, n_lin, in_bits, hid_bits, out_bits):
    """Whole network for one batch block; activations stay in registers/VMEM values."""

    def kernel(*refs):
        x_ref = refs[0]
        conv_refs = [refs[1 + 2 * j: 1 + 2 * j + 2] for j in range(n_conv)]
        base = 1 + 2 * n_conv
        lin_refs = [refs[base + 2 * j: base + 2 * j + 2] for j in range(n_lin)]
        o_ref = refs[base + 2 * n_lin]

        # Input block is length-major: (seq, b_blk, cin); rows of the 2D view are
        # l * b_blk + b, so conv taps are whole-vreg (b_blk >= 8 sublanes) shifts.
        x3 = x_ref[...]
        seq, b_blk, cin0 = x3.shape
        x = x3.reshape(seq * b_blk, cin0)

        # Input quantizer (QuantHardTanh) -- applied by the first conv layer only.
        x = _quant_signed(x, in_bits)

        # Conv stack: SparseConv1d(k=3, pad=1) -> folded BN -> QuantReLU -> MaxPool(2).
        L = seq
        for j in range(n_conv):
            w_ref, b_ref = conv_refs[j]
            cin = x.shape[1]
            zblk = jnp.zeros((b_blk, cin), jnp.float32)
            # pad=1 zero taps == zeroing the first / last b_blk rows (length-major).
            x_prev = jnp.concatenate([zblk, x[:-b_blk, :]], axis=0)
            x_next = jnp.concatenate([x[b_blk:, :], zblk], axis=0)
            # One fused MXU matmul over all 3 taps: K = 3*cin, weight pre-reshaped
            # on the host to (3*cin, cout) in matching (tap, channel) order.
            lhs = jnp.concatenate([x_prev, x, x_next], axis=1).astype(jnp.bfloat16)
            y = jnp.dot(lhs, w_ref[...], preferred_element_type=jnp.float32)
            y = y + b_ref[...]                      # conv bias + folded eval-mode BN
            y = _quant_relu(y, hid_bits)
            # Fused MaxPool1d(2): max of the two aligned b_blk-row halves of each
            # adjacent length pair -- no scratch store / strided readback.
            cout = y.shape[1]
            y = y.reshape(L // 2, 2 * b_blk, cout)
            x = jnp.maximum(y[:, :b_blk, :], y[:, b_blk:, :]).reshape(
                (L // 2) * b_blk, cout)
            L //= 2

        # Flatten (torch NCW order f = c*l_last + l) fused with the first linear:
        # lane-concatenate the l_last pooled (b_blk, c_last) tiles; w1 rows were
        # pre-permuted on the host to index l*c_last + c, so this is one matmul.
        l_last = L
        h = jnp.concatenate([x[l * b_blk:(l + 1) * b_blk, :] for l in range(l_last)],
                            axis=1)

        # Linear stack (hidden: folded BN + QuantReLU, last: QuantIdentity).
        for j in range(n_lin):
            w_ref, b_ref = lin_refs[j]
            h = jnp.dot(h.astype(jnp.bfloat16), w_ref[...],
                        preferred_element_type=jnp.float32) + b_ref[...]
            h = _quant_relu(h, hid_bits) if j < n_lin - 1 else _quant_signed(h, out_bits)
        o_ref[...] = h

    return kernel


def _default_batch_blocks():
    """1 batch block on single-TensorCore chips (v5e/v6e), 2 on v7x (two TCs)."""
    try:
        kind = jax.devices()[0].device_kind.lower()
    except Exception:
        return 1
    # TODO(synk): on v7x, verify in a profile that the size-2 "parallel" axis is
    # actually sharded across both TensorCores; switch to CORE_PARALLEL if not.
    return 2 if "v7" in kind else 1


def build_fused_forward(params, cfg, batch, batch_blocks=None):
    """Fold BN + sparsity masks into the operands, pre-reshape weights for the fused
    tap/flatten matmuls, and return a jitted forward over NCW inputs."""
    if batch_blocks is None:
        batch_blocks = _default_batch_blocks()
    if batch % batch_blocks != 0 or (batch // batch_blocks) % 8 != 0:
        batch_blocks = 1
    b_blk = batch // batch_blocks
    assert b_blk % 8 == 0, "batch block must be sublane aligned"

    seq = cfg["sequence_length"]
    cin0 = cfg["input_length"]
    n_conv = len(params["convs"])
    n_lin = len(params["linears"])
    l_last = seq // (2 ** n_conv)                   # length after the conv+pool stack
    c_last = params["convs"][-1]["w"].shape[0]
    assert c_last * l_last == cfg["1st_layer_in_f"]

    operands, in_specs = [], []

    # Network input, length-major: (seq, batch, cin); batch is the blocked axis.
    in_specs.append(pl.BlockSpec((seq, b_blk, cin0), lambda i: (0, i, 0)))

    for p in params["convs"]:
        cout, cin, k = p["w"].shape
        scale, shift = p["bn_scale"], p["bn_shift"]
        w = p["w"] * p["mask"] * scale[:, None, None]          # fold BN scale
        b = p["b"] * scale + shift                             # fold BN shift
        # (cout, cin, k) -> (k, cin, cout) -> (k*cin, cout): rows = tap*cin + channel,
        # matching the in-kernel lane concat [x_prev | x | x_next].
        wcat = jnp.transpose(w, (2, 1, 0)).reshape(k * cin, cout).astype(jnp.bfloat16)
        operands += [wcat, b[None, :].astype(jnp.float32)]
        in_specs += [pl.BlockSpec((k * cin, cout), lambda i: (0, 0)),
                     pl.BlockSpec((1, cout), lambda i: (0, 0))]

    for j, p in enumerate(params["linears"]):
        scale, shift = p["bn_scale"], p["bn_shift"]
        w = p["w"] * p["mask"] * scale[:, None]
        b = p["b"] * scale + shift
        dout, din = w.shape
        if j == 0:
            # torch flatten feature f = c*l_last + l; kernel LHS column j = l*c_last + c.
            wt = jnp.transpose(w.reshape(dout, c_last, l_last), (2, 1, 0)).reshape(
                l_last * c_last, dout)
        else:
            wt = jnp.transpose(w)                              # (din, dout)
        operands += [wt.astype(jnp.bfloat16), b[None, :].astype(jnp.float32)]
        in_specs += [pl.BlockSpec(wt.shape, lambda i: (0, 0)),
                     pl.BlockSpec((1, dout), lambda i: (0, 0))]

    out_dim = params["linears"][-1]["w"].shape[0]
    kernel = _make_fused_kernel(n_conv, n_lin, cfg["input_bitwidth"],
                                cfg["hidden_bitwidth"], cfg["output_bitwidth"])

    # VMEM is trivial at this size (largest live activation ~16 KiB). If batch is
    # scaled up, re-budget b_blk against v7x's 64 MiB physical VMEM (vs 128 MiB on
    # v5e/v6e) before raising vmem_limit_bytes.
    call = pl.pallas_call(
        kernel,
        out_shape=jax.ShapeDtypeStruct((batch, out_dim), jnp.float32),
        grid=(batch_blocks,),
        in_specs=in_specs,
        out_specs=pl.BlockSpec((b_blk, out_dim), lambda i: (i, 0)),
        compiler_params=pltpu.CompilerParams(
            dimension_semantics=("parallel",)),
    )

    def fwd(x_ncl):
        # NCW -> (length, batch, channel): length-major rows inside each batch block.
        x_lbc = jnp.transpose(x_ncl, (2, 0, 1))
        return call(x_lbc, *operands)

    return jax.jit(fwd)


# ---------------- deterministic parameter construction (glue) ---------------
def conv_mask(key, c_out, c_in, k, fan_in):
    # RandomFixedSparsityConv1DMask: per output channel keep `fan_in` input channels.
    rows = []
    for _ in range(c_out):
        key, sub = jax.random.split(key)
        perm = jax.random.permutation(sub, c_in)
        sel = jnp.zeros((c_in,), jnp.float32).at[perm[:fan_in]].set(1.0)
        rows.append(jnp.broadcast_to(sel[:, None], (c_in, k)))
    return jnp.stack(rows, axis=0)  # (c_out, c_in, k)


def linear_mask(key, n_out, n_in, fan_in):
    # RandomFixedSparsityMask2D: per output keep `fan_in` input features.
    rows = []
    for _ in range(n_out):
        key, sub = jax.random.split(key)
        perm = jax.random.permutation(sub, n_in)
        rows.append(jnp.zeros((n_in,), jnp.float32).at[perm[:fan_in]].set(1.0))
    return jnp.stack(rows, axis=0)  # (n_out, n_in)


def bn_fold(gamma, beta, mean, var, eps=1e-5):
    scale = gamma / jnp.sqrt(var + eps)
    shift = beta - mean * scale
    return scale, shift


def init_model(cfg, key):
    num_neurons = [cfg["input_length"]] + cfg["hidden_layers"] + [cfg["output_length"]]
    L = len(num_neurons)
    convs, linears = [], []
    for i in range(1, L):
        cin, cout = num_neurons[i - 1], num_neurons[i]
        key, kw, kb, km, kg, kbe, kme, kv = jax.random.split(key, 8)
        is_conv = (i == 1) or (i <= L - 4)
        if is_conv:
            fan_in = cfg["input_fanin"] if i == 1 else cfg["conv_fanin"]
            w = 0.3 * jax.random.normal(kw, (cout, cin, 3), jnp.float32)
            b = 0.05 * jax.random.normal(kb, (cout,), jnp.float32)
            mask = conv_mask(km, cout, cin, 3, fan_in)
            gamma = 1.0 + 0.1 * jax.random.normal(kg, (cout,))
            beta = 0.1 * jax.random.normal(kbe, (cout,))
            mean = 0.1 * jax.random.normal(kme, (cout,))
            var = 0.5 + jax.random.uniform(kv, (cout,))
            s, sh = bn_fold(gamma, beta, mean, var)
            convs.append(dict(w=w, b=b, mask=mask, bn_scale=s, bn_shift=sh))
        else:
            if i == L - 3:                      # first linear: flattened conv output
                cin = cfg["1st_layer_in_f"]
                fan_in, has_bn = cfg["hidden_fanin"], True
            elif i == L - 2:
                fan_in, has_bn = cfg["hidden_fanin"], True
            else:                               # last layer: QuantIdentity, no BN
                fan_in, has_bn = cfg["output_fanin"], False
            w = 0.3 * jax.random.normal(kw, (cout, cin), jnp.float32)
            b = 0.05 * jax.random.normal(kb, (cout,), jnp.float32)
            mask = linear_mask(km, cout, cin, fan_in)
            if has_bn:
                gamma = 1.0 + 0.1 * jax.random.normal(kg, (cout,))
                beta = 0.1 * jax.random.normal(kbe, (cout,))
                mean = 0.1 * jax.random.normal(kme, (cout,))
                var = 0.5 + jax.random.uniform(kv, (cout,))
                s, sh = bn_fold(gamma, beta, mean, var)
            else:
                s, sh = jnp.ones((cout,)), jnp.zeros((cout,))
            linears.append(dict(w=w, b=b, mask=mask, bn_scale=s, bn_shift=sh))
    return dict(convs=convs, linears=linears)


# ----------------------- plain-JAX reference (self-check) -------------------
def _im2col_1d(x_ncl, k=3, pad=1):
    B, C, L = x_ncl.shape
    xp = jnp.pad(x_ncl, ((0, 0), (0, 0), (pad, pad)))
    cols = jnp.stack([xp[:, :, t:t + L] for t in range(k)], axis=-1)  # (B,C,L,k)
    cols = jnp.transpose(cols, (0, 2, 1, 3))                          # (B,L,C,k)
    return cols.reshape(B * L, C * k)


def reference_forward(x, params, cfg):
    """Same math in f32, no Pallas -- used only to sanity-check the fused kernel."""
    hb = cfg["hidden_bitwidth"]
    hp = jax.lax.Precision.HIGHEST
    x = _quant_signed(x, cfg["input_bitwidth"])            # QuantHardTanh input quant
    for p in params["convs"]:
        B, C, L = x.shape
        cout = p["w"].shape[0]
        patches = _im2col_1d(x, 3, cfg["padding"])
        w = (p["w"] * p["mask"]).reshape(cout, -1)
        y = jnp.dot(patches, w.T, precision=hp) + p["b"][None, :]
        y = y * p["bn_scale"][None, :] + p["bn_shift"][None, :]
        y = _quant_relu(y, hb)
        y = y.reshape(B, L, cout).transpose(0, 2, 1)       # back to NCW
        x = jnp.maximum(y[..., 0::2], y[..., 1::2])        # MaxPool1d(2)
    x = x.reshape(x.shape[0], -1)                          # torch flatten (c-major)
    for j, p in enumerate(params["linears"]):
        last = j == len(params["linears"]) - 1
        y = jnp.dot(x, (p["w"] * p["mask"]).T, precision=hp) + p["b"][None, :]
        y = y * p["bn_scale"][None, :] + p["bn_shift"][None, :]
        x = _quant_signed(y, cfg["output_bitwidth"]) if last else _quant_relu(y, hb)
    return x


# ---------------------------------------------------------------------------
if __name__ == "__main__":
    model_config = {
        "input_length": 2,                        # I/Q channels
        "hidden_layers": [8, 8, 16, 16, 32, 32],  # 4 conv stages + 2 hidden FCs
        "output_length": 8,
        "sequence_length": 32,
        "padding": 1,
        "input_bitwidth": 4,
        "hidden_bitwidth": 4,
        "output_bitwidth": 4,
        "input_fanin": 2,
        "conv_fanin": 2,
        "hidden_fanin": 8,
        "output_fanin": 8,
        "1st_layer_in_f": 32,                     # 16 channels * seq 2 after 4x(conv+pool)
    }

    key = jax.random.PRNGKey(0)
    kparam, kx = jax.random.split(key)
    params = init_model(model_config, kparam)

    B = 16
    x = jax.random.normal(
        kx, (B, model_config["input_length"], model_config["sequence_length"]),
        jnp.float32)

    fwd = build_fused_forward(params, model_config, B)
    out = fwd(x)
    jax.block_until_ready(out)
    assert out.shape == (B, model_config["output_length"]), out.shape
    assert bool(jnp.all(jnp.isfinite(out)))

    # Self-check against the plain-JAX f32 reference.  The kernel's bf16 MXU
    # operands can legitimately flip an activation across a quant step, which may
    # propagate to a couple of output quant steps (step = 2/7 ~= 0.286): bound the
    # max deviation and require the bulk of outputs to agree within one step.
    ref = jax.jit(lambda inp: reference_forward(inp, params, model_config))(x)
    diff = jnp.abs(out - ref)
    out_step = MAXV / float(2 ** (model_config["output_bitwidth"] - 1) - 1)
    max_diff = float(jnp.max(diff))
    frac_within_one_step = float(jnp.mean(diff <= out_step + 1e-3))
    assert max_diff < 0.9, max_diff
    assert frac_within_one_step > 0.7, frac_within_one_step

    print("KERNEL_OK")
</pallas_src>

<mosaic_0001>
module attributes {stable_mosaic.version = 11 : i64} {
  func.func @kernel(%arg0: i32, %arg1: memref<32x16x2xf32, #tpu.memory_space<vmem>>, %arg2: memref<6x8xbf16, #tpu.memory_space<vmem>>, %arg3: memref<1x8xf32, #tpu.memory_space<vmem>>, %arg4: memref<24x8xbf16, #tpu.memory_space<vmem>>, %arg5: memref<1x8xf32, #tpu.memory_space<vmem>>, %arg6: memref<24x16xbf16, #tpu.memory_space<vmem>>, %arg7: memref<1x16xf32, #tpu.memory_space<vmem>>, %arg8: memref<48x16xbf16, #tpu.memory_space<vmem>>, %arg9: memref<1x16xf32, #tpu.memory_space<vmem>>, %arg10: memref<32x32xbf16, #tpu.memory_space<vmem>>, %arg11: memref<1x32xf32, #tpu.memory_space<vmem>>, %arg12: memref<32x32xbf16, #tpu.memory_space<vmem>>, %arg13: memref<1x32xf32, #tpu.memory_space<vmem>>, %arg14: memref<32x8xbf16, #tpu.memory_space<vmem>>, %arg15: memref<1x8xf32, #tpu.memory_space<vmem>>, %arg16: memref<16x8xf32, #tpu.memory_space<vmem>>) attributes {dimension_semantics = [#tpu.dimension_semantics<parallel>], iteration_bounds = array<i64: 1>, scalar_prefetch = 0 : i64, scratch_operands = 0 : i64, tpu.core_type = #tpu.core_type<tc>, window_params = [{transform_indices = @transform_0, window_bounds = array<i64: 32, 16, 2>}, {pipeline_mode = #tpu.pipeline_mode<synchronous>, transform_indices = @transform_1, window_bounds = array<i64: 6, 8>}, {pipeline_mode = #tpu.pipeline_mode<synchronous>, transform_indices = @transform_2, window_bounds = array<i64: 1, 8>}, {pipeline_mode = #tpu.pipeline_mode<synchronous>, transform_indices = @transform_3, window_bounds = array<i64: 24, 8>}, {pipeline_mode = #tpu.pipeline_mode<synchronous>, transform_indices = @transform_4, window_bounds = array<i64: 1, 8>}, {pipeline_mode = #tpu.pipeline_mode<synchronous>, transform_indices = @transform_5, window_bounds = array<i64: 24, 16>}, {pipeline_mode = #tpu.pipeline_mode<synchronous>, transform_indices = @transform_6, window_bounds = array<i64: 1, 16>}, {pipeline_mode = #tpu.pipeline_mode<synchronous>, transform_indices = @transform_7, window_bounds = array<i64: 48, 16>}, {pipeline_mode = #tpu.pipeline_mode<synchronous>, transform_indices = @transform_8, window_bounds = array<i64: 1, 16>}, {pipeline_mode = #tpu.pipeline_mode<synchronous>, transform_indices = @transform_9, window_bounds = array<i64: 32, 32>}, {pipeline_mode = #tpu.pipeline_mode<synchronous>, transform_indices = @transform_10, window_bounds = array<i64: 1, 32>}, {pipeline_mode = #tpu.pipeline_mode<synchronous>, transform_indices = @transform_11, window_bounds = array<i64: 32, 32>}, {pipeline_mode = #tpu.pipeline_mode<synchronous>, transform_indices = @transform_12, window_bounds = array<i64: 1, 32>}, {pipeline_mode = #tpu.pipeline_mode<synchronous>, transform_indices = @transform_13, window_bounds = array<i64: 32, 8>}, {pipeline_mode = #tpu.pipeline_mode<synchronous>, transform_indices = @transform_14, window_bounds = array<i64: 1, 8>}, {transform_indices = @transform_15, window_bounds = array<i64: 16, 8>}]} {
    %c0 = arith.constant 0 : index
    %c0_0 = arith.constant 0 : index
    %c0_1 = arith.constant 0 : index
    %0 = vector.load %arg1[%c0, %c0_0, %c0_1] : memref<32x16x2xf32, #tpu.memory_space<vmem>>, vector<32x16x2xf32>
    %1 = vector.shape_cast %0 : vector<32x16x2xf32> to vector<512x2xf32>
    %cst = arith.constant 3.500000e+00 : f32
    %2 = vector.broadcast %cst : f32 to vector<512x2xf32>
    %3 = arith.mulf %1, %2 : vector<512x2xf32>
    %cst_2 = arith.constant 5.000000e-01 : f32
    %4 = vector.broadcast %cst_2 : f32 to vector<512x2xf32>
    %5 = arith.addf %3, %4 : vector<512x2xf32>
    %6 = math.floor %5 : vector<512x2xf32>
    %cst_3 = arith.constant -7.000000e+00 : f32
    %cst_4 = arith.constant 7.000000e+00 : f32
    %7 = vector.broadcast %cst_3 : f32 to vector<512x2xf32>
    %8 = arith.maximumf %7, %6 : vector<512x2xf32>
    %9 = vector.broadcast %cst_4 : f32 to vector<512x2xf32>
    %10 = arith.minimumf %9, %8 : vector<512x2xf32>
    %cst_5 = arith.constant 0.285714298 : f32
    %11 = vector.broadcast %cst_5 : f32 to vector<512x2xf32>
    %12 = arith.mulf %10, %11 : vector<512x2xf32>
    %cst_6 = arith.constant 0.000000e+00 : f32
    %13 = vector.broadcast %cst_6 : f32 to vector<16x2xf32>
    %14 = vector.extract_strided_slice %12 {offsets = [0, 0], sizes = [496, 2], strides = [1, 1]} : vector<512x2xf32> to vector<496x2xf32>
    %15 = tpu.concatenate %13, %14 in 0 : vector<16x2xf32>, vector<496x2xf32> -> vector<512x2xf32>
    %16 = vector.extract_strided_slice %12 {offsets = [16, 0], sizes = [496, 2], strides = [1, 1]} : vector<512x2xf32> to vector<496x2xf32>
    %17 = tpu.concatenate %16, %13 in 0 : vector<496x2xf32>, vector<16x2xf32> -> vector<512x2xf32>
    %18 = tpu.concatenate %15, %12, %17 in 1 : vector<512x2xf32>, vector<512x2xf32>, vector<512x2xf32> -> vector<512x6xf32>
    %19 = arith.truncf %18 : vector<512x6xf32> to vector<512x6xbf16>
    %c0_7 = arith.constant 0 : index
    %c0_8 = arith.constant 0 : index
    %20 = vector.load %arg2[%c0_7, %c0_8] : memref<6x8xbf16, #tpu.memory_space<vmem>>, vector<6x8xbf16>
    %cst_9 = arith.constant dense<0.000000e+00> : vector<512x8xf32>
    %21 = tpu.matmul %19, %20, %cst_9 {dimension_numbers = #tpu.dot_dimension_numbers<[1], [0], [0], [1], [0, 0, 1, 1], [], []>} : vector<512x6xbf16>, vector<6x8xbf16>, vector<512x8xf32> -> vector<512x8xf32>
    %c0_10 = arith.constant 0 : index
    %c0_11 = arith.constant 0 : index
    %22 = vector.load %arg3[%c0_10, %c0_11] : memref<1x8xf32, #tpu.memory_space<vmem>>, vector<1x8xf32>
    %23 = vector.broadcast %22 : vector<1x8xf32> to vector<512x8xf32>
    %24 = arith.addf %21, %23 : vector<512x8xf32>
    %cst_12 = arith.constant 0.000000e+00 : f32
    %25 = vector.broadcast %cst_12 : f32 to vector<512x8xf32>
    %26 = arith.maximumf %24, %25 : vector<512x8xf32>
    %cst_13 = arith.constant 7.500000e+00 : f32
    %27 = vector.broadcast %cst_13 : f32 to vector<512x8xf32>
    %28 = arith.mulf %26, %27 : vector<512x8xf32>
    %cst_14 = arith.constant 5.000000e-01 : f32
    %29 = vector.broadcast %cst_14 : f32 to vector<512x8xf32>
    %30 = arith.addf %28, %29 : vector<512x8xf32>
    %31 = math.floor %30 : vector<512x8xf32>
    %cst_15 = arith.constant 0.000000e+00 : f32
    %cst_16 = arith.constant 1.500000e+01 : f32
    %32 = vector.broadcast %cst_15 : f32 to vector<512x8xf32>
    %33 = arith.maximumf %32, %31 : vector<512x8xf32>
    %34 = vector.broadcast %cst_16 : f32 to vector<512x8xf32>
    %35 = arith.minimumf %34, %33 : vector<512x8xf32>
    %cst_17 = arith.constant 0.13333334 : f32
    %36 = vector.broadcast %cst_17 : f32 to vector<512x8xf32>
    %37 = arith.mulf %35, %36 : vector<512x8xf32>
    %38 = vector.shape_cast %37 : vector<512x8xf32> to vector<16x32x8xf32>
    %39 = vector.extract_strided_slice %38 {offsets = [0, 0, 0], sizes = [16, 16, 8], strides = [1, 1, 1]} : vector<16x32x8xf32> to vector<16x16x8xf32>
    %40 = vector.extract_strided_slice %38 {offsets = [0, 16, 0], sizes = [16, 16, 8], strides = [1, 1, 1]} : vector<16x32x8xf32> to vector<16x16x8xf32>
    %41 = arith.maximumf %39, %40 : vector<16x16x8xf32>
    %42 = vector.shape_cast %41 : vector<16x16x8xf32> to vector<256x8xf32>
    %cst_18 = arith.constant 0.000000e+00 : f32
    %43 = vector.broadcast %cst_18 : f32 to vector<16x8xf32>
    %44 = vector.extract_strided_slice %42 {offsets = [0, 0], sizes = [240, 8], strides = [1, 1]} : vector<256x8xf32> to vector<240x8xf32>
    %45 = tpu.concatenate %43, %44 in 0 : vector<16x8xf32>, vector<240x8xf32> -> vector<256x8xf32>
    %46 = vector.extract_strided_slice %42 {offsets = [16, 0], sizes = [240, 8], strides = [1, 1]} : vector<256x8xf32> to vector<240x8xf32>
    %47 = tpu.concatenate %46, %43 in 0 : vector<240x8xf32>, vector<16x8xf32> -> vector<256x8xf32>
    %48 = tpu.concatenate %45, %42, %47 in 1 : vector<256x8xf32>, vector<256x8xf32>, vector<256x8xf32> -> vector<256x24xf32>
    %49 = arith.truncf %48 : vector<256x24xf32> to vector<256x24xbf16>
    %c0_19 = arith.constant 0 : index
    %c0_20 = arith.constant 0 : index
    %50 = vector.load %arg4[%c0_19, %c0_20] : memref<24x8xbf16, #tpu.memory_space<vmem>>, vector<24x8xbf16>
    %cst_21 = arith.constant dense<0.000000e+00> : vector<256x8xf32>
    %51 = tpu.matmul %49, %50, %cst_21 {dimension_numbers = #tpu.dot_dimension_numbers<[1], [0], [0], [1], [0, 0, 1, 1], [], []>} : vector<256x24xbf16>, vector<24x8xbf16>, vector<256x8xf32> -> vector<256x8xf32>
    %c0_22 = arith.constant 0 : index
    %c0_23 = arith.constant 0 : index
    %52 = vector.load %arg5[%c0_22, %c0_23] : memref<1x8xf32, #tpu.memory_space<vmem>>, vector<1x8xf32>
    %53 = vector.broadcast %52 : vector<1x8xf32> to vector<256x8xf32>
    %54 = arith.addf %51, %53 : vector<256x8xf32>
    %cst_24 = arith.constant 0.000000e+00 : f32
    %55 = vector.broadcast %cst_24 : f32 to vector<256x8xf32>
    %56 = arith.maximumf %54, %55 : vector<256x8xf32>
    %cst_25 = arith.constant 7.500000e+00 : f32
    %57 = vector.broadcast %cst_25 : f32 to vector<256x8xf32>
    %58 = arith.mulf %56, %57 : vector<256x8xf32>
    %cst_26 = arith.constant 5.000000e-01 : f32
    %59 = vector.broadcast %cst_26 : f32 to vector<256x8xf32>
    %60 = arith.addf %58, %59 : vector<256x8xf32>
    %61 = math.floor %60 : vector<256x8xf32>
    %cst_27 = arith.constant 0.000000e+00 : f32
    %cst_28 = arith.constant 1.500000e+01 : f32
    %62 = vector.broadcast %cst_27 : f32 to vector<256x8xf32>
    %63 = arith.maximumf %62, %61 : vector<256x8xf32>
    %64 = vector.broadcast %cst_28 : f32 to vector<256x8xf32>
    %65 = arith.minimumf %64, %63 : vector<256x8xf32>
    %cst_29 = arith.constant 0.13333334 : f32
    %66 = vector.broadcast %cst_29 : f32 to vector<256x8xf32>
    %67 = arith.mulf %65, %66 : vector<256x8xf32>
    %68 = vector.shape_cast %67 : vector<256x8xf32> to vector<8x32x8xf32>
    %69 = vector.extract_strided_slice %68 {offsets = [0, 0, 0], sizes = [8, 16, 8], strides = [1, 1, 1]} : vector<8x32x8xf32> to vector<8x16x8xf32>
    %70 = vector.extract_strided_slice %68 {offsets = [0, 16, 0], sizes = [8, 16, 8], strides = [1, 1, 1]} : vector<8x32x8xf32> to vector<8x16x8xf32>
    %71 = arith.maximumf %69, %70 : vector<8x16x8xf32>
    %72 = vector.shape_cast %71 : vector<8x16x8xf32> to vector<128x8xf32>
    %cst_30 = arith.constant 0.000000e+00 : f32
    %73 = vector.broadcast %cst_30 : f32 to vector<16x8xf32>
    %74 = vector.extract_strided_slice %72 {offsets = [0, 0], sizes = [112, 8], strides = [1, 1]} : vector<128x8xf32> to vector<112x8xf32>
    %75 = tpu.concatenate %73, %74 in 0 : vector<16x8xf32>, vector<112x8xf32> -> vector<128x8xf32>
    %76 = vector.extract_strided_slice %72 {offsets = [16, 0], sizes = [112, 8], strides = [1, 1]} : vector<128x8xf32> to vector<112x8xf32>
    %77 = tpu.concatenate %76, %73 in 0 : vector<112x8xf32>, vector<16x8xf32> -> vector<128x8xf32>
    %78 = tpu.concatenate %75, %72, %77 in 1 : vector<128x8xf32>, vector<128x8xf32>, vector<128x8xf32> -> vector<128x24xf32>
    %79 = arith.truncf %78 : vector<128x24xf32> to vector<128x24xbf16>
    %c0_31 = arith.constant 0 : index
    %c0_32 = arith.constant 0 : index
    %80 = vector.load %arg6[%c0_31, %c0_32] : memref<24x16xbf16, #tpu.memory_space<vmem>>, vector<24x16xbf16>
    %cst_33 = arith.constant dense<0.000000e+00> : vector<128x16xf32>
    %81 = tpu.matmul %79, %80, %cst_33 {dimension_numbers = #tpu.dot_dimension_numbers<[1], [0], [0], [1], [0, 0, 1, 1], [], []>} : vector<128x24xbf16>, vector<24x16xbf16>, vector<128x16xf32> -> vector<128x16xf32>
    %c0_34 = arith.constant 0 : index
    %c0_35 = arith.constant 0 : index
    %82 = vector.load %arg7[%c0_34, %c0_35] : memref<1x16xf32, #tpu.memory_space<vmem>>, vector<1x16xf32>
    %83 = vector.broadcast %82 : vector<1x16xf32> to vector<128x16xf32>
    %84 = arith.addf %81, %83 : vector<128x16xf32>
    %cst_36 = arith.constant 0.000000e+00 : f32
    %85 = vector.broadcast %cst_36 : f32 to vector<128x16xf32>
    %86 = arith.maximumf %84, %85 : vector<128x16xf32>
    %cst_37 = arith.constant 7.500000e+00 : f32
    %87 = vector.broadcast %cst_37 : f32 to vector<128x16xf32>
    %88 = arith.mulf %86, %87 : vector<128x16xf32>
    %cst_38 = arith.constant 5.000000e-01 : f32
    %89 = vector.broadcast %cst_38 : f32 to vector<128x16xf32>
    %90 = arith.addf %88, %89 : vector<128x16xf32>
    %91 = math.floor %90 : vector<128x16xf32>
    %cst_39 = arith.constant 0.000000e+00 : f32
    %cst_40 = arith.constant 1.500000e+01 : f32
    %92 = vector.broadcast %cst_39 : f32 to vector<128x16xf32>
    %93 = arith.maximumf %92, %91 : vector<128x16xf32>
    %94 = vector.broadcast %cst_40 : f32 to vector<128x16xf32>
    %95 = arith.minimumf %94, %93 : vector<128x16xf32>
    %cst_41 = arith.constant 0.13333334 : f32
    %96 = vector.broadcast %cst_41 : f32 to vector<128x16xf32>
    %97 = arith.mulf %95, %96 : vector<128x16xf32>
    %98 = vector.shape_cast %97 : vector<128x16xf32> to vector<4x32x16xf32>
    %99 = vector.extract_strided_slice %98 {offsets = [0, 0, 0], sizes = [4, 16, 16], strides = [1, 1, 1]} : vector<4x32x16xf32> to vector<4x16x16xf32>
    %100 = vector.extract_strided_slice %98 {offsets = [0, 16, 0], sizes = [4, 16, 16], strides = [1, 1, 1]} : vector<4x32x16xf32> to vector<4x16x16xf32>
    %101 = arith.maximumf %99, %100 : vector<4x16x16xf32>
    %102 = vector.shape_cast %101 : vector<4x16x16xf32> to vector<64x16xf32>
    %cst_42 = arith.constant 0.000000e+00 : f32
    %103 = vector.broadcast %cst_42 : f32 to vector<16x16xf32>
    %104 = vector.extract_strided_slice %102 {offsets = [0, 0], sizes = [48, 16], strides = [1, 1]} : vector<64x16xf32> to vector<48x16xf32>
    %105 = tpu.concatenate %103, %104 in 0 : vector<16x16xf32>, vector<48x16xf32> -> vector<64x16xf32>
    %106 = vector.extract_strided_slice %102 {offsets = [16, 0], sizes = [48, 16], strides = [1, 1]} : vector<64x16xf32> to vector<48x16xf32>
    %107 = tpu.concatenate %106, %103 in 0 : vector<48x16xf32>, vector<16x16xf32> -> vector<64x16xf32>
    %108 = tpu.concatenate %105, %102, %107 in 1 : vector<64x16xf32>, vector<64x16xf32>, vector<64x16xf32> -> vector<64x48xf32>
    %109 = arith.truncf %108 : vector<64x48xf32> to vector<64x48xbf16>
    %c0_43 = arith.constant 0 : index
    %c0_44 = arith.constant 0 : index
    %110 = vector.load %arg8[%c0_43, %c0_44] : memref<48x16xbf16, #tpu.memory_space<vmem>>, vector<48x16xbf16>
    %cst_45 = arith.constant dense<0.000000e+00> : vector<64x16xf32>
    %111 = tpu.matmul %109, %110, %cst_45 {dimension_numbers = #tpu.dot_dimension_numbers<[1], [0], [0], [1], [0, 0, 1, 1], [], []>} : vector<64x48xbf16>, vector<48x16xbf16>, vector<64x16xf32> -> vector<64x16xf32>
    %c0_46 = arith.constant 0 : index
    %c0_47 = arith.constant 0 : index
    %112 = vector.load %arg9[%c0_46, %c0_47] : memref<1x16xf32, #tpu.memory_space<vmem>>, vector<1x16xf32>
    %113 = vector.broadcast %112 : vector<1x16xf32> to vector<64x16xf32>
    %114 = arith.addf %111, %113 : vector<64x16xf32>
    %cst_48 = arith.constant 0.000000e+00 : f32
    %115 = vector.broadcast %cst_48 : f32 to vector<64x16xf32>
    %116 = arith.maximumf %114, %115 : vector<64x16xf32>
    %cst_49 = arith.constant 7.500000e+00 : f32
    %117 = vector.broadcast %cst_49 : f32 to vector<64x16xf32>
    %118 = arith.mulf %116, %117 : vector<64x16xf32>
    %cst_50 = arith.constant 5.000000e-01 : f32
    %119 = vector.broadcast %cst_50 : f32 to vector<64x16xf32>
    %120 = arith.addf %118, %119 : vector<64x16xf32>
    %121 = math.floor %120 : vector<64x16xf32>
    %cst_51 = arith.constant 0.000000e+00 : f32
    %cst_52 = arith.constant 1.500000e+01 : f32
    %122 = vector.broadcast %cst_51 : f32 to vector<64x16xf32>
    %123 = arith.maximumf %122, %121 : vector<64x16xf32>
    %124 = vector.broadcast %cst_52 : f32 to vector<64x16xf32>
    %125 = arith.minimumf %124, %123 : vector<64x16xf32>
    %cst_53 = arith.constant 0.13333334 : f32
    %126 = vector.broadcast %cst_53 : f32 to vector<64x16xf32>
    %127 = arith.mulf %125, %126 : vector<64x16xf32>
    %128 = vector.shape_cast %127 : vector<64x16xf32> to vector<2x32x16xf32>
    %129 = vector.extract_strided_slice %128 {offsets = [0, 0, 0], sizes = [2, 16, 16], strides = [1, 1, 1]} : vector<2x32x16xf32> to vector<2x16x16xf32>
    %130 = vector.extract_strided_slice %128 {offsets = [0, 16, 0], sizes = [2, 16, 16], strides = [1, 1, 1]} : vector<2x32x16xf32> to vector<2x16x16xf32>
    %131 = arith.maximumf %129, %130 : vector<2x16x16xf32>
    %132 = vector.shape_cast %131 : vector<2x16x16xf32> to vector<32x16xf32>
    %133 = vector.extract_strided_slice %132 {offsets = [0, 0], sizes = [16, 16], strides = [1, 1]} : vector<32x16xf32> to vector<16x16xf32>
    %134 = vector.extract_strided_slice %132 {offsets = [16, 0], sizes = [16, 16], strides = [1, 1]} : vector<32x16xf32> to vector<16x16xf32>
    %135 = tpu.concatenate %133, %134 in 1 : vector<16x16xf32>, vector<16x16xf32> -> vector<16x32xf32>
    %136 = arith.truncf %135 : vector<16x32xf32> to vector<16x32xbf16>
    %c0_54 = arith.constant 0 : index
    %c0_55 = arith.constant 0 : index
    %137 = vector.load %arg10[%c0_54, %c0_55] : memref<32x32xbf16, #tpu.memory_space<vmem>>, vector<32x32xbf16>
    %cst_56 = arith.constant dense<0.000000e+00> : vector<16x32xf32>
    %138 = tpu.matmul %136, %137, %cst_56 {dimension_numbers = #tpu.dot_dimension_numbers<[1], [0], [0], [1], [0, 0, 1, 1], [], []>} : vector<16x32xbf16>, vector<32x32xbf16>, vector<16x32xf32> -> vector<16x32xf32>
    %c0_57 = arith.constant 0 : index
    %c0_58 = arith.constant 0 : index
    %139 = vector.load %arg11[%c0_57, %c0_58] : memref<1x32xf32, #tpu.memory_space<vmem>>, vector<1x32xf32>
    %140 = vector.broadcast %139 : vector<1x32xf32> to vector<16x32xf32>
    %141 = arith.addf %138, %140 : vector<16x32xf32>
    %cst_59 = arith.constant 0.000000e+00 : f32
    %142 = vector.broadcast %cst_59 : f32 to vector<16x32xf32>
    %143 = arith.maximumf %141, %142 : vector<16x32xf32>
    %cst_60 = arith.constant 7.500000e+00 : f32
    %144 = vector.broadcast %cst_60 : f32 to vector<16x32xf32>
    %145 = arith.mulf %143, %144 : vector<16x32xf32>
    %cst_61 = arith.constant 5.000000e-01 : f32
    %146 = vector.broadcast %cst_61 : f32 to vector<16x32xf32>
    %147 = arith.addf %145, %146 : vector<16x32xf32>
    %148 = math.floor %147 : vector<16x32xf32>
    %cst_62 = arith.constant 0.000000e+00 : f32
    %cst_63 = arith.constant 1.500000e+01 : f32
    %149 = vector.broadcast %cst_62 : f32 to vector<16x32xf32>
    %150 = arith.maximumf %149, %148 : vector<16x32xf32>
    %151 = vector.broadcast %cst_63 : f32 to vector<16x32xf32>
    %152 = arith.minimumf %151, %150 : vector<16x32xf32>
    %cst_64 = arith.constant 0.13333334 : f32
    %153 = vector.broadcast %cst_64 : f32 to vector<16x32xf32>
    %154 = arith.mulf %152, %153 : vector<16x32xf32>
    %155 = arith.truncf %154 : vector<16x32xf32> to vector<16x32xbf16>
    %c0_65 = arith.constant 0 : index
    %c0_66 = arith.constant 0 : index
    %156 = vector.load %arg12[%c0_65, %c0_66] : memref<32x32xbf16, #tpu.memory_space<vmem>>, vector<32x32xbf16>
    %cst_67 = arith.constant dense<0.000000e+00> : vector<16x32xf32>
    %157 = tpu.matmul %155, %156, %cst_67 {dimension_numbers = #tpu.dot_dimension_numbers<[1], [0], [0], [1], [0, 0, 1, 1], [], []>} : vector<16x32xbf16>, vector<32x32xbf16>, vector<16x32xf32> -> vector<16x32xf32>
    %c0_68 = arith.constant 0 : index
    %c0_69 = arith.constant 0 : index
    %158 = vector.load %arg13[%c0_68, %c0_69] : memref<1x32xf32, #tpu.memory_space<vmem>>, vector<1x32xf32>
    %159 = vector.broadcast %158 : vector<1x32xf32> to vector<16x32xf32>
    %160 = arith.addf %157, %159 : vector<16x32xf32>
    %cst_70 = arith.constant 0.000000e+00 : f32
    %161 = vector.broadcast %cst_70 : f32 to vector<16x32xf32>
    %162 = arith.maximumf %160, %161 : vector<16x32xf32>
    %cst_71 = arith.constant 7.500000e+00 : f32
    %163 = vector.broadcast %cst_71 : f32 to vector<16x32xf32>
    %164 = arith.mulf %162, %163 : vector<16x32xf32>
    %cst_72 = arith.constant 5.000000e-01 : f32
    %165 = vector.broadcast %cst_72 : f32 to vector<16x32xf32>
    %166 = arith.addf %164, %165 : vector<16x32xf32>
    %167 = math.floor %166 : vector<16x32xf32>
    %cst_73 = arith.constant 0.000000e+00 : f32
    %cst_74 = arith.constant 1.500000e+01 : f32
    %168 = vector.broadcast %cst_73 : f32 to vector<16x32xf32>
    %169 = arith.maximumf %168, %167 : vector<16x32xf32>
    %170 = vector.broadcast %cst_74 : f32 to vector<16x32xf32>
    %171 = arith.minimumf %170, %169 : vector<16x32xf32>
    %cst_75 = arith.constant 0.13333334 : f32
    %172 = vector.broadcast %cst_75 : f32 to vector<16x32xf32>
    %173 = arith.mulf %171, %172 : vector<16x32xf32>
    %174 = arith.truncf %173 : vector<16x32xf32> to vector<16x32xbf16>
    %c0_76 = arith.constant 0 : index
    %c0_77 = arith.constant 0 : index
    %175 = vector.load %arg14[%c0_76, %c0_77] : memref<32x8xbf16, #tpu.memory_space<vmem>>, vector<32x8xbf16>
    %cst_78 = arith.constant dense<0.000000e+00> : vector<16x8xf32>
    %176 = tpu.matmul %174, %175, %cst_78 {dimension_numbers = #tpu.dot_dimension_numbers<[1], [0], [0], [1], [0, 0, 1, 1], [], []>} : vector<16x32xbf16>, vector<32x8xbf16>, vector<16x8xf32> -> vector<16x8xf32>
    %c0_79 = arith.constant 0 : index
    %c0_80 = arith.constant 0 : index
    %177 = vector.load %arg15[%c0_79, %c0_80] : memref<1x8xf32, #tpu.memory_space<vmem>>, vector<1x8xf32>
    %178 = vector.broadcast %177 : vector<1x8xf32> to vector<16x8xf32>
    %179 = arith.addf %176, %178 : vector<16x8xf32>
    %cst_81 = arith.constant 3.500000e+00 : f32
    %180 = vector.broadcast %cst_81 : f32 to vector<16x8xf32>
    %181 = arith.mulf %179, %180 : vector<16x8xf32>
    %cst_82 = arith.constant 5.000000e-01 : f32
    %182 = vector.broadcast %cst_82 : f32 to vector<16x8xf32>
    %183 = arith.addf %181, %182 : vector<16x8xf32>
    %184 = math.floor %183 : vector<16x8xf32>
    %cst_83 = arith.constant -7.000000e+00 : f32
    %cst_84 = arith.constant 7.000000e+00 : f32
    %185 = vector.broadcast %cst_83 : f32 to vector<16x8xf32>
    %186 = arith.maximumf %185, %184 : vector<16x8xf32>
    %187 = vector.broadcast %cst_84 : f32 to vector<16x8xf32>
    %188 = arith.minimumf %187, %186 : vector<16x8xf32>
    %cst_85 = arith.constant 0.285714298 : f32
    %189 = vector.broadcast %cst_85 : f32 to vector<16x8xf32>
    %190 = arith.mulf %188, %189 : vector<16x8xf32>
    %c0_86 = arith.constant 0 : index
    %c0_87 = arith.constant 0 : index
    %191 = vector.load %arg16[%c0_86, %c0_87] : memref<16x8xf32, #tpu.memory_space<vmem>>, vector<16x8xf32>
    tpu.vector_store %arg16[%c0_86, %c0_87], %190 {strides = array<i32>} : memref<16x8xf32, #tpu.memory_space<vmem>>, vector<16x8xf32>,
    return
  }
  func.func @transform_0(%arg0: i32) -> (i32, i32, i32) {
    %c0_i32 = arith.constant 0 : i32
    %c0_i32_0 = arith.constant 0 : i32
    %c0_i32_1 = arith.constant 0 : i32
    return %c0_i32, %arg0, %c0_i32_0 : i32, i32, i32
  }
  func.func @transform_1(%arg0: i32) -> (i32, i32) {
    %c0_i32 = arith.constant 0 : i32
    %c0_i32_0 = arith.constant 0 : i32
    %c0_i32_1 = arith.constant 0 : i32
    return %c0_i32, %c0_i32_0 : i32, i32
  }
  func.func @transform_2(%arg0: i32) -> (i32, i32) {
    %c0_i32 = arith.constant 0 : i32
    %c0_i32_0 = arith.constant 0 : i32
    %c0_i32_1 = arith.constant 0 : i32
    return %c0_i32, %c0_i32_0 : i32, i32
  }
  func.func @transform_3(%arg0: i32) -> (i32, i32) {
    %c0_i32 = arith.constant 0 : i32
    %c0_i32_0 = arith.constant 0 : i32
    %c0_i32_1 = arith.constant 0 : i32
    return %c0_i32, %c0_i32_0 : i32, i32
  }
  func.func @transform_4(%arg0: i32) -> (i32, i32) {
    %c0_i32 = arith.constant 0 : i32
    %c0_i32_0 = arith.constant 0 : i32
    %c0_i32_1 = arith.constant 0 : i32
    return %c0_i32, %c0_i32_0 : i32, i32
  }
  func.func @transform_5(%arg0: i32) -> (i32, i32) {
    %c0_i32 = arith.constant 0 : i32
    %c0_i32_0 = arith.constant 0 : i32
    %c0_i32_1 = arith.constant 0 : i32
    return %c0_i32, %c0_i32_0 : i32, i32
  }
  func.func @transform_6(%arg0: i32) -> (i32, i32) {
    %c0_i32 = arith.constant 0 : i32
    %c0_i32_0 = arith.constant 0 : i32
    %c0_i32_1 = arith.constant 0 : i32
    return %c0_i32, %c0_i32_0 : i32, i32
  }
  func.func @transform_7(%arg0: i32) -> (i32, i32) {
    %c0_i32 = arith.constant 0 : i32
    %c0_i32_0 = arith.constant 0 : i32
    %c0_i32_1 = arith.constant 0 : i32
    return %c0_i32, %c0_i32_0 : i32, i32
  }
  func.func @transform_8(%arg0: i32) -> (i32, i32) {
    %c0_i32 = arith.constant 0 : i32
    %c0_i32_0 = arith.constant 0 : i32
    %c0_i32_1 = arith.constant 0 : i32
    return %c0_i32, %c0_i32_0 : i32, i32
  }
  func.func @transform_9(%arg0: i32) -> (i32, i32) {
    %c0_i32 = arith.constant 0 : i32
    %c0_i32_0 = arith.constant 0 : i32
    %c0_i32_1 = arith.constant 0 : i32
    return %c0_i32, %c0_i32_0 : i32, i32
  }
  func.func @transform_10(%arg0: i32) -> (i32, i32) {
    %c0_i32 = arith.constant 0 : i32
    %c0_i32_0 = arith.constant 0 : i32
    %c0_i32_1 = arith.constant 0 : i32
    return %c0_i32, %c0_i32_0 : i32, i32
  }
  func.func @transform_11(%arg0: i32) -> (i32, i32) {
    %c0_i32 = arith.constant 0 : i32
    %c0_i32_0 = arith.constant 0 : i32
    %c0_i32_1 = arith.constant 0 : i32
    return %c0_i32, %c0_i32_0 : i32, i32
  }
  func.func @transform_12(%arg0: i32) -> (i32, i32) {
    %c0_i32 = arith.constant 0 : i32
    %c0_i32_0 = arith.constant 0 : i32
    %c0_i32_1 = arith.constant 0 : i32
    return %c0_i32, %c0_i32_0 : i32, i32
  }
  func.func @transform_13(%arg0: i32) -> (i32, i32) {
    %c0_i32 = arith.constant 0 : i32
    %c0_i32_0 = arith.constant 0 : i32
    %c0_i32_1 = arith.constant 0 : i32
    return %c0_i32, %c0_i32_0 : i32, i32
  }
  func.func @transform_14(%arg0: i32) -> (i32, i32) {
    %c0_i32 = arith.constant 0 : i32
    %c0_i32_0 = arith.constant 0 : i32
    %c0_i32_1 = arith.constant 0 : i32
    return %c0_i32, %c0_i32_0 : i32, i32
  }
  func.func @transform_15(%arg0: i32) -> (i32, i32) {
    %c0_i32 = arith.constant 0 : i32
    %c0_i32_0 = arith.constant 0 : i32
    return %arg0, %c0_i32 : i32, i32
  }
}

</mosaic_0001>

<bundles_post_ra>
// kernel: fwd.1
= control target key start
LH: loop header
LB: loop body
LE: loop exit
PB: predicated region body
PF: predicated region fallthrough
CT: control target
= control target key end

     0   :  { %s4668_s16 = smov 4   ;;  %s4669_s17 = smov 2   ;;  %vm1212_vm0 = vcmask 1042432   ;;  %vm945_vm1 = vcmask 15360   ;;  %vm1010_vm2 = vcmask 31744   ;;  %vm1115_vm3 = vcmask 48128   ;;  %s6057_s0 = inlined_call_operand.vmem [shape: f32[32,16,2], index: 0, kind: input, shape index: {}]   ;;  %s6058_s1 = inlined_call_operand.vmem [shape: bf16[6,8], index: 1, kind: input, shape index: {}]   ;;  %s6059_s2 = inlined_call_operand.vmem [shape: f32[1,8], index: 2, kind: input, shape index: {}]   ;;  %s6060_s3 = inlined_call_operand.vmem [shape: bf16[24,8], index: 3, kind: input, shape index: {}]   ;;  %s6061_s4 = inlined_call_operand.vmem [shape: f32[1,8], index: 4, kind: input, shape index: {}]   ;;  %s6062_s5 = inlined_call_operand.vmem [shape: bf16[24,16], index: 5, kind: input, shape index: {}]   ;;  %s6063_s6 = inlined_call_operand.vmem [shape: f32[1,16], index: 6, kind: input, shape index: {}]   ;;  %s6064_s7 = inlined_call_operand.vmem [shape: bf16[48,16], index: 7, kind: input, shape index: {}]   ;;  %s6065_s9 = inlined_call_operand.vmem [shape: bf16[32,32], index: 9, kind: input, shape index: {}]   ;;  %s6066_s8 = inlined_call_operand.vmem [shape: f32[1,16], index: 8, kind: input, shape index: {}]   ;;  %s6067_s11 = inlined_call_operand.vmem [shape: bf16[32,32], index: 11, kind: input, shape index: {}]   ;;  %s6068_s13 = inlined_call_operand.vmem [shape: bf16[32,8], index: 13, kind: input, shape index: {}]   ;;  %s6069_s10 = inlined_call_operand.vmem [shape: f32[1,32], index: 10, kind: input, shape index: {}]   ;;  %s6070_s12 = inlined_call_operand.vmem [shape: f32[1,32], index: 12, kind: input, shape index: {}]   ;;  %s6071_s14 = inlined_call_operand.vmem [shape: f32[1,8], index: 14, kind: input, shape index: {}]   ;;  %s6072_s15 = inlined_call_operand.vmem [shape: f32[16,8], index: 15, kind: output, shape index: {}]  }
   0x1   :  { %v53_v0 = vld [vmem:[%s6057_s0 + $0x10] sm:$0xff]  ;;  %v54_v1 = vld [vmem:[%s6057_s0 + $0x18] sm:$0xff]  ;;  %v51_v2 = vld [vmem:[%s6057_s0] sm:$0xff]  ;;  %s4672_s29 = smov 16   ;;  %vm2356_vm4 = vcmask 1043456   ;;  %vm2206_vm5 = vcmask 64512  }
   0x2   :  { %v117_v3 = vmul.f32 3.5, %v53_v0  ;;  %v118_v4 = vmul.f32 3.5, %v54_v1  ;;  %v52_v5 = vld [vmem:[%s6057_s0 + $0x8] sm:$0xff]  ;;  %v115_v6 = vmul.f32 3.5, %v51_v2  ;;  %v55_v7 = vld [vmem:[%s6057_s0 + $0x20] sm:$0xff]  ;;  %v57_v12 = vld [vmem:[%s6057_s0 + $0x30] sm:$0xff] }
   0x3   :  { %v56_v8 = vld [vmem:[%s6057_s0 + $0x28] sm:$0xff]  ;;  %v116_v9 = vmul.f32 3.5, %v52_v5  ;;  %v119_v10 = vmul.f32 3.5, %v55_v7  ;;  %v58_v13 = vld [vmem:[%s6057_s0 + $0x38] sm:$0xff]  ;;  %v121_v17 = vmul.f32 3.5, %v57_v12  ;;  %v59_v38 = vld [vmem:[%s6057_s0 + $0x40] sm:$0xff] }
   0x4   :  { %v120_v11 = vmul.f32 3.5, %v56_v8  ;;  %v181_v14 = vadd.f32 0.5, %v117_v3  ;;  %v182_v15 = vadd.f32 0.5, %v118_v4  ;;  %v179_v16 = vadd.f32 0.5, %v115_v6  ;;  %v60_v39 = vld [vmem:[%s6057_s0 + $0x48] sm:$0xff]  ;;  %v61_v40 = vld [vmem:[%s6057_s0 + $0x50] sm:$0xff] }
   0x5   :  { %v180_v18 = vadd.f32 0.5, %v116_v9  ;;  %v183_v19 = vadd.f32 0.5, %v119_v10  ;;  %v122_v21 = vmul.f32 3.5, %v58_v13  ;;  %v185_v25 = vadd.f32 0.5, %v121_v17  ;;  %v62_v50 = vld [vmem:[%s6057_s0 + $0x58] sm:$0xff]  ;;  %v63_v51 = vld [vmem:[%s6057_s0 + $0x60] sm:$0xff] }
   0x6   :  { %v184_v20 = vadd.f32 0.5, %v120_v11  ;;  %v245_v22 = vfloor.f32 %v181_v14  ;;  %v246_v23 = vfloor.f32 %v182_v15  ;;  %v243_v24 = vfloor.f32 %v179_v16  ;;  %v64_v52 = vld [vmem:[%s6057_s0 + $0x68] sm:$0xff]  ;;  %v65_v0 = vld [vmem:[%s6057_s0 + $0x70] sm:$0xff]  ;;  %v66_v1 = vld [vmem:[%s6057_s0 + $0x78] sm:$0xff] }
   0x7   :  { %v244_v26 = vfloor.f32 %v180_v18  ;;  %v247_v27 = vfloor.f32 %v183_v19  ;;  %v186_v29 = vadd.f32 0.5, %v122_v21  ;;  %v249_v33 = vfloor.f32 %v185_v25  ;;  %v67_v25 = vld [vmem:[%s6057_s0 + $0x80] sm:$0xff] }
   0x8   :  { %v248_v28 = vfloor.f32 %v184_v20  ;;  %v3675_v30 = vclamps-f32 %v245_v22, 7.0  ;;  %v3676_v31 = vclamps-f32 %v246_v23, 7.0  ;;  %v3673_v32 = vclamps-f32 %v243_v24, 7.0 }
   0x9   :  { %v3674_v34 = vclamps-f32 %v244_v26, 7.0  ;;  %v3677_v35 = vclamps-f32 %v247_v27, 7.0  ;;  %v250_v37 = vfloor.f32 %v186_v29  ;;  %v3679_v48 = vclamps-f32 %v249_v33, 7.0 }
   0xa   :  { %v3678_v36 = vclamps-f32 %v248_v28, 7.0  ;;  %v4788_v41 = vmul.f32 0.2857143, %v3675_v30  ;;  %v4790_v42 = vmul.f32 0.2857143, %v3676_v31  ;;  %v123_v55 = vmul.f32 3.5, %v59_v38 }
   0xb   :  { %v4792_v43 = vmul.f32 0.2857143, %v3673_v32  ;;  %v4794_v44 = vmul.f32 0.2857143, %v3674_v34  ;;  %v4796_v45 = vmul.f32 0.2857143, %v3677_v35 }
   0xc   :  { %v4798_v46 = vmul.f32 0.2857143, %v3678_v36  ;;  %v4079_v47 = vpack.i.bf16 %v4790_v42, %v4788_v41  ;;  %v3680_v49 = vclamps-f32 %v250_v37, 7.0  ;;  %v4816_v56 = vmul.f32 0.2857143, %v3679_v48  ;;  %v68_v30 = vld [vmem:[%s6057_s0 + $0x88] sm:$0xff] }
   0xd   :  { %v4069_v53 = vpack.i.bf16 %v4794_v44, %v4792_v43  ;;  %v124_v58 = vmul.f32 3.5, %v60_v39  ;;  %v125_v59 = vmul.f32 3.5, %v61_v40  ;;  %v187_v60 = vadd.f32 0.5, %v123_v55  ;;  %v69_v31 = vld [vmem:[%s6057_s0 + $0x90] sm:$0xff]  ;;  %v70_v38 = vld [vmem:[%s6057_s0 + $0x98] sm:$0xff]  ;;  %v71_v39 = vld [vmem:[%s6057_s0 + $0xa0] sm:$0xff] }
   0xe   :  { %v4084_v54 = vpack.i.bf16 %v4798_v46, %v4796_v45  ;;  %4080 = vrot.lane.b32.xlu1 %v4079_v47, %s4668_s16  ;;  %v4818_v57 = vmul.f32 0.2857143, %v3680_v49  ;;  %v126_v61 = vmul.f32 3.5, %v62_v50  ;;  %v127_v62 = vmul.f32 3.5, %v63_v51  ;;  %v72_v40 = vld [vmem:[%s6057_s0 + $0xa8] sm:$0xff]  ;;  %v73_v55 = vld [vmem:[%s6057_s0 + $0xb0] sm:$0xff] }
   0xf   :  { %4070 = vrot.lane.b32.xlu0 %v4069_v53, %s4669_s17  ;;  %v128_v63 = vmul.f32 3.5, %v64_v52  ;;  %v188_v3 = vadd.f32 0.5, %v124_v58  ;;  %v189_v4 = vadd.f32 0.5, %v125_v59  ;;  %v251_v5 = vfloor.f32 %v187_v60  ;;  %v74_v58 = vld [vmem:[%s6057_s0 + $0xb8] sm:$0xff] }
  0x10   :  { %v4094_v2 = vpack.i.bf16 %v4818_v57, %v4816_v56  ;;  %v190_v6 = vadd.f32 0.5, %v126_v61  ;;  %v191_v7 = vadd.f32 0.5, %v127_v62  ;;  %v129_v11 = vmul.f32 3.5, %v65_v0 }
  0x11   :  { %v192_v8 = vadd.f32 0.5, %v128_v63  ;;  %v252_v9 = vfloor.f32 %v188_v3  ;;  %v253_v10 = vfloor.f32 %v189_v4  ;;  %v130_v12 = vmul.f32 3.5, %v66_v1 }
  0x12   :  { %4085 = vrot.lane.b32.xlu1 %v4084_v54, %s4668_s16  ;;  %v3681_v13 = vclamps-f32 %v251_v5, 7.0  ;;  %v254_v14 = vfloor.f32 %v190_v6  ;;  %v255_v15 = vfloor.f32 %v191_v7  ;;  %v193_v19 = vadd.f32 0.5, %v129_v11 }
  0x13   :  { %4075 = vrot.lane.b32.xlu0 %v4079_v47, %s4669_s17  ;;  %v256_v16 = vfloor.f32 %v192_v8  ;;  %v3682_v17 = vclamps-f32 %v252_v9, 7.0  ;;  %v3683_v18 = vclamps-f32 %v253_v10, 7.0  ;;  %v194_v20 = vadd.f32 0.5, %v130_v12 }
  0x14   :  { %v4831_v21 = vmul.f32 0.2857143, %v3681_v13  ;;  %v3684_v22 = vclamps-f32 %v254_v14, 7.0  ;;  %v3685_v23 = vclamps-f32 %v255_v15, 7.0  ;;  %v257_v28 = vfloor.f32 %v193_v19 }
  0x15   :  { %v3686_v24 = vclamps-f32 %v256_v16, 7.0  ;;  %v4837_v26 = vmul.f32 0.2857143, %v3682_v17  ;;  %v4839_v27 = vmul.f32 0.2857143, %v3683_v18  ;;  %v258_v29 = vfloor.f32 %v194_v20  ;;  %v75_v16 = vld [vmem:[%s6057_s0 + $0xc0] sm:$0xff] }
  0x16   :  { %4095 = vrot.lane.b32.xlu1 %v4094_v2, %s4669_s17  ;;  %v4848_v32 = vmul.f32 0.2857143, %v3684_v22  ;;  %v4850_v33 = vmul.f32 0.2857143, %v3685_v23  ;;  %v3687_v36 = vclamps-f32 %v257_v28, 7.0  ;;  %v131_v49 = vmul.f32 3.5, %v67_v25 }
  0x17   :  { %4090 = vrot.lane.b32.xlu0 %v4084_v54, %s4669_s17  ;;  %v4852_v34 = vmul.f32 0.2857143, %v3686_v24  ;;  %v4104_v35 = vpack.i.bf16 %v4837_v26, %v4831_v21  ;;  %v3688_v37 = vclamps-f32 %v258_v29, 7.0  ;;  %v132_v50 = vmul.f32 3.5, %v68_v30  ;;  %v76_v22 = vld [vmem:[%s6057_s0 + $0xc8] sm:$0xff]  ;;  %v77_v24 = vld [vmem:[%s6057_s0 + $0xd0] sm:$0xff] }
  0x18   :  { %v4114_v47 = vpack.i.bf16 %v4848_v32, %v4839_v27  ;;  %v133_v51 = vmul.f32 3.5, %v69_v31  ;;  %v134_v52 = vmul.f32 3.5, %v70_v38  ;;  %v135_v53 = vmul.f32 3.5, %v71_v39  ;;  %v78_v25 = vld [vmem:[%s6057_s0 + $0xd8] sm:$0xff] }
  0x19   :  { %v4124_v48 = vpack.i.bf16 %v4852_v34, %v4850_v33  ;;  %v136_v54 = vmul.f32 3.5, %v72_v40  ;;  %v4877_v59 = vmul.f32 0.2857143, %v3687_v36  ;;  %v4879_v60 = vmul.f32 0.2857143, %v3688_v37  ;;  %v80_v36 = vld [vmem:[%s6057_s0 + $0xe8] sm:$0xff] }
  0x1a   :  { %4105 = vrot.lane.b32.xlu1 %v4104_v35, %s4668_s16  ;;  %v195_v61 = vadd.f32 0.5, %v131_v49  ;;  %v196_v62 = vadd.f32 0.5, %v132_v50  ;;  %v197_v63 = vadd.f32 0.5, %v133_v51  ;;  %v198_v0 = vadd.f32 0.5, %v134_v52 }
  0x1b   :  { %4100 = vrot.lane.b32.xlu0 %v4094_v2, %s4668_s16  ;;  %v199_v1 = vadd.f32 0.5, %v135_v53  ;;  %v200_v2 = vadd.f32 0.5, %v136_v54  ;;  %v137_v5 = vmul.f32 3.5, %v73_v55  ;;  %v138_v6 = vmul.f32 3.5, %v74_v58 }
  0x1c   :  { %v259_v3 = vfloor.f32 %v195_v61  ;;  %v260_v4 = vfloor.f32 %v196_v62  ;;  %v261_v7 = vfloor.f32 %v197_v63  ;;  %v262_v8 = vfloor.f32 %v198_v0  ;;  %v81_v63 = vld [vmem:[%s6057_s0 + $0xf0] sm:$0xff] }
  0x1d   :  { %v263_v11 = vfloor.f32 %v199_v1  ;;  %v4134_v12 = vpack.i.bf16 %v4879_v60, %v4877_v59  ;;  %v264_v13 = vfloor.f32 %v200_v2  ;;  %v201_v14 = vadd.f32 0.5, %v137_v5 }
  0x1e   :  { %4115 = vrot.lane.b32.xlu1 %v4114_v47, %s4669_s17  ;;  %v3689_v9 = vclamps-f32 %v259_v3, 7.0  ;;  %v3690_v10 = vclamps-f32 %v260_v4, 7.0  ;;  %v202_v15 = vadd.f32 0.5, %v138_v6  ;;  %v3691_v19 = vclamps-f32 %v261_v7, 7.0  ;;  %v82_v3 = vld [vmem:[%s6057_s0 + $0xf8] sm:$0xff] }
  0x1f   :  { %4110 = vrot.lane.b32.xlu0 %v4104_v35, %s4669_s17  ;;  %v3692_v20 = vclamps-f32 %v262_v8, 7.0  ;;  %v3693_v23 = vclamps-f32 %v263_v11, 7.0  ;;  %v3694_v28 = vclamps-f32 %v264_v13, 7.0  ;;  %v265_v29 = vfloor.f32 %v201_v14  ;;  %v79_v35 = vld [vmem:[%s6057_s0 + $0xe0] sm:$0xff] }
  0x20   :  { %v4889_v17 = vmul.f32 0.2857143, %v3689_v9  ;;  %v4891_v18 = vmul.f32 0.2857143, %v3690_v10  ;;  %v266_v30 = vfloor.f32 %v202_v15  ;;  %v139_v31 = vmul.f32 3.5, %v75_v16  ;;  %v83_v11 = vld [vmem:[%s6057_s0 + $0x100] sm:$0xff] }
  0x21   :  { %v4912_v38 = vmul.f32 0.2857143, %v3691_v19  ;;  %v4914_v39 = vmul.f32 0.2857143, %v3692_v20  ;;  %v140_v40 = vmul.f32 3.5, %v76_v22  ;;  %v141_v49 = vmul.f32 3.5, %v77_v24 }
  0x22   :  { %4125 = vrot.lane.b32.xlu1 %v4124_v48, %s4668_s16  ;;  %v4144_v37 = vpack.i.bf16 %v4891_v18, %v4889_v17  ;;  %v142_v50 = vmul.f32 3.5, %v78_v25  ;;  %v4917_v51 = vmul.f32 0.2857143, %v3693_v23  ;;  %v143_v53 = vmul.f32 3.5, %v79_v35  ;;  %v84_v16 = vld [vmem:[%s6057_s0 + $0x108] sm:$0xff] }
  0x23   :  { %4120 = vrot.lane.b32.xlu0 %v4114_v47, %s4668_s16  ;;  %v203_v47 = vadd.f32 0.5, %v139_v31  ;;  %v204_v52 = vadd.f32 0.5, %v140_v40  ;;  %v144_v54 = vmul.f32 3.5, %v80_v36  ;;  %v4919_v55 = vmul.f32 0.2857143, %v3694_v28 }
  0x24   :  { %v3695_v58 = vclamps-f32 %v265_v29, 7.0  ;;  %v3696_v61 = vclamps-f32 %v266_v30, 7.0  ;;  %v205_v62 = vadd.f32 0.5, %v141_v49  ;;  %v206_v2 = vadd.f32 0.5, %v142_v50  ;;  %v85_v29 = vld [vmem:[%s6057_s0 + $0x110] sm:$0xff] }
  0x25   :  { %v267_v0 = vfloor.f32 %v203_v47  ;;  %v268_v1 = vfloor.f32 %v204_v52  ;;  %v207_v4 = vadd.f32 0.5, %v143_v53  ;;  %v208_v5 = vadd.f32 0.5, %v144_v54 }
  0x26   :  { %4135 = vrot.lane.b32.xlu1 %v4134_v12, %s4669_s17  ;;  %v145_v6 = vmul.f32 3.5, %v81_v63  ;;  %v4164_v7 = vpack.i.bf16 %v4919_v55, %v4917_v51  ;;  %v4933_v8 = vmul.f32 0.2857143, %v3695_v58  ;;  %v4935_v9 = vmul.f32 0.2857143, %v3696_v61 }
  0x27   :  { %4130 = vrot.lane.b32.xlu0 %v4124_v48, %s4669_s17  ;;  %v4154_v48 = vpack.i.bf16 %v4914_v39, %v4912_v38  ;;  %v269_v10 = vfloor.f32 %v205_v62  ;;  %v3698_v13 = vclamps-f32 %v268_v1, 7.0  ;;  %v270_v14 = vfloor.f32 %v206_v2 }
  0x28   :  { %v146_v15 = vmul.f32 3.5, %v82_v3  ;;  %v271_v19 = vfloor.f32 %v207_v4  ;;  %v272_v20 = vfloor.f32 %v208_v5  ;;  %v209_v22 = vadd.f32 0.5, %v145_v6 }
  0x29   :  { %v147_v23 = vmul.f32 3.5, %v83_v11  ;;  %v4174_v24 = vpack.i.bf16 %v4935_v9, %v4933_v8  ;;  %v3699_v25 = vclamps-f32 %v269_v10, 7.0  ;;  %v148_v28 = vmul.f32 3.5, %v84_v16 }
  0x2a   :  { %4145 = vrot.lane.b32.xlu1 %v4144_v37, %s4668_s16  ;;  %v4953_v31 = vmul.f32 0.2857143, %v3698_v13  ;;  %v3700_v35 = vclamps-f32 %v270_v14, 7.0  ;;  %v210_v36 = vadd.f32 0.5, %v146_v15  ;;  %v3701_v40 = vclamps-f32 %v271_v19, 7.0  ;;  %v90_v15 = vld [vmem:[%s6057_s0 + $0x138] sm:$0xff] }
  0x2b   :  { %4140 = vrot.lane.b32.xlu0 %v4134_v12, %s4668_s16  ;;  %v3697_v12 = vclamps-f32 %v267_v0, 7.0  ;;  %v3702_v47 = vclamps-f32 %v272_v20, 7.0  ;;  %v273_v49 = vfloor.f32 %v209_v22  ;;  %v211_v50 = vadd.f32 0.5, %v147_v23  ;;  %v88_v0 = vld [vmem:[%s6057_s0 + $0x128] sm:$0xff] }
  0x2c   :  { %v4959_v52 = vmul.f32 0.2857143, %v3699_v25  ;;  %v212_v53 = vadd.f32 0.5, %v148_v28  ;;  %v149_v54 = vmul.f32 3.5, %v85_v29  ;;  %v4964_v61 = vmul.f32 0.2857143, %v3700_v35 }
  0x2d   :  { %v4951_v30 = vmul.f32 0.2857143, %v3697_v12  ;;  %v274_v62 = vfloor.f32 %v210_v36  ;;  %v4973_v1 = vmul.f32 0.2857143, %v3701_v40  ;;  %v4975_v2 = vmul.f32 0.2857143, %v3702_v47 }
  0x2e   :  { %4155 = vrot.lane.b32.xlu1 %v4154_v48, %s4669_s17  ;;  %v3703_v3 = vclamps-f32 %v273_v49, 7.0  ;;  %v275_v4 = vfloor.f32 %v211_v50  ;;  %v276_v5 = vfloor.f32 %v212_v53  ;;  %v213_v6 = vadd.f32 0.5, %v149_v54  ;;  %v92_v29 = vld [vmem:[%s6057_s0 + $0x148] sm:$0xff] }
  0x2f   :  { %4150 = vrot.lane.b32.xlu0 %v4144_v37, %s4669_s17  ;;  %v86_v37 = vld [vmem:[%s6057_s0 + $0x118] sm:$0xff]  ;;  %v4184_v58 = vpack.i.bf16 %v4953_v31, %v4951_v30  ;;  %v152_v11 = vmul.f32 3.5, %v88_v0  ;;  %v4194_v12 = vpack.i.bf16 %v4964_v61, %v4959_v52  ;;  %v3704_v13 = vclamps-f32 %v274_v62, 7.0 }
  0x30   :  { %v150_v63 = vmul.f32 3.5, %v86_v37  ;;  %v4204_v16 = vpack.i.bf16 %v4975_v2, %v4973_v1  ;;  %v4989_v19 = vmul.f32 0.2857143, %v3703_v3  ;;  %v3705_v20 = vclamps-f32 %v275_v4, 7.0 }
  0x31   :  { %v3706_v22 = vclamps-f32 %v276_v5, 7.0  ;;  %v277_v23 = vfloor.f32 %v213_v6  ;;  %v216_v28 = vadd.f32 0.5, %v152_v11  ;;  %v4998_v35 = vmul.f32 0.2857143, %v3704_v13  ;;  %v94_v5 = vld [vmem:[%s6057_s0 + $0x158] sm:$0xff] }
  0x32   :  { %4165 = vrot.lane.b32.xlu1 %v4164_v7, %s4668_s16  ;;  %v214_v14 = vadd.f32 0.5, %v150_v63  ;;  %v154_v40 = vmul.f32 3.5, %v90_v15  ;;  %v5001_v47 = vmul.f32 0.2857143, %v3705_v20  ;;  %v156_v50 = vmul.f32 3.5, %v92_v29  ;;  %v95_v20 = vld [vmem:[%s6057_s0 + $0x160] sm:$0xff] }
  0x33   :  { %4160 = vrot.lane.b32.xlu0 %v4154_v48, %s4668_s16  ;;  %v87_v48 = vld [vmem:[%s6057_s0 + $0x120] sm:$0xff]  ;;  %v5003_v53 = vmul.f32 0.2857143, %v3706_v22  ;;  %v3707_v54 = vclamps-f32 %v277_v23, 7.0  ;;  %v280_v63 = vfloor.f32 %v216_v28  ;;  %v4214_v0 = vpack.i.bf16 %v4998_v35, %v4989_v19  ;;  %v96_v28 = vld [vmem:[%s6057_s0 + $0x168] sm:$0xff] }
  0x34   :  { %v151_v10 = vmul.f32 3.5, %v87_v48  ;;  %v278_v36 = vfloor.f32 %v214_v14  ;;  %v93_v48 = vld [vmem:[%s6057_s0 + $0x150] sm:$0xff]  ;;  %v218_v4 = vadd.f32 0.5, %v154_v40  ;;  %vm2239_vm6 = vcmask 130048  }
  0x35   :  { %v157_v11 = vmul.f32 3.5, %v93_v48  ;;  %v4224_v13 = vpack.i.bf16 %v5003_v53, %v5001_v47  ;;  %v5017_v14 = vmul.f32 0.2857143, %v3707_v54  ;;  %v3710_v15 = vclamps-f32 %v280_v63, 7.0 }
  0x36   :  { %4175 = vrot.lane.b32.xlu1 %v4174_v24, %s4669_s17  ;;  %v215_v25 = vadd.f32 0.5, %v151_v10  ;;  %v3708_v3 = vclamps-f32 %v278_v36, 7.0  ;;  %v220_v10 = vadd.f32 0.5, %v156_v50  ;;  %v282_v23 = vfloor.f32 %v218_v4 }
  0x37   :  { %4170 = vrot.lane.b32.xlu0 %v4164_v7, %s4669_s17  ;;  %v89_v7 = vld [vmem:[%s6057_s0 + $0x130] sm:$0xff]  ;;  %6093 = vst [vmem:[#allocation2_spill] sm:$0xff] %v5017_v14  ;;  %v221_v36 = vadd.f32 0.5, %v157_v11  ;;  %v160_v50 = vmul.f32 3.5, %v96_v28  ;;  %vm2307_vm7 = vcmask 195584   ;;  %vm3231_vm8 = vcmask 261120  }
  0x38   :  { %v153_v37 = vmul.f32 3.5, %v89_v7  ;;  %v279_v62 = vfloor.f32 %v215_v25  ;;  %v158_v25 = vmul.f32 3.5, %v94_v5  ;;  %v284_v29 = vfloor.f32 %v220_v10 }
  0x39   :  { %v3712_v63 = vclamps-f32 %v282_v23, 7.0  ;;  %v285_v5 = vfloor.f32 %v221_v36  ;;  %v224_v10 = vadd.f32 0.5, %v160_v50  ;;  %vm3275_vm9 = vcmask 392192  }
  0x3a   :  { %4185 = vrot.lane.b32.xlu1 %v4184_v58, %s4668_s16  ;;  %v3709_v7 = vclamps-f32 %v279_v62, 7.0  ;;  %v222_v48 = vadd.f32 0.5, %v158_v25  ;;  %v3714_v4 = vclamps-f32 %v284_v29, 7.0  ;;  %v100_v25 = vld [vmem:[%s6057_s0 + $0x188] sm:$0xff]  ;;  %vm4674_vm10 = vmmov 0  }
  0x3b   :  { %4180 = vrot.lane.b32.xlu0 %v4174_v24, %s4668_s16  ;;  %v91_v24 = vld [vmem:[%s6057_s0 + $0x140] sm:$0xff]  ;;  %v3715_v29 = vclamps-f32 %v285_v5, 7.0 }
  0x3c   :  { %v155_v49 = vmul.f32 3.5, %v91_v24  ;;  %v5029_v40 = vmul.f32 0.2857143, %v3709_v7  ;;  %v286_v23 = vfloor.f32 %v222_v48 }
  0x3d   :  { %v5073_v5 = vmul.f32 0.2857143, %v3715_v29 }
  0x3e   :  { %4195 = vrot.lane.b32.xlu1 %v4194_v12, %s4669_s17  ;;  %v219_v6 = vadd.f32 0.5, %v155_v49  ;;  %v5031_v49 = vmul.f32 0.2857143, %v3710_v15 }
  0x3f   :  { %4190 = vrot.lane.b32.xlu0 %v4184_v58, %s4669_s17  ;;  %v217_v58 = vadd.f32 0.5, %v153_v37  ;;  %v159_v37 = vmul.f32 3.5, %v95_v20  ;;  %6098 = vst [vmem:[#allocation7_spill] sm:$0xff] %v5073_v5 }
  0x40   :  { %v283_v24 = vfloor.f32 %v219_v6  ;;  %v4244_v15 = vpack.i.bf16 %v5031_v49, %v5029_v40 }
  0x41   :  { %v281_v22 = vfloor.f32 %v217_v58  ;;  %v223_v6 = vadd.f32 0.5, %v159_v37  ;;  %v288_v37 = vfloor.f32 %v224_v10 }
  0x42   :  { %4205 = vrot.lane.b32.xlu1 %v4204_v16, %s4668_s16  ;;  %v3713_v58 = vclamps-f32 %v283_v24, 7.0  ;;  %v5059_v24 = vmul.f32 0.2857143, %v3714_v4 }
  0x43   :  { %4200 = vrot.lane.b32.xlu0 %v4194_v12, %s4668_s16  ;;  %v5023_v12 = vmul.f32 0.2857143, %v3708_v3  ;;  %v3711_v62 = vclamps-f32 %v281_v22, 7.0  ;;  %v98_v3 = vld [vmem:[%s6057_s0 + $0x178] sm:$0xff]  ;;  %v5048_v22 = vmul.f32 0.2857143, %v3712_v63  ;;  %v287_v36 = vfloor.f32 %v223_v6 }
  0x44   :  { %v162_v7 = vmul.f32 3.5, %v98_v3  ;;  %v5057_v28 = vmul.f32 0.2857143, %v3713_v58  ;;  %6097 = vst [vmem:[#allocation6_spill] sm:$0xff] %v5059_v24  ;;  %v101_v3 = vld [vmem:[%s6057_s0 + $0x190] sm:$0xff]  ;;  %v102_v58 = vld [vmem:[%s6057_s0 + $0x198] sm:$0xff] }
  0x45   :  { %v4234_v54 = vpack.i.bf16 %v5023_v12, %v5017_v14  ;;  %v5046_v20 = vmul.f32 0.2857143, %v3711_v62  ;;  %6095 = vst [vmem:[#allocation4_spill] sm:$0xff] %v5048_v22  ;;  %v3717_v6 = vclamps-f32 %v287_v36, 7.0  ;;  %v3718_v10 = vclamps-f32 %v288_v37, 7.0 }
  0x46   :  { %4215 = vrot.lane.b32.xlu1 %v4214_v0, %s4669_s17  ;;  %6096 = vst [vmem:[#allocation5_spill] sm:$0xff] %v5057_v28  ;;  %v226_v62 = vadd.f32 0.5, %v162_v7  ;;  %v4264_v4 = vpack.i.bf16 %v5059_v24, %v5057_v28  ;;  %v165_v29 = vmul.f32 3.5, %v101_v3 }
  0x47   :  { %4210 = vrot.lane.b32.xlu0 %v4204_v16, %s4669_s17  ;;  %v97_v16 = vld [vmem:[%s6057_s0 + $0x170] sm:$0xff]  ;;  %6094 = vst [vmem:[#allocation3_spill] sm:$0xff] %v5046_v20  ;;  %v4254_v48 = vpack.i.bf16 %v5048_v22, %v5046_v20  ;;  %v166_v22 = vmul.f32 3.5, %v102_v58  ;;  %v5085_v36 = vmul.f32 0.2857143, %v3717_v6 }
  0x48   :  { %v161_v11 = vmul.f32 3.5, %v97_v16  ;;  %v164_v16 = vmul.f32 3.5, %v100_v25  ;;  %v290_v7 = vfloor.f32 %v226_v62  ;;  %v105_v62 = vld [vmem:[%s6057_s0 + $0x1b0] sm:$0xff]  ;;  %v229_v3 = vadd.f32 0.5, %v165_v29  ;;  %v1107_v6 = vld [vmem:[%s6058_s1] sm:$0x7] }
  0x49   :  { %6100 = vst [vmem:[#allocation9_spill] sm:$0xff] %v5085_v36  ;;  %v230_v58 = vadd.f32 0.5, %v166_v22  ;;  %4059 = vmatprep.subr.msk.bf16.mxu0 %vm1212_vm0, %v1107_v6 }
  0x4a   :  { %4225 = vrot.lane.b32.xlu1 %v4224_v13, %s4668_s16  ;;  %v225_v50 = vadd.f32 0.5, %v161_v11  ;;  %v228_v20 = vadd.f32 0.5, %v164_v16  ;;  %v3720_v24 = vclamps-f32 %v290_v7, 7.0  ;;  %v293_v29 = vfloor.f32 %v229_v3 }
  0x4b   :  { %4220 = vrot.lane.b32.xlu0 %v4214_v0, %s4668_s16  ;;  %v99_v0 = vld [vmem:[%s6057_s0 + $0x180] sm:$0xff] }
  0x4c   :  { %v163_v63 = vmul.f32 3.5, %v99_v0  ;;  %v289_v11 = vfloor.f32 %v225_v50  ;;  %v104_v0 = vld [vmem:[%s6057_s0 + $0x1a8] sm:$0xff]  ;;  %v292_v16 = vfloor.f32 %v228_v20 }
  0x4d   :  { %v168_v50 = vmul.f32 3.5, %v104_v0 }
  0x4e   :  { %4235 = vrot.lane.b32.xlu1 %v4234_v54, %s4669_s17  ;;  %v3719_v28 = vclamps-f32 %v289_v11, 7.0  ;;  %v3722_v22 = vclamps-f32 %v292_v16, 7.0 }
  0x4f   :  { %4230 = vrot.lane.b32.xlu0 %v4224_v13, %s4669_s17  ;;  %v3716_v13 = vclamps-f32 %v286_v23, 7.0  ;;  %v227_v23 = vadd.f32 0.5, %v163_v63  ;;  %v5090_v63 = vmul.f32 0.2857143, %v3718_v10  ;;  %v169_v10 = vmul.f32 3.5, %v105_v62 }
  0x50   :  { %v232_v7 = vadd.f32 0.5, %v168_v50  ;;  %v5104_v0 = vmul.f32 0.2857143, %v3719_v28  ;;  %v1214_v50 = vsel %vm1212_vm0, %v1107_v6, 0  ;;  %v5125_v6 = vmul.f32 0.2857143, %v3722_v22 }
  0x51   :  { %v5082_v25 = vmul.f32 0.2857143, %v3716_v13  ;;  %v291_v14 = vfloor.f32 %v227_v23  ;;  %v106_v13 = vld [vmem:[%s6057_s0 + $0x1b8] sm:$0xff]  ;;  %v233_v28 = vadd.f32 0.5, %v169_v10  ;;  %3900 = vmatpush3.bf16.msra.mxu0 %v1214_v50  ;;  %v3723_v10 = vclamps-f32 %v293_v29, 7.0  ;;  %v111_v29 = vld [vmem:[%s6057_s0 + $0x1e0] sm:$0xff] }
  0x52   :  { %4245 = vrot.lane.b32.xlu1 %v4244_v15, %s4668_s16  ;;  %v170_v23 = vmul.f32 3.5, %v106_v13  ;;  %6101 = vst [vmem:[#allocation10_spill] sm:$0xff] %v5104_v0  ;;  %6104 = vst [vmem:[#allocation13_spill] sm:$0xff] %v5125_v6 }
  0x53   :  { %4240 = vrot.lane.b32.xlu0 %v4234_v54, %s4668_s16  ;;  %v103_v54 = vld [vmem:[%s6057_s0 + $0x1a0] sm:$0xff]  ;;  %6099 = vst [vmem:[#allocation8_spill] sm:$0xff] %v5082_v25  ;;  %v3721_v20 = vclamps-f32 %v291_v14, 7.0  ;;  %v5134_v22 = vmul.f32 0.2857143, %v3723_v10 }
  0x54   :  { %v167_v37 = vmul.f32 3.5, %v103_v54  ;;  %v4284_v54 = vpack.i.bf16 %v5090_v63, %v5085_v36  ;;  %v234_v62 = vadd.f32 0.5, %v170_v23  ;;  %v6082_v36 = vmov 0.0  }
  0x55   :  { %4051 = vmatprep.subr.bf16.mxu0 %v6082_v36  ;;  %6105 = vst [vmem:[#allocation14_spill] sm:$0xff] %v5134_v22 }
  0x56   :  { %4255 = vrot.lane.b32.xlu1 %v4254_v48, %s4669_s17  ;;  %v231_v11 = vadd.f32 0.5, %v167_v37  ;;  %v108_v37 = vld [vmem:[%s6057_s0 + $0x1c8] sm:$0xff]  ;;  %v298_v50 = vfloor.f32 %v234_v62 }
  0x57   :  { %4250 = vrot.lane.b32.xlu0 %v4244_v15, %s4669_s17  ;;  %v4274_v15 = vpack.i.bf16 %v5082_v25, %v5073_v5  ;;  %v5106_v5 = vmul.f32 0.2857143, %v3720_v24  ;;  %v294_v25 = vfloor.f32 %v230_v58  ;;  %v296_v24 = vfloor.f32 %v232_v7  ;;  %v109_v58 = vld [vmem:[%s6057_s0 + $0x1d0] sm:$0xff]  ;;  %v110_v7 = vld [vmem:[%s6057_s0 + $0x1d8] sm:$0xff] }
  0x58   :  { %v295_v14 = vfloor.f32 %v231_v11  ;;  %v172_v3 = vmul.f32 3.5, %v108_v37  ;;  %v297_v37 = vfloor.f32 %v233_v28  ;;  %v112_v28 = vld [vmem:[%s6057_s0 + $0x1e8] sm:$0xff] }
  0x59   :  { %6102 = vst [vmem:[#allocation11_spill] sm:$0xff] %v5106_v5  ;;  %v4294_v13 = vpack.i.bf16 %v5106_v5, %v5104_v0  ;;  %v3724_v11 = vclamps-f32 %v294_v25, 7.0  ;;  %v173_v5 = vmul.f32 3.5, %v109_v58 }
  0x5a   :  { %4265 = vrot.lane.b32.xlu1 %v4264_v4, %s4668_s16  ;;  %v3725_v23 = vclamps-f32 %v295_v14, 7.0  ;;  %v236_v36 = vadd.f32 0.5, %v172_v3  ;;  %v3727_v62 = vclamps-f32 %v297_v37, 7.0 }
  0x5b   :  { %4260 = vrot.lane.b32.xlu0 %v4254_v48, %s4668_s16  ;;  %v107_v48 = vld [vmem:[%s6057_s0 + $0x1c0] sm:$0xff]  ;;  %v5136_v25 = vmul.f32 0.2857143, %v3724_v11  ;;  %v237_v10 = vadd.f32 0.5, %v173_v5  ;;  %v175_v11 = vmul.f32 3.5, %v111_v29 }
  0x5c   :  { %v171_v16 = vmul.f32 3.5, %v107_v48  ;;  %v3726_v48 = vclamps-f32 %v296_v24, 7.0  ;;  %v5145_v14 = vmul.f32 0.2857143, %v3725_v23  ;;  %v300_v58 = vfloor.f32 %v236_v36  ;;  %v113_v23 = vld [vmem:[%s6057_s0 + $0x1f0] sm:$0xff] }
  0x5d   :  { %6106 = vst [vmem:[#allocation15_spill] sm:$0xff] %v5136_v25  ;;  %v5161_v36 = vmul.f32 0.2857143, %v3727_v62  ;;  %v239_v29 = vadd.f32 0.5, %v175_v11 }
  0x5e   :  { %4275 = vrot.lane.b32.xlu1 %v4274_v15, %s4669_s17  ;;  %v235_v0 = vadd.f32 0.5, %v171_v16  ;;  %6107 = vst [vmem:[#allocation16_spill] sm:$0xff] %v5145_v14  ;;  %v5147_v24 = vmul.f32 0.2857143, %v3726_v48  ;;  %v3728_v16 = vclamps-f32 %v298_v50, 7.0  ;;  %v3730_v50 = vclamps-f32 %v300_v58, 7.0 }
  0x5f   :  { %4270 = vrot.lane.b32.xlu0 %v4264_v4, %s4669_s17  ;;  %v5123_v4 = vmul.f32 0.2857143, %v3721_v20 }
  0x60   :  { %v299_v3 = vfloor.f32 %v235_v0  ;;  %v114_v0 = vld [vmem:[%s6057_s0 + $0x1f8] sm:$0xff]  ;;  %v4324_v5 = vpack.i.bf16 %v5147_v24, %v5145_v14  ;;  %v5163_v48 = vmul.f32 0.2857143, %v3728_v16  ;;  %v5171_v62 = vmul.f32 0.2857143, %v3730_v50 }
  0x61   :  { %6103 = vst [vmem:[#allocation12_spill] sm:$0xff] %v5123_v4  ;;  %v4304_v20 = vpack.i.bf16 %v5125_v6, %v5123_v4  ;;  %v176_v4 = vmul.f32 3.5, %v112_v28 }
  0x62   :  { %4285 = vrot.lane.b32.xlu1 %v4284_v54, %s4668_s16  ;;  %v3729_v37 = vclamps-f32 %v299_v3, 7.0  ;;  %v4334_v6 = vpack.i.bf16 %v5163_v48, %v5161_v36  ;;  %v303_v3 = vfloor.f32 %v239_v29 }
  0x63   :  { %4280 = vrot.lane.b32.xlu0 %v4274_v15, %s4668_s16  ;;  %v174_v15 = vmul.f32 3.5, %v110_v7  ;;  %v4314_v7 = vpack.i.bf16 %v5136_v25, %v5134_v22  ;;  %v240_v28 = vadd.f32 0.5, %v176_v4  ;;  %v177_v22 = vmul.f32 3.5, %v113_v23 }
  0x64   :  { %v178_v25 = vmul.f32 3.5, %v114_v0  ;;  %v5169_v14 = vmul.f32 0.2857143, %v3729_v37  ;;  %v3733_v23 = vclamps-f32 %v303_v3, 7.0 }
  0x65   :  { %v241_v11 = vadd.f32 0.5, %v177_v22 }
  0x66   :  { %4295 = vrot.lane.b32.xlu1 %v4294_v13, %s4669_s17  ;;  %v4344_v4 = vpack.i.bf16 %v5171_v62, %v5169_v14  ;;  %v5183_v29 = vmul.f32 0.2857143, %v3733_v23 }
  0x67   :  { %4290 = vrot.lane.b32.xlu0 %v4284_v54, %s4669_s17  ;;  %v238_v54 = vadd.f32 0.5, %v174_v15  ;;  %v301_v15 = vfloor.f32 %v237_v10  ;;  %v304_v10 = vfloor.f32 %v240_v28  ;;  %v305_v50 = vfloor.f32 %v241_v11 }
  0x69   :  { %v3731_v16 = vclamps-f32 %v301_v15, 7.0  ;;  %v3734_v37 = vclamps-f32 %v304_v10, 7.0 }
  0x6a   :  { %4305 = vrot.lane.b32.xlu1 %v4304_v20, %s4668_s16 }
  0x6b   :  { %4300 = vrot.lane.b32.xlu0 %v4294_v13, %s4668_s16  ;;  %v302_v13 = vfloor.f32 %v238_v54  ;;  %v242_v54 = vadd.f32 0.5, %v178_v25  ;;  %v5188_v25 = vmul.f32 0.2857143, %v3734_v37 }
  0x6d   :  { %v3732_v58 = vclamps-f32 %v302_v13, 7.0  ;;  %v306_v15 = vfloor.f32 %v242_v54  ;;  %6110 = vst [vmem:[#allocation19_spill] sm:$0xff] %v5188_v25  ;;  %v4364_v28 = vpack.i.bf16 %v5188_v25, %v5183_v29 }
  0x6e   :  { %4315 = vrot.lane.b32.xlu1 %v4314_v7, %s4669_s17 }
  0x6f   :  { %4310 = vrot.lane.b32.xlu0 %v4304_v20, %s4669_s17  ;;  %v5177_v20 = vmul.f32 0.2857143, %v3731_v16  ;;  %v5180_v0 = vmul.f32 0.2857143, %v3732_v58  ;;  %v3736_v13 = vclamps-f32 %v306_v15, 7.0 }
  0x71   :  { %6108 = vst [vmem:[#allocation17_spill] sm:$0xff] %v5177_v20  ;;  %6109 = vst [vmem:[#allocation18_spill] sm:$0xff] %v5180_v0  ;;  %v4354_v22 = vpack.i.bf16 %v5180_v0, %v5177_v20 }
  0x72   :  { %4325 = vrot.lane.b32.xlu1 %v4324_v5, %s4668_s16 }
  0x73   :  { %4320 = vrot.lane.b32.xlu0 %v4314_v7, %s4668_s16  ;;  %v3735_v7 = vclamps-f32 %v305_v50, 7.0 }
  0x75   :  { %v497_v16 = vmul.f32 0.2857143, %v3735_v7 }
  0x76   :  { %4335 = vrot.lane.b32.xlu1 %v4334_v6, %s4669_s17 }
  0x77   :  { %4330 = vrot.lane.b32.xlu0 %v4324_v5, %s4669_s17  ;;  %v498_v5 = vmul.f32 0.2857143, %v3736_v13 }
  0x7a   :  { %4345 = vrot.lane.b32.xlu1 %v4344_v4, %s4668_s16 }
  0x7b   :  { %4340 = vrot.lane.b32.xlu0 %v4334_v6, %s4668_s16  ;;  %v4374_v6 = vpack.i.bf16 %v498_v5, %v497_v16 }
  0x7e   :  { %4355 = vrot.lane.b32.xlu1 %v4354_v22, %s4669_s17 }
  0x7f   :  { %4350 = vrot.lane.b32.xlu0 %v4344_v4, %s4669_s17 }
  0x80   :  { %v4081_v3 = vpop.permute.xlu1 %4080 }
  0x81   :  { %v4083_v58 = vunpack.i.h.bf16 %v4081_v3  ;;  %v4082_v10 = vunpack.i.l.bf16 %v4081_v3  ;;  %v4071_v11 = vpop.permute.xlu0 %4070 }
  0x82   :  { %v4073_v54 = vunpack.i.h.bf16 %v4071_v11  ;;  %v4072_v23 = vunpack.i.l.bf16 %v4071_v11  ;;  %4365 = vrot.lane.b32.xlu1 %v4364_v28, %s4668_s16 }
  0x83   :  { %4360 = vrot.lane.b32.xlu0 %v4354_v22, %s4668_s16 }
  0x84   :  { %v4086_v37 = vpop.permute.xlu1 %4085  ;;  %v946_v50 = vsel %vm945_vm1, 0.0, %v4072_v23  ;;  %v947_v15 = vsel %vm945_vm1, 0.0, %v4073_v54 }
  0x85   :  { %v4088_v4 = vunpack.i.h.bf16 %v4086_v37  ;;  %v4087_v7 = vunpack.i.l.bf16 %v4086_v37  ;;  %v4076_v13 = vpop.permute.xlu0 %4075  ;;  %v1011_v3 = vsel %vm1010_vm2, %v946_v50, %v4082_v10  ;;  %v1012_v20 = vsel %vm1010_vm2, %v947_v15, %v4083_v58 }
  0x86   :  { %v4078_v11 = vunpack.i.h.bf16 %v4076_v13  ;;  %v4077_v0 = vunpack.i.l.bf16 %v4076_v13  ;;  %v1075_v25 = vpack.c.bf16 %v1012_v20, %v1011_v3  ;;  %4375 = vrot.lane.b32.xlu1 %v4374_v6, %s4669_s17  ;;  %v6111_v50 = vmov 0.0  }
  0x87   :  { %4370 = vrot.lane.b32.xlu0 %v4364_v28, %s4669_s17  ;;  %s4671_s17 = smov 8  }
  0x88   :  { %v949_v22 = vsel %vm945_vm1, %v4794_v44, %v4078_v11  ;;  %v948_v16 = vsel %vm945_vm1, %v4792_v43, %v4077_v0  ;;  %3901 = vmatprep.mubr.msk.bf16.mxu0 %vm1115_vm3, %v1075_v25  ;;  %v4096_v5 = vpop.permute.xlu1 %4095 }
  0x89   :  { %v4091_v54 = vpop.permute.xlu0 %4090  ;;  %v1013_v10 = vsel %vm1010_vm2, %v948_v16, %v4087_v7  ;;  %v1014_v58 = vsel %vm1010_vm2, %v949_v22, %v4088_v4  ;;  %v4098_v23 = vunpack.i.h.bf16 %v4096_v5  ;;  %v4097_v20 = vunpack.i.l.bf16 %v4096_v5 }
  0x8a   :  { %v1076_v37 = vpack.c.bf16 %v1014_v58, %v1013_v10  ;;  %880 = vrot.lane.b32.xlu1 %v6111_v50, %s4668_s16  ;;  %v4093_v28 = vunpack.i.h.bf16 %v4091_v54  ;;  %v4092_v15 = vunpack.i.l.bf16 %v4091_v54 }
  0x8b   :  { %4380 = vrot.lane.b32.xlu0 %v4374_v6, %s4668_s16  ;;  %v953_v7 = vsel %vm945_vm1, %v4798_v46, %v4098_v23  ;;  %v952_v4 = vsel %vm945_vm1, %v4796_v45, %v4097_v20 }
  0x8c   :  { %3902 = vmatmul.mubr.msk.bf16.vlgmr.msra.gmra.mrb[0].mxu0 %vm1115_vm3, %v1076_v37  ;;  %v4106_v43 = vpop.permute.xlu1 %4105  ;;  %v951_v11 = vsel %vm945_vm1, %v4790_v42, %v4093_v28  ;;  %v950_v6 = vsel %vm945_vm1, %v4788_v41, %v4092_v15 }
  0x8d   :  { %v4108_v44 = vunpack.i.h.bf16 %v4106_v43  ;;  %v4107_v0 = vunpack.i.l.bf16 %v4106_v43  ;;  %v4101_v25 = vpop.permute.xlu0 %4100 }
  0x8e   :  { %v4103_v13 = vunpack.i.h.bf16 %v4101_v25  ;;  %v4102_v3 = vunpack.i.l.bf16 %v4101_v25 }
  0x8f   :  { %v1017_v22 = vsel %vm1010_vm2, %v952_v4, %v4107_v0  ;;  %v1018_v16 = vsel %vm1010_vm2, %v953_v7, %v4108_v44 }
  0x90   :  { %v1015_v5 = vsel %vm1010_vm2, %v950_v6, %v4102_v3  ;;  %v1016_v54 = vsel %vm1010_vm2, %v951_v11, %v4103_v13  ;;  %v4116_v46 = vpop.permute.xlu1 %4115  ;;  %v1078_v10 = vpack.c.bf16 %v1018_v16, %v1017_v22 }
  0x91   :  { %v4111_v58 = vpop.permute.xlu0 %4110  ;;  %v1077_v45 = vpack.c.bf16 %v1016_v54, %v1015_v5  ;;  %v4118_v23 = vunpack.i.h.bf16 %v4116_v46  ;;  %v4117_v20 = vunpack.i.l.bf16 %v4116_v46 }
  0x92   :  { %v4113_v37 = vunpack.i.h.bf16 %v4111_v58  ;;  %v4112_v43 = vunpack.i.l.bf16 %v4111_v58 }
  0x93   :  { %3905 = vmatprep.mubr.msk.bf16.mxu0 %vm1115_vm3, %v1077_v45  ;;  %v957_v44 = vsel %vm945_vm1, %v4837_v26, %v4118_v23  ;;  %v956_v0 = vsel %vm945_vm1, %v4831_v21, %v4117_v20 }
  0x94   :  { %3906 = vmatmul.mubr.msk.bf16.gmra.mrb[4].mxu0 %vm1115_vm3, %v1078_v10  ;;  %v4126_v41 = vpop.permute.xlu1 %4125  ;;  %v955_v4 = vsel %vm945_vm1, %v4818_v57, %v4113_v37  ;;  %v954_v13 = vsel %vm945_vm1, %v4816_v56, %v4112_v43 }
  0x95   :  { %v4128_v42 = vunpack.i.h.bf16 %v4126_v41  ;;  %v4127_v28 = vunpack.i.l.bf16 %v4126_v41  ;;  %v4121_v15 = vpop.permute.xlu0 %4120 }
  0x96   :  { %v4123_v25 = vunpack.i.h.bf16 %v4121_v15  ;;  %v4122_v7 = vunpack.i.l.bf16 %v4121_v15 }
  0x97   :  { %v1021_v3 = vsel %vm1010_vm2, %v956_v0, %v4127_v28  ;;  %v1022_v11 = vsel %vm1010_vm2, %v957_v44, %v4128_v42 }
  0x98   :  { %v1019_v6 = vsel %vm1010_vm2, %v954_v13, %v4122_v7  ;;  %v1020_v22 = vsel %vm1010_vm2, %v955_v4, %v4123_v25  ;;  %v4136_v26 = vpop.permute.xlu1 %4135  ;;  %v1080_v16 = vpack.c.bf16 %v1022_v11, %v1021_v3 }
  0x99   :  { %v4131_v5 = vpop.permute.xlu0 %4130  ;;  %v1079_v21 = vpack.c.bf16 %v1020_v22, %v1019_v6  ;;  %v4138_v54 = vunpack.i.h.bf16 %v4136_v26  ;;  %v4137_v46 = vunpack.i.l.bf16 %v4136_v26 }
  0x9a   :  { %v4133_v10 = vunpack.i.h.bf16 %v4131_v5  ;;  %v4132_v58 = vunpack.i.l.bf16 %v4131_v5 }
  0x9b   :  { %3909 = vmatprep.mubr.msk.bf16.mxu0 %vm1115_vm3, %v1079_v21  ;;  %v961_v20 = vsel %vm945_vm1, %v4852_v34, %v4138_v54  ;;  %v960_v37 = vsel %vm945_vm1, %v4850_v33, %v4137_v46 }
  0x9c   :  { %3910 = vmatmul.mubr.msk.bf16.gmra.mrb[8].mxu0 %vm1115_vm3, %v1080_v16  ;;  %v4146_v56 = vpop.permute.xlu1 %4145  ;;  %v959_v42 = vsel %vm945_vm1, %v4848_v32, %v4133_v10  ;;  %v958_v28 = vsel %vm945_vm1, %v4839_v27, %v4132_v58 }
  0x9d   :  { %v4148_v57 = vunpack.i.h.bf16 %v4146_v56  ;;  %v4147_v45 = vunpack.i.l.bf16 %v4146_v56  ;;  %v4141_v23 = vpop.permute.xlu0 %4140 }
  0x9e   :  { %v4143_v43 = vunpack.i.h.bf16 %v4141_v23  ;;  %v4142_v41 = vunpack.i.l.bf16 %v4141_v23 }
  0x9f   :  { %v1025_v15 = vsel %vm1010_vm2, %v960_v37, %v4147_v45  ;;  %v1026_v44 = vsel %vm1010_vm2, %v961_v20, %v4148_v57 }
  0xa0   :  { %v1023_v0 = vsel %vm1010_vm2, %v958_v28, %v4142_v41  ;;  %v1024_v25 = vsel %vm1010_vm2, %v959_v42, %v4143_v43  ;;  %v4156_v34 = vpop.permute.xlu1 %4155  ;;  %v1082_v7 = vpack.c.bf16 %v1026_v44, %v1025_v15 }
  0xa1   :  { %v4151_v4 = vpop.permute.xlu0 %4150  ;;  %v1081_v33 = vpack.c.bf16 %v1024_v25, %v1023_v0  ;;  %v4158_v13 = vunpack.i.h.bf16 %v4156_v34  ;;  %v4157_v3 = vunpack.i.l.bf16 %v4156_v34 }
  0xa2   :  { %v4153_v11 = vunpack.i.h.bf16 %v4151_v4  ;;  %v4152_v6 = vunpack.i.l.bf16 %v4151_v4 }
  0xa3   :  { %3913 = vmatprep.mubr.msk.bf16.mxu0 %vm1115_vm3, %v1081_v33  ;;  %v965_v16 = vsel %vm945_vm1, %v4891_v18, %v4158_v13  ;;  %v964_v5 = vsel %vm945_vm1, %v4889_v17, %v4157_v3 }
  0xa4   :  { %3914 = vmatmul.mubr.msk.bf16.gmra.mrb[12].mxu0 %vm1115_vm3, %v1082_v7  ;;  %v4166_v27 = vpop.permute.xlu1 %4165  ;;  %v963_v46 = vsel %vm945_vm1, %v4879_v60, %v4153_v11  ;;  %v962_v10 = vsel %vm945_vm1, %v4877_v59, %v4152_v6 }
  0xa5   :  { %v4168_v32 = vunpack.i.h.bf16 %v4166_v27  ;;  %v4167_v22 = vunpack.i.l.bf16 %v4166_v27  ;;  %v4161_v26 = vpop.permute.xlu0 %4160 }
  0xa6   :  { %v4163_v21 = vunpack.i.h.bf16 %v4161_v26  ;;  %v4162_v54 = vunpack.i.l.bf16 %v4161_v26 }
  0xa7   :  { %v1029_v58 = vsel %vm1010_vm2, %v964_v5, %v4167_v22  ;;  %v1030_v56 = vsel %vm1010_vm2, %v965_v16, %v4168_v32 }
  0xa8   :  { %v1027_v57 = vsel %vm1010_vm2, %v962_v10, %v4162_v54  ;;  %v1028_v45 = vsel %vm1010_vm2, %v963_v46, %v4163_v21  ;;  %v4176_v18 = vpop.permute.xlu1 %4175  ;;  %v1084_v23 = vpack.c.bf16 %v1030_v56, %v1029_v58 }
  0xa9   :  { %v4171_v20 = vpop.permute.xlu0 %4170  ;;  %v1083_v17 = vpack.c.bf16 %v1028_v45, %v1027_v57  ;;  %v4178_v37 = vunpack.i.h.bf16 %v4176_v18  ;;  %v4177_v43 = vunpack.i.l.bf16 %v4176_v18 }
  0xaa   :  { %v4173_v41 = vunpack.i.h.bf16 %v4171_v20  ;;  %v4172_v42 = vunpack.i.l.bf16 %v4171_v20 }
  0xab   :  { %3917 = vmatprep.mubr.msk.bf16.mxu0 %vm1115_vm3, %v1083_v17  ;;  %v969_v44 = vsel %vm945_vm1, %v4919_v55, %v4178_v37  ;;  %v968_v0 = vsel %vm945_vm1, %v4917_v51, %v4177_v43 }
  0xac   :  { %3918 = vmatmul.mubr.msk.bf16.gmra.mrb[16].mxu0 %vm1115_vm3, %v1084_v23  ;;  %v4186_v59 = vpop.permute.xlu1 %4185  ;;  %v967_v7 = vsel %vm945_vm1, %v4914_v39, %v4173_v41  ;;  %v966_v4 = vsel %vm945_vm1, %v4912_v38, %v4172_v42 }
  0xad   :  { %v4188_v60 = vunpack.i.h.bf16 %v4186_v59  ;;  %v4187_v28 = vunpack.i.l.bf16 %v4186_v59  ;;  %v4181_v15 = vpop.permute.xlu0 %4180 }
  0xae   :  { %v4183_v25 = vunpack.i.h.bf16 %v4181_v15  ;;  %v4182_v34 = vunpack.i.l.bf16 %v4181_v15 }
  0xaf   :  { %v1033_v33 = vsel %vm1010_vm2, %v968_v0, %v4187_v28  ;;  %v1034_v13 = vsel %vm1010_vm2, %v969_v44, %v4188_v60 }
  0xb0   :  { %v1086_v3 = vpack.c.bf16 %v1034_v13, %v1033_v33  ;;  %v1031_v11 = vsel %vm1010_vm2, %v966_v4, %v4182_v34  ;;  %v1032_v55 = vsel %vm1010_vm2, %v967_v7, %v4183_v25  ;;  %v4196_v6 = vpop.permute.xlu1 %4195 }
  0xb1   :  { %v1085_v27 = vpack.c.bf16 %v1032_v55, %v1031_v11  ;;  %v4191_v51 = vpop.permute.xlu0 %4190  ;;  %v4198_v32 = vunpack.i.h.bf16 %v4196_v6  ;;  %v4197_v22 = vunpack.i.l.bf16 %v4196_v6 }
  0xb2   :  { %v4193_v26 = vunpack.i.h.bf16 %v4191_v51  ;;  %v4192_v16 = vunpack.i.l.bf16 %v4191_v51 }
  0xb3   :  { %3921 = vmatprep.mubr.msk.bf16.mxu0 %vm1115_vm3, %v1085_v27  ;;  %v973_v54 = vsel %vm945_vm1, %v4953_v31, %v4198_v32  ;;  %v972_v46 = vsel %vm945_vm1, %v4951_v30, %v4197_v22 }
  0xb4   :  { %3922 = vmatmul.mubr.msk.bf16.gmra.mrb[20].mxu0 %vm1115_vm3, %v1086_v3  ;;  %v4206_v38 = vpop.permute.xlu1 %4205  ;;  %v971_v56 = vsel %vm945_vm1, %v4935_v9, %v4193_v26  ;;  %v970_v57 = vsel %vm945_vm1, %v4933_v8, %v4192_v16 }
  0xb5   :  { %v4208_v39 = vunpack.i.h.bf16 %v4206_v38  ;;  %v4207_v5 = vunpack.i.l.bf16 %v4206_v38  ;;  %v4201_v21 = vpop.permute.xlu0 %4200 }
  0xb6   :  { %v4203_v10 = vunpack.i.h.bf16 %v4201_v21  ;;  %v4202_v58 = vunpack.i.l.bf16 %v4201_v21 }
  0xb7   :  { %v1037_v45 = vsel %vm1010_vm2, %v972_v46, %v4207_v5  ;;  %v1038_v18 = vsel %vm1010_vm2, %v973_v54, %v4208_v39 }
  0xb8   :  { %v1088_v23 = vpack.c.bf16 %v1038_v18, %v1037_v45  ;;  %v1035_v20 = vsel %vm1010_vm2, %v970_v57, %v4202_v58  ;;  %v1036_v31 = vsel %vm1010_vm2, %v971_v56, %v4203_v10  ;;  %v4216_v17 = vpop.permute.xlu1 %4215 }
  0xb9   :  { %v1087_v37 = vpack.c.bf16 %v1036_v31, %v1035_v20  ;;  %v4211_v30 = vpop.permute.xlu0 %4210  ;;  %v4218_v43 = vunpack.i.h.bf16 %v4216_v17  ;;  %v4217_v41 = vunpack.i.l.bf16 %v4216_v17 }
  0xba   :  { %v4213_v42 = vunpack.i.h.bf16 %v4211_v30  ;;  %v4212_v59 = vunpack.i.l.bf16 %v4211_v30 }
  0xbb   :  { %3925 = vmatprep.mubr.msk.bf16.mxu0 %vm1115_vm3, %v1087_v37  ;;  %v977_v15 = vsel %vm945_vm1, %v4975_v2, %v4218_v43  ;;  %v976_v44 = vsel %vm945_vm1, %v4973_v1, %v4217_v41 }
  0xbc   :  { %3926 = vmatmul.mubr.msk.bf16.gmra.mrb[24].mxu0 %vm1115_vm3, %v1088_v23  ;;  %v4226_v8 = vpop.permute.xlu1 %4225  ;;  %v975_v34 = vsel %vm945_vm1, %v4964_v61, %v4213_v42  ;;  %v974_v7 = vsel %vm945_vm1, %v4959_v52, %v4212_v59 }
  0xbd   :  { %v4228_v9 = vunpack.i.h.bf16 %v4226_v8  ;;  %v4227_v60 = vunpack.i.l.bf16 %v4226_v8  ;;  %v4221_v28 = vpop.permute.xlu0 %4220  ;;  %v6112_v8 = vld [vmem:[#allocation2_spill] sm:$0xff] }
  0xbe   :  { %v4223_v0 = vunpack.i.h.bf16 %v4221_v28  ;;  %v4222_v25 = vunpack.i.l.bf16 %v4221_v28 }
  0xbf   :  { %v1041_v4 = vsel %vm1010_vm2, %v976_v44, %v4227_v60  ;;  %v1042_v33 = vsel %vm1010_vm2, %v977_v15, %v4228_v9 }
  0xc0   :  { %v1090_v13 = vpack.c.bf16 %v1042_v33, %v1041_v4  ;;  %v1039_v3 = vsel %vm1010_vm2, %v974_v7, %v4222_v25  ;;  %v1040_v2 = vsel %vm1010_vm2, %v975_v34, %v4223_v0  ;;  %v4236_v11 = vpop.permute.xlu1 %4235 }
  0xc1   :  { %v1089_v55 = vpack.c.bf16 %v1040_v2, %v1039_v3  ;;  %v4231_v1 = vpop.permute.xlu0 %4230  ;;  %v4238_v6 = vunpack.i.h.bf16 %v4236_v11  ;;  %v4237_v27 = vunpack.i.l.bf16 %v4236_v11  ;;  %v6113_v11 = vld [vmem:[#allocation6_spill] sm:$0xff] }
  0xc2   :  { %v4233_v51 = vunpack.i.h.bf16 %v4231_v1  ;;  %v4232_v32 = vunpack.i.l.bf16 %v4231_v1  ;;  %v6114_v1 = vld [vmem:[#allocation5_spill] sm:$0xff] }
  0xc3   :  { %3929 = vmatprep.mubr.msk.bf16.mxu0 %vm1115_vm3, %v1089_v55  ;;  %v981_v16 = vsel %vm945_vm1, %v5003_v53, %v4238_v6  ;;  %v980_v38 = vsel %vm945_vm1, %v5001_v47, %v4237_v27 }
  0xc4   :  { %3930 = vmatmul.mubr.msk.bf16.gmra.mrb[28].mxu0 %vm1115_vm3, %v1090_v13  ;;  %v4246_v52 = vpop.permute.xlu1 %4245  ;;  %v979_v21 = vsel %vm945_vm1, %v4998_v35, %v4233_v51  ;;  %v978_v54 = vsel %vm945_vm1, %v4989_v19, %v4232_v32  ;;  %v6115_v32 = vld [vmem:[#allocation4_spill] sm:$0xff] }
  0xc5   :  { %v4248_v61 = vunpack.i.h.bf16 %v4246_v52  ;;  %v4247_v22 = vunpack.i.l.bf16 %v4246_v52  ;;  %v4241_v26 = vpop.permute.xlu0 %4240 }
  0xc6   :  { %v4243_v39 = vunpack.i.h.bf16 %v4241_v26  ;;  %v4242_v5 = vunpack.i.l.bf16 %v4241_v26 }
  0xc7   :  { %v1045_v46 = vsel %vm1010_vm2, %v980_v38, %v4247_v22  ;;  %v1046_v10 = vsel %vm1010_vm2, %v981_v16, %v4248_v61  ;;  %v6116_v61 = vld [vmem:[#allocation3_spill] sm:$0xff] }
  0xc8   :  { %v1092_v58 = vpack.c.bf16 %v1046_v10, %v1045_v46  ;;  %v1043_v56 = vsel %vm1010_vm2, %v978_v54, %v4242_v5  ;;  %v1044_v53 = vsel %vm1010_vm2, %v979_v21, %v4243_v39  ;;  %v4256_v57 = vpop.permute.xlu1 %4255 }
  0xc9   :  { %v1091_v45 = vpack.c.bf16 %v1044_v53, %v1043_v56  ;;  %v4251_v47 = vpop.permute.xlu0 %4250  ;;  %v4258_v18 = vunpack.i.h.bf16 %v4256_v57  ;;  %v4257_v23 = vunpack.i.l.bf16 %v4256_v57 }
  0xca   :  { %v4253_v20 = vunpack.i.h.bf16 %v4251_v47  ;;  %v4252_v31 = vunpack.i.l.bf16 %v4251_v47 }
  0xcb   :  { %3933 = vmatprep.mubr.msk.bf16.mxu0 %vm1115_vm3, %v1091_v45  ;;  %v985_v30 = vsel %vm945_vm1, %v5031_v49, %v4258_v18  ;;  %v984_v43 = vsel %vm945_vm1, %v5029_v40, %v4257_v23 }
  0xcc   :  { %3934 = vmatmul.mubr.msk.bf16.gmra.mrb[32].mxu0 %vm1115_vm3, %v1092_v58  ;;  %v4266_v19 = vpop.permute.xlu1 %4265  ;;  %v983_v59 = vsel %vm945_vm1, %v5023_v12, %v4253_v20  ;;  %v982_v9 = vsel %vm945_vm1, %v6112_v8, %v4252_v31  ;;  %v6117_v20 = vld [vmem:[#allocation9_spill] sm:$0xff] }
  0xcd   :  { %v4268_v35 = vunpack.i.h.bf16 %v4266_v19  ;;  %v4267_v17 = vunpack.i.l.bf16 %v4266_v19  ;;  %v4261_v37 = vpop.permute.xlu0 %4260 }
  0xce   :  { %v4263_v41 = vunpack.i.h.bf16 %v4261_v37  ;;  %v4262_v42 = vunpack.i.l.bf16 %v4261_v37 }
  0xcf   :  { %v1049_v60 = vsel %vm1010_vm2, %v984_v43, %v4267_v17  ;;  %v1050_v28 = vsel %vm1010_vm2, %v985_v30, %v4268_v35  ;;  %v6118_v17 = vld [vmem:[#allocation8_spill] sm:$0xff]  ;;  %v6119_v30 = vld [vmem:[#allocation7_spill] sm:$0xff] }
  0xd0   :  { %v1094_v15 = vpack.c.bf16 %v1050_v28, %v1049_v60  ;;  %v1047_v44 = vsel %vm1010_vm2, %v982_v9, %v4262_v42  ;;  %v1048_v49 = vsel %vm1010_vm2, %v983_v59, %v4263_v41  ;;  %v4276_v0 = vpop.permute.xlu1 %4275 }
  0xd1   :  { %v1093_v25 = vpack.c.bf16 %v1048_v49, %v1047_v44  ;;  %v4271_v40 = vpop.permute.xlu0 %4270  ;;  %v4278_v34 = vunpack.i.h.bf16 %v4276_v0  ;;  %v4277_v7 = vunpack.i.l.bf16 %v4276_v0 }
  0xd2   :  { %v4273_v4 = vunpack.i.h.bf16 %v4271_v40  ;;  %v4272_v33 = vunpack.i.l.bf16 %v4271_v40 }
  0xd3   :  { %3937 = vmatprep.mubr.msk.bf16.mxu0 %vm1115_vm3, %v1093_v25  ;;  %v989_v55 = vsel %vm945_vm1, %v6113_v11, %v4278_v34  ;;  %v988_v6 = vsel %vm945_vm1, %v6114_v1, %v4277_v7  ;;  %v6122_v11 = vld [vmem:[#allocation11_spill] sm:$0xff]  ;;  %v6123_v1 = vld [vmem:[#allocation10_spill] sm:$0xff] }
  0xd4   :  { %3938 = vmatmul.mubr.msk.bf16.gmra.mrb[36].mxu0 %vm1115_vm3, %v1094_v15  ;;  %v4286_v12 = vpop.permute.xlu1 %4285  ;;  %v987_v52 = vsel %vm945_vm1, %v6115_v32, %v4273_v4  ;;  %v986_v22 = vsel %vm945_vm1, %v6116_v61, %v4272_v33  ;;  %v6120_v4 = vld [vmem:[#allocation13_spill] sm:$0xff] }
  0xd5   :  { %v4288_v13 = vunpack.i.h.bf16 %v4286_v12  ;;  %v4287_v3 = vunpack.i.l.bf16 %v4286_v12  ;;  %v4281_v2 = vpop.permute.xlu0 %4280  ;;  %v6121_v12 = vld [vmem:[#allocation12_spill] sm:$0xff] }
  0xd6   :  { %v4283_v27 = vunpack.i.h.bf16 %v4281_v2  ;;  %v4282_v51 = vunpack.i.l.bf16 %v4281_v2 }
  0xd7   :  { %v1053_v26 = vsel %vm1010_vm2, %v988_v6, %v4287_v3  ;;  %v1054_v16 = vsel %vm1010_vm2, %v989_v55, %v4288_v13 }
  0xd8   :  { %v1096_v38 = vpack.c.bf16 %v1054_v16, %v1053_v26  ;;  %v1051_v39 = vsel %vm1010_vm2, %v986_v22, %v4282_v51  ;;  %v1052_v5 = vsel %vm1010_vm2, %v987_v52, %v4283_v27  ;;  %v4296_v21 = vpop.permute.xlu1 %4295 }
  0xd9   :  { %v1095_v54 = vpack.c.bf16 %v1052_v5, %v1051_v39  ;;  %v4291_v46 = vpop.permute.xlu0 %4290  ;;  %v4298_v10 = vunpack.i.h.bf16 %v4296_v21  ;;  %v4297_v58 = vunpack.i.l.bf16 %v4296_v21 }
  0xda   :  { %v4293_v56 = vunpack.i.h.bf16 %v4291_v46  ;;  %v4292_v53 = vunpack.i.l.bf16 %v4291_v46 }
  0xdb   :  { %3941 = vmatprep.mubr.msk.bf16.mxu0 %vm1115_vm3, %v1095_v54  ;;  %v993_v23 = vsel %vm945_vm1, %v5090_v63, %v4298_v10  ;;  %v992_v31 = vsel %vm945_vm1, %v6117_v20, %v4297_v58  ;;  %v6126_v20 = vld [vmem:[#allocation14_spill] sm:$0xff] }
  0xdc   :  { %3942 = vmatmul.mubr.msk.bf16.gmra.mrb[40].mxu0 %vm1115_vm3, %v1096_v38  ;;  %v4306_v57 = vpop.permute.xlu1 %4305  ;;  %v991_v37 = vsel %vm945_vm1, %v6118_v17, %v4293_v56  ;;  %v990_v43 = vsel %vm945_vm1, %v6119_v30, %v4292_v53  ;;  %v6124_v53 = vld [vmem:[#allocation16_spill] sm:$0xff] }
  0xdd   :  { %v4308_v45 = vunpack.i.h.bf16 %v4306_v57  ;;  %v4307_v47 = vunpack.i.l.bf16 %v4306_v57  ;;  %v4301_v18 = vpop.permute.xlu0 %4300 }
  0xde   :  { %v4303_v19 = vunpack.i.h.bf16 %v4301_v18  ;;  %v4302_v35 = vunpack.i.l.bf16 %v4301_v18  ;;  %v6125_v18 = vld [vmem:[#allocation15_spill] sm:$0xff] }
  0xdf   :  { %v1057_v41 = vsel %vm1010_vm2, %v992_v31, %v4307_v47  ;;  %v1058_v42 = vsel %vm1010_vm2, %v993_v23, %v4308_v45 }
  0xe0   :  { %v1098_v59 = vpack.c.bf16 %v1058_v42, %v1057_v41  ;;  %v1055_v8 = vsel %vm1010_vm2, %v990_v43, %v4302_v35  ;;  %v1056_v63 = vsel %vm1010_vm2, %v991_v37, %v4303_v19  ;;  %v4316_v9 = vpop.permute.xlu1 %4315 }
  0xe1   :  { %v1097_v60 = vpack.c.bf16 %v1056_v63, %v1055_v8  ;;  %v4311_v28 = vpop.permute.xlu0 %4310  ;;  %v4318_v15 = vunpack.i.h.bf16 %v4316_v9  ;;  %v4317_v44 = vunpack.i.l.bf16 %v4316_v9 }
  0xe2   :  { %v4313_v49 = vunpack.i.h.bf16 %v4311_v28  ;;  %v4312_v0 = vunpack.i.l.bf16 %v4311_v28 }
  0xe3   :  { %3945 = vmatprep.mubr.msk.bf16.mxu0 %vm1115_vm3, %v1097_v60  ;;  %v997_v33 = vsel %vm945_vm1, %v6120_v4, %v4318_v15  ;;  %v996_v13 = vsel %vm945_vm1, %v6121_v12, %v4317_v44 }
  0xe4   :  { %3946 = vmatmul.mubr.msk.bf16.gmra.mrb[44].mxu0 %vm1115_vm3, %v1098_v59  ;;  %v4326_v25 = vpop.permute.xlu1 %4325  ;;  %v995_v55 = vsel %vm945_vm1, %v6122_v11, %v4313_v49  ;;  %v994_v6 = vsel %vm945_vm1, %v6123_v1, %v4312_v0 }
  0xe5   :  { %v4328_v40 = vunpack.i.h.bf16 %v4326_v25  ;;  %v4327_v34 = vunpack.i.l.bf16 %v4326_v25  ;;  %v4321_v7 = vpop.permute.xlu0 %4320 }
  0xe6   :  { %v4323_v3 = vunpack.i.h.bf16 %v4321_v7  ;;  %v4322_v2 = vunpack.i.l.bf16 %v4321_v7 }
  0xe7   :  { %v1061_v27 = vsel %vm1010_vm2, %v996_v13, %v4327_v34  ;;  %v1062_v51 = vsel %vm1010_vm2, %v997_v33, %v4328_v40 }
  0xe8   :  { %v1100_v32 = vpack.c.bf16 %v1062_v51, %v1061_v27  ;;  %v1059_v52 = vsel %vm1010_vm2, %v994_v6, %v4322_v2  ;;  %v1060_v61 = vsel %vm1010_vm2, %v995_v55, %v4323_v3  ;;  %v4336_v22 = vpop.permute.xlu1 %4335 }
  0xe9   :  { %v1099_v26 = vpack.c.bf16 %v1060_v61, %v1059_v52  ;;  %v4331_v16 = vpop.permute.xlu0 %4330  ;;  %v4338_v38 = vunpack.i.h.bf16 %v4336_v22  ;;  %v4337_v39 = vunpack.i.l.bf16 %v4336_v22 }
  0xea   :  { %v4333_v5 = vunpack.i.h.bf16 %v4331_v16  ;;  %v4332_v21 = vunpack.i.l.bf16 %v4331_v16 }
  0xeb   :  { %3949 = vmatprep.mubr.msk.bf16.mxu0 %vm1115_vm3, %v1099_v26  ;;  %v1001_v56 = vsel %vm945_vm1, %v5147_v24, %v4338_v38  ;;  %v1000_v57 = vsel %vm945_vm1, %v6124_v53, %v4337_v39  ;;  %v6128_v26 = vld [vmem:[#allocation18_spill] sm:$0xff]  ;;  %v6129_v38 = vld [vmem:[#allocation17_spill] sm:$0xff] }
  0xec   :  { %3950 = vmatmul.mubr.msk.bf16.gmra.mrb[48].mxu0 %vm1115_vm3, %v1100_v32  ;;  %v4346_v54 = vpop.permute.xlu1 %4345  ;;  %v999_v23 = vsel %vm945_vm1, %v6125_v18, %v4333_v5  ;;  %v998_v31 = vsel %vm945_vm1, %v6126_v20, %v4332_v21 }
  0xed   :  { %v4348_v46 = vunpack.i.h.bf16 %v4346_v54  ;;  %v4347_v10 = vunpack.i.l.bf16 %v4346_v54  ;;  %v4341_v58 = vpop.permute.xlu0 %4340 }
  0xee   :  { %v4343_v45 = vunpack.i.h.bf16 %v4341_v58  ;;  %v4342_v47 = vunpack.i.l.bf16 %v4341_v58 }
  0xef   :  { %v1065_v19 = vsel %vm1010_vm2, %v1000_v57, %v4347_v10  ;;  %v1066_v35 = vsel %vm1010_vm2, %v1001_v56, %v4348_v46  ;;  %v5427_v46 = vld [vmem:[%s6059_s2] ss:$0 sm:$0xff] }
  0xf0   :  { %v1102_v17 = vpack.c.bf16 %v1066_v35, %v1065_v19  ;;  %v1063_v37 = vsel %vm1010_vm2, %v998_v31, %v4342_v47  ;;  %v1064_v24 = vsel %vm1010_vm2, %v999_v23, %v4343_v45  ;;  %v4356_v30 = vpop.permute.xlu1 %4355 }
  0xf1   :  { %v1101_v43 = vpack.c.bf16 %v1064_v24, %v1063_v37  ;;  %v4351_v41 = vpop.permute.xlu0 %4350  ;;  %v4358_v42 = vunpack.i.h.bf16 %v4356_v30  ;;  %v4357_v59 = vunpack.i.l.bf16 %v4356_v30 }
  0xf2   :  { %v4353_v8 = vunpack.i.h.bf16 %v4351_v41  ;;  %v4352_v63 = vunpack.i.l.bf16 %v4351_v41 }
  0xf3   :  { %3953 = vmatprep.mubr.msk.bf16.mxu0 %vm1115_vm3, %v1101_v43  ;;  %v1005_v44 = vsel %vm945_vm1, %v5171_v62, %v4358_v42  ;;  %v1004_v49 = vsel %vm945_vm1, %v5169_v14, %v4357_v59 }
  0xf4   :  { %3954 = vmatmul.mubr.msk.bf16.gmra.mrb[52].mxu0 %vm1115_vm3, %v1102_v17  ;;  %v4366_v9 = vpop.permute.xlu1 %4365  ;;  %v1003_v40 = vsel %vm945_vm1, %v5163_v48, %v4353_v8  ;;  %v1002_v34 = vsel %vm945_vm1, %v5161_v36, %v4352_v63  ;;  %v6127_v48 = vld [vmem:[#allocation19_spill] sm:$0xff] }
  0xf5   :  { %v4368_v60 = vunpack.i.h.bf16 %v4366_v9  ;;  %v4367_v28 = vunpack.i.l.bf16 %v4366_v9  ;;  %v4361_v15 = vpop.permute.xlu0 %4360 }
  0xf6   :  { %v4363_v0 = vunpack.i.h.bf16 %v4361_v15  ;;  %v4362_v25 = vunpack.i.l.bf16 %v4361_v15 }
  0xf7   :  { %v1069_v7 = vsel %vm1010_vm2, %v1004_v49, %v4367_v28  ;;  %v1070_v4 = vsel %vm1010_vm2, %v1005_v44, %v4368_v60 }
  0xf8   :  { %v1104_v33 = vpack.c.bf16 %v1070_v4, %v1069_v7  ;;  %v1067_v12 = vsel %vm1010_vm2, %v1002_v34, %v4362_v25  ;;  %v1068_v62 = vsel %vm1010_vm2, %v1003_v40, %v4363_v0  ;;  %v4376_v13 = vpop.permute.xlu1 %4375 }
  0xf9   :  { %v1103_v3 = vpack.c.bf16 %v1068_v62, %v1067_v12  ;;  %v4371_v14 = vpop.permute.xlu0 %4370  ;;  %v4378_v2 = vunpack.i.h.bf16 %v4376_v13  ;;  %v4377_v11 = vunpack.i.l.bf16 %v4376_v13 }
  0xfa   :  { %v4373_v55 = vunpack.i.h.bf16 %v4371_v14  ;;  %v4372_v1 = vunpack.i.l.bf16 %v4371_v14 }
  0xfb   :  { %3957 = vmatprep.mubr.msk.bf16.mxu0 %vm1115_vm3, %v1103_v3  ;;  %v1008_v36 = vsel %vm945_vm1, %v5183_v29, %v4377_v11  ;;  %v1009_v6 = vsel %vm945_vm1, %v6127_v48, %v4378_v2 }
  0xfc   :  { %3958 = vmatmul.mubr.msk.bf16.gmra.mrb[56].mxu0 %vm1115_vm3, %v1104_v33  ;;  %v881_v27 = vpop.permute.xlu1 %880  ;;  %v1007_v16 = vsel %vm945_vm1, %v6128_v26, %v4373_v55  ;;  %v1006_v39 = vsel %vm945_vm1, %v6129_v38, %v4372_v1 }
  0xfd   :  { %v4381_v51 = vpop.permute.xlu0 %4380  ;;  %v1073_v32 = vsel %vm1010_vm2, %v1008_v36, %v881_v27  ;;  %v1074_v52 = vsel %vm1010_vm2, %v1009_v6, %v881_v27 }
  0xfe   :  { %v4383_v61 = vunpack.i.h.bf16 %v4381_v51  ;;  %v4382_v22 = vunpack.i.l.bf16 %v4381_v51  ;;  %v1106_v21 = vpack.c.bf16 %v1074_v52, %v1073_v32 }
 0x100   :  { %v1071_v29 = vsel %vm1010_vm2, %v1006_v39, %v4382_v22  ;;  %v1072_v5 = vsel %vm1010_vm2, %v1007_v16, %v4383_v61 }
 0x101   :  { %v1105_v54 = vpack.c.bf16 %v1072_v5, %v1071_v29 }
 0x103   :  { %3961 = vmatprep.mubr.msk.bf16.mxu0 %vm1115_vm3, %v1105_v54 }
 0x104   :  { %3962 = vmatmul.mubr.msk.bf16.gmra.mrb[60].mxu0 %vm1115_vm3, %v1106_v21 }
 0x105   :  { %4055 = vmatprep.mubr.msk.bf16.mxu0 %vm4674_vm10, %v6111_v50 }
 0x15f   :  { %v3903_v10 = vpop.f32.mrb[0].mxu0 }
 0x160   :  { %v1259_v58 = vadd.f32 %v3903_v10, %v5427_v46  ;;  %v1250_v56 = vpop.f32.mrb[1].mxu0 }
 0x161   :  { %v1251_v53 = vadd.f32 %v5427_v46, %v1250_v56  ;;  %v3904_v57 = vpop.f32.mrb[2].mxu0 }
 0x162   :  { %v1507_v45 = vmax.f32 %v1259_v58, 0.0  ;;  %v1262_v47 = vadd.f32 %v3904_v57, %v5427_v46  ;;  %v1253_v18 = vpop.f32.mrb[3].mxu0 }
 0x163   :  { %v1505_v23 = vmax.f32 %v1251_v53, 0.0  ;;  %v1254_v20 = vadd.f32 %v5427_v46, %v1253_v18 }
 0x164   :  { %v1571_v31 = vmul.f32 7.5, %v1507_v45  ;;  %v1508_v19 = vmax.f32 %v1262_v47, 0.0 }
 0x165   :  { %v1569_v35 = vmul.f32 7.5, %v1505_v23  ;;  %v1506_v17 = vmax.f32 %v1254_v20, 0.0 }
 0x166   :  { %v1635_v37 = vadd.f32 0.5, %v1571_v31  ;;  %v1572_v24 = vmul.f32 7.5, %v1508_v19 }
 0x167   :  { %v1633_v30 = vadd.f32 0.5, %v1569_v35  ;;  %v1570_v43 = vmul.f32 7.5, %v1506_v17  ;;  %v3907_v41 = vpop.f32.mrb[4].mxu0 }
 0x168   :  { %v1699_v42 = vfloor.f32 %v1635_v37  ;;  %v1636_v59 = vadd.f32 0.5, %v1572_v24  ;;  %v1275_v8 = vadd.f32 %v3907_v41, %v5427_v46  ;;  %v1266_v63 = vpop.f32.mrb[5].mxu0 }
 0x169   :  { %v1697_v9 = vfloor.f32 %v1633_v30  ;;  %v1634_v60 = vadd.f32 0.5, %v1570_v43  ;;  %v1267_v28 = vadd.f32 %v5427_v46, %v1266_v63  ;;  %v3908_v15 = vpop.f32.mrb[6].mxu0 }
 0x16a   :  { %v1763_v44 = vmax.f32 %v1699_v42, 0.0  ;;  %v1700_v49 = vfloor.f32 %v1636_v59  ;;  %v1511_v0 = vmax.f32 %v1275_v8, 0.0  ;;  %v1278_v25 = vadd.f32 %v3908_v15, %v5427_v46  ;;  %v1269_v40 = vpop.f32.mrb[7].mxu0 }
 0x16b   :  { %v1761_v34 = vmax.f32 %v1697_v9, 0.0  ;;  %v1698_v7 = vfloor.f32 %v1634_v60  ;;  %v1509_v4 = vmax.f32 %v1267_v28, 0.0  ;;  %v1270_v33 = vadd.f32 %v5427_v46, %v1269_v40 }
 0x16c   :  { %v1827_v12 = vmin.f32 %v1763_v44, 15.0  ;;  %v1764_v62 = vmax.f32 %v1700_v49, 0.0  ;;  %v1575_v13 = vmul.f32 7.5, %v1511_v0  ;;  %v1512_v3 = vmax.f32 %v1278_v25, 0.0 }
 0x16d   :  { %v1825_v14 = vmin.f32 %v1761_v34, 15.0  ;;  %v1762_v2 = vmax.f32 %v1698_v7, 0.0  ;;  %v1573_v11 = vmul.f32 7.5, %v1509_v4  ;;  %v1510_v55 = vmax.f32 %v1270_v33, 0.0 }
 0x16e   :  { %v1891_v1 = vmul.f32 0.13333334, %v1827_v12  ;;  %v1828_v36 = vmin.f32 %v1764_v62, 15.0  ;;  %v1639_v48 = vadd.f32 0.5, %v1575_v13  ;;  %v1576_v6 = vmul.f32 7.5, %v1512_v3 }
 0x16f   :  { %v1889_v27 = vmul.f32 0.13333334, %v1825_v14  ;;  %v1826_v51 = vmin.f32 %v1762_v2, 15.0  ;;  %v1637_v32 = vadd.f32 0.5, %v1573_v11  ;;  %v1574_v52 = vmul.f32 7.5, %v1510_v55  ;;  %v3911_v61 = vpop.f32.mrb[8].mxu0 }
 0x170   :  { %v1892_v22 = vmul.f32 0.13333334, %v1828_v36  ;;  %v1703_v26 = vfloor.f32 %v1639_v48  ;;  %v1640_v16 = vadd.f32 0.5, %v1576_v6  ;;  %v1291_v38 = vadd.f32 %v3911_v61, %v5427_v46  ;;  %v1282_v39 = vpop.f32.mrb[9].mxu0 }
 0x171   :  { %v1890_v29 = vmul.f32 0.13333334, %v1826_v51  ;;  %v1701_v5 = vfloor.f32 %v1637_v32  ;;  %v1638_v21 = vadd.f32 0.5, %v1574_v52  ;;  %v1283_v54 = vadd.f32 %v5427_v46, %v1282_v39  ;;  %v3912_v10 = vpop.f32.mrb[10].mxu0 }
 0x172   :  { %v1767_v58 = vmax.f32 %v1703_v26, 0.0  ;;  %v1704_v56 = vfloor.f32 %v1640_v16  ;;  %v1515_v53 = vmax.f32 %v1291_v38, 0.0  ;;  %v1294_v57 = vadd.f32 %v3912_v10, %v5427_v46  ;;  %v1285_v45 = vpop.f32.mrb[11].mxu0 }
 0x173   :  { %v1765_v47 = vmax.f32 %v1701_v5, 0.0  ;;  %v1702_v18 = vfloor.f32 %v1638_v21  ;;  %v1513_v23 = vmax.f32 %v1283_v54, 0.0  ;;  %v1286_v20 = vadd.f32 %v5427_v46, %v1285_v45 }
 0x174   :  { %v1831_v31 = vmin.f32 %v1767_v58, 15.0  ;;  %v1768_v19 = vmax.f32 %v1704_v56, 0.0  ;;  %v1579_v35 = vmul.f32 7.5, %v1515_v53  ;;  %v1516_v17 = vmax.f32 %v1294_v57, 0.0 }
 0x175   :  { %v1829_v37 = vmin.f32 %v1765_v47, 15.0  ;;  %v1766_v24 = vmax.f32 %v1702_v18, 0.0  ;;  %v1577_v30 = vmul.f32 7.5, %v1513_v23  ;;  %v1514_v43 = vmax.f32 %v1286_v20, 0.0 }
 0x176   :  { %v1895_v41 = vmul.f32 0.13333334, %v1831_v31  ;;  %v1832_v42 = vmin.f32 %v1768_v19, 15.0  ;;  %v1643_v59 = vadd.f32 0.5, %v1579_v35  ;;  %v1580_v8 = vmul.f32 7.5, %v1516_v17 }
 0x177   :  { %v1893_v63 = vmul.f32 0.13333334, %v1829_v37  ;;  %v1830_v9 = vmin.f32 %v1766_v24, 15.0  ;;  %v1641_v60 = vadd.f32 0.5, %v1577_v30  ;;  %v1578_v28 = vmul.f32 7.5, %v1514_v43  ;;  %v3915_v15 = vpop.f32.mrb[12].mxu0 }
 0x178   :  { %v1896_v44 = vmul.f32 0.13333334, %v1832_v42  ;;  %v1707_v49 = vfloor.f32 %v1643_v59  ;;  %v1644_v0 = vadd.f32 0.5, %v1580_v8  ;;  %v1307_v25 = vadd.f32 %v3915_v15, %v5427_v46  ;;  %v1298_v40 = vpop.f32.mrb[13].mxu0 }
 0x179   :  { %v5442_v34 = vmax.f32 %v1893_v63, %v1895_v41  ;;  %v1894_v7 = vmul.f32 0.13333334, %v1830_v9  ;;  %v1705_v4 = vfloor.f32 %v1641_v60  ;;  %v1642_v33 = vadd.f32 0.5, %v1578_v28  ;;  %v3916_v12 = vpop.f32.mrb[14].mxu0  ;;  %v4654_v9 = vld [vmem:[%s6060_s3] sm:$0xff]  }
 0x17a   :  { %v1771_v62 = vmax.f32 %v1707_v49, 0.0  ;;  %v1708_v13 = vfloor.f32 %v1644_v0  ;;  %v1519_v3 = vmax.f32 %v1307_v25, 0.0  ;;  %v5444_v14 = vmax.f32 %v1889_v27, %v1891_v1  ;;  %v1301_v2 = vpop.f32.mrb[15].mxu0  ;;  %3965 = vmatprep.subr.bf16.mxu1 %v4654_v9 }
 0x17b   :  { %v5446_v11 = vmax.f32 %v1894_v7, %v1896_v44  ;;  %v1769_v55 = vmax.f32 %v1705_v4, 0.0  ;;  %v1706_v36 = vfloor.f32 %v1642_v33  ;;  %v5448_v48 = vmax.f32 %v1890_v29, %v1892_v22  ;;  %3966 = vmatpush3.bf16.msra.mxu1 %v4654_v9 }
 0x17c   :  { %v1835_v6 = vmin.f32 %v1771_v62, 15.0  ;;  %v1772_v51 = vmax.f32 %v1708_v13, 0.0  ;;  %v1583_v32 = vmul.f32 7.5, %v1519_v3  ;;  %v1299_v52 = vadd.f32 %v5427_v46, %v1298_v40 }
 0x17d   :  { %v1833_v61 = vmin.f32 %v1769_v55, 15.0  ;;  %v1770_v26 = vmax.f32 %v1706_v36, 0.0  ;;  %v4384_v16 = vpack.i.bf16 %v5448_v48, %v5444_v14  ;;  %v1310_v1 = vadd.f32 %v3916_v12, %v5427_v46 }
 0x17e   :  { %v1899_v27 = vmul.f32 0.13333334, %v1835_v6  ;;  %v1836_v38 = vmin.f32 %v1772_v51, 15.0  ;;  %v1647_v39 = vadd.f32 0.5, %v1583_v32  ;;  %v1517_v5 = vmax.f32 %v1299_v52, 0.0 }
 0x17f   :  { %v1897_v21 = vmul.f32 0.13333334, %v1833_v61  ;;  %v1834_v54 = vmin.f32 %v1770_v26, 15.0  ;;  %4385 = vrot.lane.b32.xlu0 %v4384_v16, %s4671_s17  ;;  %v1520_v22 = vmax.f32 %v1310_v1, 0.0  ;;  %v1302_v29 = vadd.f32 %v5427_v46, %v1301_v2  ;;  %v3919_v10 = vpop.f32.mrb[16].mxu0 }
 0x180   :  { %v1900_v58 = vmul.f32 0.13333334, %v1836_v38  ;;  %v1711_v56 = vfloor.f32 %v1647_v39  ;;  %v1581_v53 = vmul.f32 7.5, %v1517_v5  ;;  %v1323_v57 = vadd.f32 %v3919_v10, %v5427_v46  ;;  %v1314_v45 = vpop.f32.mrb[17].mxu0 }
 0x181   :  { %v5457_v47 = vmax.f32 %v1897_v21, %v1899_v27  ;;  %v1898_v18 = vmul.f32 0.13333334, %v1834_v54  ;;  %v1584_v23 = vmul.f32 7.5, %v1520_v22  ;;  %v1518_v20 = vmax.f32 %v1302_v29, 0.0  ;;  %v3920_v31 = vpop.f32.mrb[18].mxu0 }
 0x182   :  { %v1775_v19 = vmax.f32 %v1711_v56, 0.0  ;;  %v1645_v35 = vadd.f32 0.5, %v1581_v53  ;;  %v1523_v17 = vmax.f32 %v1323_v57, 0.0  ;;  %v4389_v37 = vpack.i.bf16 %v5446_v11, %v5442_v34  ;;  %v1317_v24 = vpop.f32.mrb[19].mxu0 }
 0x183   :  { %v5461_v30 = vmax.f32 %v1898_v18, %v1900_v58  ;;  %v1648_v43 = vadd.f32 0.5, %v1584_v23  ;;  %v1582_v41 = vmul.f32 7.5, %v1518_v20  ;;  %v1315_v63 = vadd.f32 %v5427_v46, %v1314_v45 }
 0x184   :  { %v1839_v42 = vmin.f32 %v1775_v19, 15.0  ;;  %v1709_v59 = vfloor.f32 %v1645_v35  ;;  %v1587_v8 = vmul.f32 7.5, %v1523_v17  ;;  %4390 = vrot.lane.b32.xlu1 %v4389_v37, %s4671_s17  ;;  %4395 = vrot.lane.b32.xlu0 %v4389_v37, %s4672_s29  ;;  %v1326_v15 = vadd.f32 %v3920_v31, %v5427_v46 }
 0x185   :  { %v1712_v60 = vfloor.f32 %v1648_v43  ;;  %v1646_v28 = vadd.f32 0.5, %v1582_v41  ;;  %v1318_v44 = vadd.f32 %v5427_v46, %v1317_v24  ;;  %v1521_v40 = vmax.f32 %v1315_v63, 0.0 }
 0x186   :  { %v1903_v49 = vmul.f32 0.13333334, %v1839_v42  ;;  %v1773_v0 = vmax.f32 %v1709_v59, 0.0  ;;  %v1651_v25 = vadd.f32 0.5, %v1587_v8  ;;  %v1524_v33 = vmax.f32 %v1326_v15, 0.0 }
 0x187   :  { %v1776_v7 = vmax.f32 %v1712_v60, 0.0  ;;  %v1710_v4 = vfloor.f32 %v1646_v28  ;;  %v1522_v12 = vmax.f32 %v1318_v44, 0.0  ;;  %v3923_v62 = vpop.f32.mrb[20].mxu0  ;;  %v1585_v2 = vmul.f32 7.5, %v1521_v40 }
 0x188   :  { %v1837_v13 = vmin.f32 %v1773_v0, 15.0  ;;  %v1715_v3 = vfloor.f32 %v1651_v25  ;;  %v1339_v55 = vadd.f32 %v3923_v62, %v5427_v46  ;;  %v1330_v36 = vpop.f32.mrb[21].mxu0  ;;  %v1588_v32 = vmul.f32 7.5, %v1524_v33 }
 0x189   :  { %v1840_v6 = vmin.f32 %v1776_v7, 15.0  ;;  %v1774_v51 = vmax.f32 %v1710_v4, 0.0  ;;  %v1586_v52 = vmul.f32 7.5, %v1522_v12  ;;  %v3924_v61 = vpop.f32.mrb[22].mxu0  ;;  %v1649_v1 = vadd.f32 0.5, %v1585_v2 }
 0x18a   :  { %v1901_v26 = vmul.f32 0.13333334, %v1837_v13  ;;  %v1779_v16 = vmax.f32 %v1715_v3, 0.0  ;;  %v1527_v27 = vmax.f32 %v1339_v55, 0.0  ;;  %v1333_v38 = vpop.f32.mrb[23].mxu0  ;;  %v1652_v21 = vadd.f32 0.5, %v1588_v32 }
 0x18b   :  { %v1904_v39 = vmul.f32 0.13333334, %v1840_v6  ;;  %v1838_v5 = vmin.f32 %v1774_v51, 15.0  ;;  %v1650_v54 = vadd.f32 0.5, %v1586_v52  ;;  %v1713_v10 = vfloor.f32 %v1649_v1 }
 0x18c   :  { %v5472_v22 = vmax.f32 %v1901_v26, %v1903_v49  ;;  %v1843_v29 = vmin.f32 %v1779_v16, 15.0  ;;  %v1591_v58 = vmul.f32 7.5, %v1527_v27  ;;  %v1716_v53 = vfloor.f32 %v1652_v21 }
 0x18d   :  { %v1902_v56 = vmul.f32 0.13333334, %v1838_v5  ;;  %v1714_v57 = vfloor.f32 %v1650_v54  ;;  %v4399_v45 = vpack.i.bf16 %v5461_v30, %v5457_v47  ;;  %v1777_v23 = vmax.f32 %v1713_v10, 0.0 }
 0x18e   :  { %v1907_v18 = vmul.f32 0.13333334, %v1843_v29  ;;  %v1655_v20 = vadd.f32 0.5, %v1591_v58  ;;  %v1780_v19 = vmax.f32 %v1716_v53, 0.0  ;;  %v1331_v17 = vadd.f32 %v5427_v46, %v1330_v36 }
 0x18f   :  { %v5476_v31 = vmax.f32 %v1902_v56, %v1904_v39  ;;  %v1778_v35 = vmax.f32 %v1714_v57, 0.0  ;;  %4400 = vrot.lane.b32.xlu1 %v4399_v45, %s4672_s29  ;;  %v3927_v37 = vpop.f32.mrb[24].mxu0  ;;  %v1841_v24 = vmin.f32 %v1777_v23, 15.0  ;;  %4405 = vrot.lane.b32.xlu0 %v4399_v45, %s4671_s17  ;;  %v1342_v41 = vadd.f32 %v3924_v61, %v5427_v46 }
 0x190   :  { %v1719_v43 = vfloor.f32 %v1655_v20  ;;  %v1334_v42 = vadd.f32 %v5427_v46, %v1333_v38  ;;  %v1346_v59 = vpop.f32.mrb[25].mxu0  ;;  %v1844_v8 = vmin.f32 %v1780_v19, 15.0  ;;  %v1525_v9 = vmax.f32 %v1331_v17, 0.0 }
 0x191   :  { %v1842_v63 = vmin.f32 %v1778_v35, 15.0  ;;  %v1355_v60 = vadd.f32 %v3927_v37, %v5427_v46  ;;  %v3928_v28 = vpop.f32.mrb[26].mxu0  ;;  %v1905_v15 = vmul.f32 0.13333334, %v1841_v24  ;;  %v1528_v49 = vmax.f32 %v1342_v41, 0.0 }
 0x192   :  { %v1783_v44 = vmax.f32 %v1719_v43, 0.0  ;;  %v1526_v0 = vmax.f32 %v1334_v42, 0.0  ;;  %v1349_v25 = vpop.f32.mrb[27].mxu0  ;;  %v1908_v40 = vmul.f32 0.13333334, %v1844_v8  ;;  %v1589_v4 = vmul.f32 7.5, %v1525_v9 }
 0x193   :  { %v1906_v7 = vmul.f32 0.13333334, %v1842_v63  ;;  %v1531_v33 = vmax.f32 %v1355_v60, 0.0  ;;  %v5484_v12 = vmax.f32 %v1905_v15, %v1907_v18  ;;  %v1592_v13 = vmul.f32 7.5, %v1528_v49 }
 0x194   :  { %v1847_v62 = vmin.f32 %v1783_v44, 15.0  ;;  %v1590_v3 = vmul.f32 7.5, %v1526_v0  ;;  %v1653_v55 = vadd.f32 0.5, %v1589_v4  ;;  %v4409_v6 = vpack.i.bf16 %v5476_v31, %v5472_v22 }
 0x195   :  { %v5486_v2 = vmax.f32 %v1906_v7, %v1908_v40  ;;  %v1595_v36 = vmul.f32 7.5, %v1531_v33  ;;  %v1656_v32 = vadd.f32 0.5, %v1592_v13  ;;  %v1347_v16 = vadd.f32 %v5427_v46, %v1346_v59 }
 0x196   :  { %v1911_v51 = vmul.f32 0.13333334, %v1847_v62  ;;  %v1654_v52 = vadd.f32 0.5, %v1590_v3  ;;  %v1717_v61 = vfloor.f32 %v1653_v55  ;;  %4410 = vrot.lane.b32.xlu1 %v4409_v6, %s4671_s17  ;;  %v1358_v1 = vadd.f32 %v3928_v28, %v5427_v46  ;;  %4415 = vrot.lane.b32.xlu0 %v4409_v6, %s4672_s29 }
 0x197   :  { %v1659_v26 = vadd.f32 0.5, %v1595_v36  ;;  %v3931_v27 = vpop.f32.mrb[28].mxu0  ;;  %v1720_v38 = vfloor.f32 %v1656_v32  ;;  %v1350_v5 = vadd.f32 %v5427_v46, %v1349_v25  ;;  %v1529_v58 = vmax.f32 %v1347_v16, 0.0 }
 0x198   :  { %v1718_v39 = vfloor.f32 %v1654_v52  ;;  %v1371_v21 = vadd.f32 %v3931_v27, %v5427_v46  ;;  %v1362_v54 = vpop.f32.mrb[29].mxu0  ;;  %v1781_v29 = vmax.f32 %v1717_v61, 0.0  ;;  %v1532_v56 = vmax.f32 %v1358_v1, 0.0 }
 0x199   :  { %v1723_v10 = vfloor.f32 %v1659_v26  ;;  %v3932_v53 = vpop.f32.mrb[30].mxu0  ;;  %v1784_v57 = vmax.f32 %v1720_v38, 0.0  ;;  %v1530_v18 = vmax.f32 %v1350_v5, 0.0  ;;  %v1593_v17 = vmul.f32 7.5, %v1529_v58 }
 0x19a   :  { %v1782_v45 = vmax.f32 %v1718_v39, 0.0  ;;  %v1535_v23 = vmax.f32 %v1371_v21, 0.0  ;;  %v1365_v20 = vpop.f32.mrb[31].mxu0  ;;  %v1845_v19 = vmin.f32 %v1781_v29, 15.0  ;;  %v1596_v37 = vmul.f32 7.5, %v1532_v56 }
 0x19b   :  { %v1787_v35 = vmax.f32 %v1723_v10, 0.0  ;;  %v1848_v24 = vmin.f32 %v1784_v57, 15.0  ;;  %v1594_v41 = vmul.f32 7.5, %v1530_v18  ;;  %v1657_v63 = vadd.f32 0.5, %v1593_v17 }
 0x19c   :  { %v1846_v43 = vmin.f32 %v1782_v45, 15.0  ;;  %v1599_v42 = vmul.f32 7.5, %v1535_v23  ;;  %v1909_v59 = vmul.f32 0.13333334, %v1845_v19  ;;  %v1660_v9 = vadd.f32 0.5, %v1596_v37 }
 0x19d   :  { %v1851_v8 = vmin.f32 %v1787_v35, 15.0  ;;  %v1912_v60 = vmul.f32 0.13333334, %v1848_v24  ;;  %v1658_v15 = vadd.f32 0.5, %v1594_v41  ;;  %v1721_v25 = vfloor.f32 %v1657_v63 }
 0x19e   :  { %v1910_v28 = vmul.f32 0.13333334, %v1846_v43  ;;  %v1663_v44 = vadd.f32 0.5, %v1599_v42  ;;  %v5496_v49 = vmax.f32 %v1909_v59, %v1911_v51  ;;  %v1724_v40 = vfloor.f32 %v1660_v9 }
 0x19f   :  { %v1915_v0 = vmul.f32 0.13333334, %v1851_v8  ;;  %v3935_v7 = vpop.f32.mrb[32].mxu0  ;;  %v1722_v33 = vfloor.f32 %v1658_v15  ;;  %v4419_v13 = vpack.i.bf16 %v5486_v2, %v5484_v12  ;;  %v1785_v55 = vmax.f32 %v1721_v25, 0.0 }
 0x1a0   :  { %v5498_v4 = vmax.f32 %v1910_v28, %v1912_v60  ;;  %v1727_v62 = vfloor.f32 %v1663_v44  ;;  %v1378_v3 = vpop.f32.mrb[33].mxu0  ;;  %v1788_v36 = vmax.f32 %v1724_v40, 0.0  ;;  %v1363_v6 = vadd.f32 %v5427_v46, %v1362_v54 }
 0x1a1   :  { %v3936_v32 = vpop.f32.mrb[34].mxu0  ;;  %v1786_v52 = vmax.f32 %v1722_v33, 0.0  ;;  %4420 = vrot.lane.b32.xlu1 %v4419_v13, %s4672_s29  ;;  %v1374_v61 = vadd.f32 %v3932_v53, %v5427_v46  ;;  %v1366_v26 = vadd.f32 %v5427_v46, %v1365_v20  ;;  %v1849_v1 = vmin.f32 %v1785_v55, 15.0  ;;  %4425 = vrot.lane.b32.xlu0 %v4419_v13, %s4671_s17 }
 0x1a2   :  { %v1791_v51 = vmax.f32 %v1727_v62, 0.0  ;;  %v1381_v16 = vpop.f32.mrb[35].mxu0  ;;  %v1852_v27 = vmin.f32 %v1788_v36, 15.0  ;;  %v1533_v38 = vmax.f32 %v1363_v6, 0.0  ;;  %v1387_v39 = vadd.f32 %v3935_v7, %v5427_v46 }
 0x1a3   :  { %v1850_v5 = vmin.f32 %v1786_v52, 15.0  ;;  %v1536_v54 = vmax.f32 %v1374_v61, 0.0  ;;  %v1534_v29 = vmax.f32 %v1366_v26, 0.0  ;;  %v1913_v10 = vmul.f32 0.13333334, %v1849_v1 }
 0x1a4   :  { %v1855_v21 = vmin.f32 %v1791_v51, 15.0  ;;  %v1916_v58 = vmul.f32 0.13333334, %v1852_v27  ;;  %v1597_v56 = vmul.f32 7.5, %v1533_v38  ;;  %v1539_v57 = vmax.f32 %v1387_v39, 0.0 }
 0x1a5   :  { %v1914_v45 = vmul.f32 0.13333334, %v1850_v5  ;;  %v1600_v18 = vmul.f32 7.5, %v1536_v54  ;;  %v1598_v23 = vmul.f32 7.5, %v1534_v29  ;;  %v5508_v20 = vmax.f32 %v1913_v10, %v1915_v0 }
 0x1a6   :  { %v1919_v53 = vmul.f32 0.13333334, %v1855_v21  ;;  %v1661_v19 = vadd.f32 0.5, %v1597_v56  ;;  %v1603_v35 = vmul.f32 7.5, %v1539_v57  ;;  %v4429_v17 = vpack.i.bf16 %v5498_v4, %v5496_v49 }
 0x1a7   :  { %v3939_v37 = vpop.f32.mrb[36].mxu0  ;;  %v5512_v24 = vmax.f32 %v1914_v45, %v1916_v58  ;;  %v1664_v43 = vadd.f32 0.5, %v1600_v18  ;;  %v1662_v41 = vadd.f32 0.5, %v1598_v23  ;;  %v1379_v63 = vadd.f32 %v5427_v46, %v1378_v3 }
 0x1a8   :  { %v1394_v42 = vpop.f32.mrb[37].mxu0  ;;  %v1725_v59 = vfloor.f32 %v1661_v19  ;;  %v1667_v8 = vadd.f32 0.5, %v1603_v35  ;;  %4430 = vrot.lane.b32.xlu1 %v4429_v17, %s4671_s17  ;;  %v1390_v9 = vadd.f32 %v3936_v32, %v5427_v46  ;;  %4435 = vrot.lane.b32.xlu0 %v4429_v17, %s4672_s29  ;;  %v1382_v44 = vadd.f32 %v5427_v46, %v1381_v16 }
 0x1a9   :  { %v3940_v60 = vpop.f32.mrb[38].mxu0  ;;  %v1728_v28 = vfloor.f32 %v1664_v43  ;;  %v1726_v15 = vfloor.f32 %v1662_v41  ;;  %v1403_v0 = vadd.f32 %v3939_v37, %v5427_v46  ;;  %v1537_v33 = vmax.f32 %v1379_v63, 0.0 }
 0x1aa   :  { %v1397_v25 = vpop.f32.mrb[39].mxu0  ;;  %v1789_v40 = vmax.f32 %v1725_v59, 0.0  ;;  %v1731_v7 = vfloor.f32 %v1667_v8  ;;  %v1540_v62 = vmax.f32 %v1390_v9, 0.0  ;;  %v1538_v36 = vmax.f32 %v1382_v44, 0.0 }
 0x1ab   :  { %v1792_v13 = vmax.f32 %v1728_v28, 0.0  ;;  %v1790_v55 = vmax.f32 %v1726_v15, 0.0  ;;  %v1543_v3 = vmax.f32 %v1403_v0, 0.0  ;;  %v1601_v52 = vmul.f32 7.5, %v1537_v33 }
 0x1ac   :  { %v1853_v6 = vmin.f32 %v1789_v40, 15.0  ;;  %v1795_v32 = vmax.f32 %v1731_v7, 0.0  ;;  %v1604_v51 = vmul.f32 7.5, %v1540_v62  ;;  %v1602_v1 = vmul.f32 7.5, %v1538_v36 }
 0x1ad   :  { %v1856_v61 = vmin.f32 %v1792_v13, 15.0  ;;  %v1854_v26 = vmin.f32 %v1790_v55, 15.0  ;;  %v1607_v27 = vmul.f32 7.5, %v1543_v3  ;;  %v1665_v39 = vadd.f32 0.5, %v1601_v52 }
 0x1ae   :  { %v1917_v16 = vmul.f32 0.13333334, %v1853_v6  ;;  %v1859_v38 = vmin.f32 %v1795_v32, 15.0  ;;  %v1668_v5 = vadd.f32 0.5, %v1604_v51  ;;  %v1666_v10 = vadd.f32 0.5, %v1602_v1 }
 0x1af   :  { %v3943_v21 = vpop.f32.mrb[40].mxu0  ;;  %v1920_v54 = vmul.f32 0.13333334, %v1856_v61  ;;  %v1918_v29 = vmul.f32 0.13333334, %v1854_v26  ;;  %v1671_v58 = vadd.f32 0.5, %v1607_v27  ;;  %v1729_v45 = vfloor.f32 %v1665_v39 }
 0x1b0   :  { %v5520_v56 = vmax.f32 %v1917_v16, %v1919_v53  ;;  %v1923_v57 = vmul.f32 0.13333334, %v1859_v38  ;;  %v1732_v18 = vfloor.f32 %v1668_v5  ;;  %v1410_v23 = vpop.f32.mrb[41].mxu0  ;;  %v1730_v35 = vfloor.f32 %v1666_v10 }
 0x1b1   :  { %v5522_v19 = vmax.f32 %v1918_v29, %v1920_v54  ;;  %v1735_v17 = vfloor.f32 %v1671_v58  ;;  %v4439_v37 = vpack.i.bf16 %v5512_v24, %v5508_v20  ;;  %v3944_v43 = vpop.f32.mrb[42].mxu0  ;;  %v1793_v41 = vmax.f32 %v1729_v45, 0.0 }
 0x1b2   :  { %v1796_v59 = vmax.f32 %v1732_v18, 0.0  ;;  %v1395_v8 = vadd.f32 %v5427_v46, %v1394_v42  ;;  %v1413_v63 = vpop.f32.mrb[43].mxu0  ;;  %v1794_v9 = vmax.f32 %v1730_v35, 0.0  ;;  %v1406_v28 = vadd.f32 %v3940_v60, %v5427_v46 }
 0x1b3   :  { %v1799_v53 = vmax.f32 %v1735_v17, 0.0  ;;  %4440 = vrot.lane.b32.xlu1 %v4439_v37, %s4672_s29  ;;  %v1398_v15 = vadd.f32 %v5427_v46, %v1397_v25  ;;  %v1857_v44 = vmin.f32 %v1793_v41, 15.0  ;;  %4445 = vrot.lane.b32.xlu0 %v4439_v37, %s4671_s17  ;;  %v1419_v7 = vadd.f32 %v3943_v21, %v5427_v46 }
 0x1b4   :  { %v1860_v0 = vmin.f32 %v1796_v59, 15.0  ;;  %v1541_v40 = vmax.f32 %v1395_v8, 0.0  ;;  %v1858_v33 = vmin.f32 %v1794_v9, 15.0  ;;  %v1544_v13 = vmax.f32 %v1406_v28, 0.0 }
 0x1b5   :  { %v1863_v62 = vmin.f32 %v1799_v53, 15.0  ;;  %v1542_v42 = vmax.f32 %v1398_v15, 0.0  ;;  %v1921_v55 = vmul.f32 0.13333334, %v1857_v44  ;;  %v1547_v6 = vmax.f32 %v1419_v7, 0.0 }
 0x1b6   :  { %v1924_v36 = vmul.f32 0.13333334, %v1860_v0  ;;  %v1605_v3 = vmul.f32 7.5, %v1541_v40  ;;  %v1922_v32 = vmul.f32 0.13333334, %v1858_v33  ;;  %v1608_v60 = vmul.f32 7.5, %v1544_v13 }
 0x1b7   :  { %v1927_v52 = vmul.f32 0.13333334, %v1863_v62  ;;  %v1606_v51 = vmul.f32 7.5, %v1542_v42  ;;  %v5532_v25 = vmax.f32 %v1921_v55, %v1923_v57  ;;  %v1611_v26 = vmul.f32 7.5, %v1547_v6  ;;  %v3947_v27 = vpop.f32.mrb[44].mxu0 }
 0x1b8   :  { %v1669_v61 = vadd.f32 0.5, %v1605_v3  ;;  %v4449_v1 = vpack.i.bf16 %v5522_v19, %v5520_v56  ;;  %v5536_v16 = vmax.f32 %v1922_v32, %v1924_v36  ;;  %v1672_v38 = vadd.f32 0.5, %v1608_v60  ;;  %v1426_v5 = vpop.f32.mrb[45].mxu0 }
 0x1b9   :  { %v1670_v39 = vadd.f32 0.5, %v1606_v51  ;;  %v1675_v54 = vadd.f32 0.5, %v1611_v26  ;;  %v1411_v29 = vadd.f32 %v5427_v46, %v1410_v23  ;;  %v1422_v10 = vadd.f32 %v3944_v43, %v5427_v46  ;;  %v3948_v58 = vpop.f32.mrb[46].mxu0 }
 0x1ba   :  { %v1733_v21 = vfloor.f32 %v1669_v61  ;;  %4450 = vrot.lane.b32.xlu1 %v4449_v1, %s4671_s17  ;;  %v1736_v57 = vfloor.f32 %v1672_v38  ;;  %4455 = vrot.lane.b32.xlu0 %v4449_v1, %s4672_s29  ;;  %v1414_v18 = vadd.f32 %v5427_v46, %v1413_v63  ;;  %v1435_v35 = vadd.f32 %v3947_v27, %v5427_v46  ;;  %v1429_v17 = vpop.f32.mrb[47].mxu0 }
 0x1bb   :  { %v1734_v45 = vfloor.f32 %v1670_v39  ;;  %v1739_v41 = vfloor.f32 %v1675_v54  ;;  %v1545_v59 = vmax.f32 %v1411_v29, 0.0  ;;  %v1548_v8 = vmax.f32 %v1422_v10, 0.0 }
 0x1bc   :  { %v1797_v37 = vmax.f32 %v1733_v21, 0.0  ;;  %v1800_v9 = vmax.f32 %v1736_v57, 0.0  ;;  %v1546_v28 = vmax.f32 %v1414_v18, 0.0  ;;  %v1551_v23 = vmax.f32 %v1435_v35, 0.0 }
 0x1bd   :  { %v1798_v53 = vmax.f32 %v1734_v45, 0.0  ;;  %v1803_v43 = vmax.f32 %v1739_v41, 0.0  ;;  %v1609_v44 = vmul.f32 7.5, %v1545_v59  ;;  %v1612_v0 = vmul.f32 7.5, %v1548_v8 }
 0x1be   :  { %v1861_v15 = vmin.f32 %v1797_v37, 15.0  ;;  %v1864_v7 = vmin.f32 %v1800_v9, 15.0  ;;  %v1610_v62 = vmul.f32 7.5, %v1546_v28  ;;  %v1615_v63 = vmul.f32 7.5, %v1551_v23 }
 0x1bf   :  { %v3951_v40 = vpop.f32.mrb[48].mxu0  ;;  %v1862_v33 = vmin.f32 %v1798_v53, 15.0  ;;  %v1867_v55 = vmin.f32 %v1803_v43, 15.0  ;;  %v1673_v36 = vadd.f32 0.5, %v1609_v44  ;;  %v1676_v3 = vadd.f32 0.5, %v1612_v0 }
 0x1c0   :  { %v1442_v13 = vpop.f32.mrb[49].mxu0  ;;  %v1925_v42 = vmul.f32 0.13333334, %v1861_v15  ;;  %v1928_v32 = vmul.f32 0.13333334, %v1864_v7  ;;  %v1674_v51 = vadd.f32 0.5, %v1610_v62  ;;  %v4459_v10 = vpack.i.bf16 %v5536_v16, %v5532_v25 }
 0x1c1   :  { %v3952_v6 = vpop.f32.mrb[50].mxu0  ;;  %v1926_v60 = vmul.f32 0.13333334, %v1862_v33  ;;  %v1679_v61 = vadd.f32 0.5, %v1615_v63  ;;  %v1931_v1 = vmul.f32 0.13333334, %v1867_v55  ;;  %v1737_v27 = vfloor.f32 %v1673_v36 }
 0x1c2   :  { %v5544_v26 = vmax.f32 %v1925_v42, %v1927_v52  ;;  %v1740_v38 = vfloor.f32 %v1676_v3  ;;  %v1445_v39 = vpop.f32.mrb[51].mxu0  ;;  %v1738_v54 = vfloor.f32 %v1674_v51  ;;  %v1427_v18 = vadd.f32 %v5427_v46, %v1426_v5  ;;  %4460 = vrot.lane.b32.xlu1 %v4459_v10, %s4672_s29  ;;  %4465 = vrot.lane.b32.xlu0 %v4459_v10, %s4671_s17 }
 0x1c3   :  { %v5546_v21 = vmax.f32 %v1926_v60, %v1928_v32  ;;  %v1743_v29 = vfloor.f32 %v1679_v61  ;;  %v1801_v57 = vmax.f32 %v1737_v27, 0.0  ;;  %v1438_v52 = vadd.f32 %v3948_v58, %v5427_v46 }
 0x1c4   :  { %v1804_v45 = vmax.f32 %v1740_v38, 0.0  ;;  %v1802_v35 = vmax.f32 %v1738_v54, 0.0  ;;  %v1430_v41 = vadd.f32 %v5427_v46, %v1429_v17  ;;  %v1549_v9 = vmax.f32 %v1427_v18, 0.0 }
 0x1c5   :  { %v1807_v37 = vmax.f32 %v1743_v29, 0.0  ;;  %v1865_v59 = vmin.f32 %v1801_v57, 15.0  ;;  %v1451_v53 = vadd.f32 %v3951_v40, %v5427_v46  ;;  %v1552_v43 = vmax.f32 %v1438_v52, 0.0 }
 0x1c6   :  { %v1868_v8 = vmin.f32 %v1804_v45, 15.0  ;;  %v1866_v23 = vmin.f32 %v1802_v35, 15.0  ;;  %v1550_v5 = vmax.f32 %v1430_v41, 0.0  ;;  %v1613_v33 = vmul.f32 7.5, %v1549_v9 }
 0x1c7   :  { %v3955_v28 = vpop.f32.mrb[52].mxu0  ;;  %v1871_v15 = vmin.f32 %v1807_v37, 15.0  ;;  %v1929_v0 = vmul.f32 0.13333334, %v1865_v59  ;;  %v1555_v58 = vmax.f32 %v1451_v53, 0.0  ;;  %v1616_v63 = vmul.f32 7.5, %v1552_v43 }
 0x1c8   :  { %v5556_v44 = vpop.f32.mrb[53].mxu0  ;;  %v1932_v7 = vmul.f32 0.13333334, %v1868_v8  ;;  %v1930_v62 = vmul.f32 0.13333334, %v1866_v23  ;;  %v1614_v42 = vmul.f32 7.5, %v1550_v5  ;;  %v4469_v40 = vpack.i.bf16 %v5546_v21, %v5544_v26 }
 0x1c9   :  { %v1935_v17 = vmul.f32 0.13333334, %v1871_v15  ;;  %v5558_v55 = vmax.f32 %v1929_v0, %v1931_v1  ;;  %v1677_v36 = vadd.f32 0.5, %v1613_v33  ;;  %v1619_v3 = vmul.f32 7.5, %v1555_v58  ;;  %v3956_v32 = vpop.f32.mrb[54].mxu0 }
 0x1ca   :  { %v5562_v60 = vmax.f32 %v1930_v62, %v1932_v7  ;;  %v1680_v51 = vadd.f32 0.5, %v1616_v63  ;;  %v1678_v61 = vadd.f32 0.5, %v1614_v42  ;;  %v1461_v27 = vpop.f32.mrb[55].mxu0  ;;  %4470 = vrot.lane.b32.xlu1 %v4469_v40, %s4671_s17  ;;  %v1443_v29 = vadd.f32 %v5427_v46, %v1442_v13  ;;  %4475 = vrot.lane.b32.xlu0 %v4469_v40, %s4672_s29 }
 0x1cb   :  { %v1741_v38 = vfloor.f32 %v1677_v36  ;;  %v1683_v54 = vadd.f32 0.5, %v1619_v3  ;;  %v1454_v1 = vadd.f32 %v3952_v6, %v5427_v46  ;;  %v1446_v45 = vadd.f32 %v5427_v46, %v1445_v39 }
 0x1cc   :  { %v1744_v10 = vfloor.f32 %v1680_v51  ;;  %v1742_v57 = vfloor.f32 %v1678_v61  ;;  %v1467_v18 = vadd.f32 %v3955_v28, %v5427_v46  ;;  %v1553_v52 = vmax.f32 %v1443_v29, 0.0 }
 0x1cd   :  { %v1805_v35 = vmax.f32 %v1741_v38, 0.0  ;;  %v1747_v37 = vfloor.f32 %v1683_v54  ;;  %v1556_v41 = vmax.f32 %v1454_v1, 0.0  ;;  %v1554_v53 = vmax.f32 %v1446_v45, 0.0 }
 0x1ce   :  { %v1808_v8 = vmax.f32 %v1744_v10, 0.0  ;;  %v1806_v9 = vmax.f32 %v1742_v57, 0.0  ;;  %v1559_v23 = vmax.f32 %v1467_v18, 0.0  ;;  %v1617_v43 = vmul.f32 7.5, %v1553_v52 }
 0x1cf   :  { %v3959_v59 = vpop.f32.mrb[56].mxu0  ;;  %v1869_v6 = vmin.f32 %v1805_v35, 15.0  ;;  %v1811_v15 = vmax.f32 %v1747_v37, 0.0  ;;  %v1620_v5 = vmul.f32 7.5, %v1556_v41  ;;  %v1618_v46 = vmul.f32 7.5, %v1554_v53 }
 0x1d0   :  { %v5570_v13 = vpop.f32.mrb[57].mxu0  ;;  %v1872_v39 = vmin.f32 %v1808_v8, 15.0  ;;  %v1870_v7 = vmin.f32 %v1806_v9, 15.0  ;;  %v1623_v28 = vmul.f32 7.5, %v1559_v23  ;;  %v1681_v63 = vadd.f32 0.5, %v1617_v43 }
 0x1d1   :  { %v5572_v0 = vpop.f32.mrb[58].mxu0  ;;  %v1933_v58 = vmul.f32 0.13333334, %v1869_v6  ;;  %v1875_v62 = vmin.f32 %v1811_v15, 15.0  ;;  %v1684_v42 = vadd.f32 0.5, %v1620_v5  ;;  %v1682_v40 = vadd.f32 0.5, %v1618_v46 }
 0x1d2   :  { %v1477_v33 = vpop.f32.mrb[59].mxu0  ;;  %v1936_v36 = vmul.f32 0.13333334, %v1872_v39  ;;  %v1934_v3 = vmul.f32 0.13333334, %v1870_v7  ;;  %v1687_v51 = vadd.f32 0.5, %v1623_v28  ;;  %v1745_v54 = vfloor.f32 %v1681_v63 }
 0x1d3   :  { %v5574_v61 = vmax.f32 %v1933_v58, %v1935_v17  ;;  %v1939_v38 = vmul.f32 0.13333334, %v1875_v62  ;;  %v1748_v29 = vfloor.f32 %v1684_v42  ;;  %v1746_v10 = vfloor.f32 %v1682_v40  ;;  %v5583_v37 = vld [vmem:[%s6059_s2] ss:$0 sm:$0xff] }
 0x1d4   :  { %v5576_v1 = vmax.f32 %v1934_v3, %v1936_v36  ;;  %v1751_v57 = vfloor.f32 %v1687_v51  ;;  %v4479_v45 = vpack.i.bf16 %v5562_v60, %v5558_v55  ;;  %v1809_v18 = vmax.f32 %v1745_v54, 0.0 }
 0x1d5   :  { %v1812_v35 = vmax.f32 %v1748_v29, 0.0  ;;  %v1459_v17 = vadd.f32 %v5583_v37, %v5556_v44  ;;  %v1810_v41 = vmax.f32 %v1746_v10, 0.0  ;;  %v1470_v9 = vadd.f32 %v5583_v37, %v3956_v32 }
 0x1d6   :  { %v1815_v8 = vmax.f32 %v1751_v57, 0.0  ;;  %4480 = vrot.lane.b32.xlu1 %v4479_v45, %s4672_s29  ;;  %v1462_v53 = vadd.f32 %v5583_v37, %v1461_v27  ;;  %v1873_v6 = vmin.f32 %v1809_v18, 15.0  ;;  %4485 = vrot.lane.b32.xlu0 %v4479_v45, %s4671_s17  ;;  %v1483_v5 = vadd.f32 %v5583_v37, %v3959_v59 }
 0x1d7   :  { %v3963_v52 = vpop.f32.mrb[60].mxu0  ;;  %v1876_v15 = vmin.f32 %v1812_v35, 15.0  ;;  %v1557_v43 = vmax.f32 %v1459_v17, 0.0  ;;  %v1874_v44 = vmin.f32 %v1810_v41, 15.0  ;;  %v1560_v46 = vmax.f32 %v1470_v9, 0.0 }
 0x1d8   :  { %v5590_v23 = vpop.f32.mrb[61].mxu0  ;;  %v1879_v7 = vmin.f32 %v1815_v8, 15.0  ;;  %v1558_v28 = vmax.f32 %v1462_v53, 0.0  ;;  %v1937_v32 = vmul.f32 0.13333334, %v1873_v6  ;;  %v1563_v63 = vmax.f32 %v1483_v5, 0.0 }
 0x1d9   :  { %v5594_v39 = vpop.f32.mrb[62].mxu0  ;;  %v1940_v62 = vmul.f32 0.13333334, %v1876_v15  ;;  %v1621_v27 = vmul.f32 7.5, %v1557_v43  ;;  %v1938_v42 = vmul.f32 0.13333334, %v1874_v44  ;;  %v4489_v29 = vpack.i.bf16 %v5576_v1, %v5574_v61 }
 0x1da   :  { %v5596_v58 = vpop.f32.mrb[63].mxu0  ;;  %v1943_v36 = vmul.f32 0.13333334, %v1879_v7  ;;  %v1624_v3 = vmul.f32 7.5, %v1560_v46  ;;  %v1622_v40 = vmul.f32 7.5, %v1558_v28  ;;  %v5598_v51 = vmax.f32 %v1937_v32, %v1939_v38 }
 0x1db   :  { %v1685_v54 = vadd.f32 0.5, %v1621_v27  ;;  %v1627_v59 = vmul.f32 7.5, %v1563_v63  ;;  %v5602_v10 = vmax.f32 %v1938_v42, %v1940_v62  ;;  %4490 = vrot.lane.b32.xlu1 %v4489_v29, %s4671_s17  ;;  %v1475_v17 = vadd.f32 %v5583_v37, %v5570_v13  ;;  %4495 = vrot.lane.b32.xlu0 %v4489_v29, %s4672_s29 }
 0x1dc   :  { %v1688_v57 = vadd.f32 0.5, %v1624_v3  ;;  %v1686_v45 = vadd.f32 0.5, %v1622_v40  ;;  %v1486_v38 = vadd.f32 %v5583_v37, %v5572_v0  ;;  %v1478_v9 = vadd.f32 %v5583_v37, %v1477_v33 }
 0x1dd   :  { %v1749_v18 = vfloor.f32 %v1685_v54  ;;  %v1691_v35 = vadd.f32 0.5, %v1627_v59  ;;  %v1499_v53 = vadd.f32 %v5583_v37, %v3963_v52  ;;  %v1561_v43 = vmax.f32 %v1475_v17, 0.0 }
 0x1de   :  { %v1752_v41 = vfloor.f32 %v1688_v57  ;;  %v1750_v8 = vfloor.f32 %v1686_v45  ;;  %v1564_v5 = vmax.f32 %v1486_v38, 0.0  ;;  %v1562_v46 = vmax.f32 %v1478_v9, 0.0 }
 0x1df   :  { %v1813_v6 = vmax.f32 %v1749_v18, 0.0  ;;  %v1755_v15 = vfloor.f32 %v1691_v35  ;;  %v1567_v28 = vmax.f32 %v1499_v53, 0.0  ;;  %v1625_v62 = vmul.f32 7.5, %v1561_v43 }
 0x1e0   :  { %v1816_v44 = vmax.f32 %v1752_v41, 0.0  ;;  %v1814_v7 = vmax.f32 %v1750_v8, 0.0  ;;  %v1628_v0 = vmul.f32 7.5, %v1564_v5  ;;  %v1626_v42 = vmul.f32 7.5, %v1562_v46 }
 0x1e1   :  { %v1877_v13 = vmin.f32 %v1813_v6, 15.0  ;;  %v1819_v32 = vmax.f32 %v1755_v15, 0.0  ;;  %v1631_v3 = vmul.f32 7.5, %v1567_v28  ;;  %v1689_v54 = vadd.f32 0.5, %v1625_v62 }
 0x1e2   :  { %v1880_v27 = vmin.f32 %v1816_v44, 15.0  ;;  %v1878_v63 = vmin.f32 %v1814_v7, 15.0  ;;  %v1692_v52 = vadd.f32 0.5, %v1628_v0  ;;  %v1690_v57 = vadd.f32 0.5, %v1626_v42 }
 0x1e3   :  { %v1941_v40 = vmul.f32 0.13333334, %v1877_v13  ;;  %v1883_v33 = vmin.f32 %v1819_v32, 15.0  ;;  %v1695_v45 = vadd.f32 0.5, %v1631_v3  ;;  %v1753_v35 = vfloor.f32 %v1689_v54 }
 0x1e4   :  { %v1944_v59 = vmul.f32 0.13333334, %v1880_v27  ;;  %v1942_v29 = vmul.f32 0.13333334, %v1878_v63  ;;  %v1756_v17 = vfloor.f32 %v1692_v52  ;;  %v1754_v41 = vfloor.f32 %v1690_v57 }
 0x1e5   :  { %v5612_v18 = vmax.f32 %v1941_v40, %v1943_v36  ;;  %v1759_v8 = vfloor.f32 %v1695_v45  ;;  %v4499_v9 = vpack.i.bf16 %v5602_v10, %v5598_v51  ;;  %v1817_v53 = vmax.f32 %v1753_v35, 0.0 }
 0x1e6   :  { %v5614_v38 = vmax.f32 %v1942_v29, %v1944_v59  ;;  %v1820_v6 = vmax.f32 %v1756_v17, 0.0  ;;  %v1491_v15 = vadd.f32 %v5583_v37, %v5590_v23  ;;  %v1947_v43 = vmul.f32 0.13333334, %v1883_v33 }
 0x1e7   :  { %v1818_v5 = vmax.f32 %v1754_v41, 0.0  ;;  %4500 = vrot.lane.b32.xlu1 %v4499_v9, %s4672_s29  ;;  %v1502_v36 = vadd.f32 %v5583_v37, %v5594_v39  ;;  %v1494_v44 = vadd.f32 %v5583_v37, %v5596_v58  ;;  %v1881_v7 = vmin.f32 %v1817_v53, 15.0  ;;  %4505 = vrot.lane.b32.xlu0 %v4499_v9, %s4671_s17  ;;  %v4655_v37 = vld [vmem:[%s6060_s3 + $0x8] ss:$0 sps:$4 sm:$0xff]  }
 0x1e8   :  { %v1884_v46 = vmin.f32 %v1820_v6, 15.0  ;;  %v1565_v28 = vmax.f32 %v1491_v15, 0.0  ;;  %v4509_v13 = vpack.i.bf16 %v5614_v38, %v5612_v18  ;;  %v1823_v23 = vmax.f32 %v1759_v8, 0.0  ;;  %4060 = vmatprep.subr.msk.bf16.mxu1 %vm2356_vm4, %v4655_v37 }
 0x1e9   :  { %v1882_v32 = vmin.f32 %v1818_v5, 15.0  ;;  %v1568_v62 = vmax.f32 %v1502_v36, 0.0  ;;  %v1566_v0 = vmax.f32 %v1494_v44, 0.0  ;;  %v1945_v27 = vmul.f32 0.13333334, %v1881_v7 }
 0x1ea   :  { %v1948_v63 = vmul.f32 0.13333334, %v1884_v46  ;;  %v1629_v42 = vmul.f32 7.5, %v1565_v28  ;;  %v1887_v29 = vmin.f32 %v1823_v23, 15.0  ;;  %v2358_v9 = vsel %vm2356_vm4, %v4655_v37, 0 }
 0x1eb   :  { %v1946_v3 = vmul.f32 0.13333334, %v1882_v32  ;;  %v1632_v39 = vmul.f32 7.5, %v1568_v62  ;;  %v1630_v40 = vmul.f32 7.5, %v1566_v0  ;;  %4510 = vrot.lane.b32.xlu1 %v4509_v13, %s4671_s17  ;;  %v5632_v58 = vmax.f32 %v1945_v27, %v1947_v43  ;;  %4515 = vrot.lane.b32.xlu0 %v4509_v13, %s4672_s29 }
 0x1ec   :  { %v1693_v33 = vadd.f32 0.5, %v1629_v42  ;;  %v1951_v15 = vmul.f32 0.13333334, %v1887_v29  ;;  %3968 = vmatpush3.bf16.msra.mxu1 %v2358_v9 }
 0x1ed   :  { %v5635_v54 = vmax.f32 %v1946_v3, %v1948_v63  ;;  %v1696_v52 = vadd.f32 0.5, %v1632_v39  ;;  %v1694_v59 = vadd.f32 0.5, %v1630_v40 }
 0x1ee   :  { %v1757_v57 = vfloor.f32 %v1693_v33 }
 0x1ef   :  { %v1760_v45 = vfloor.f32 %v1696_v52  ;;  %v1758_v35 = vfloor.f32 %v1694_v59  ;;  %v4519_v17 = vpack.i.bf16 %v5635_v54, %v5632_v58 }
 0x1f0   :  { %v1821_v8 = vmax.f32 %v1757_v57, 0.0 }
 0x1f1   :  { %v4386_v41 = vpop.permute.xlu0 %4385  ;;  %v1824_v53 = vmax.f32 %v1760_v45, 0.0  ;;  %v1822_v6 = vmax.f32 %v1758_v35, 0.0  ;;  %4520 = vrot.lane.b32.xlu1 %v4519_v17, %s4672_s29  ;;  %4525 = vrot.lane.b32.xlu0 %v4519_v17, %s4671_s17 }
 0x1f2   :  { %v1885_v43 = vmin.f32 %v1821_v8, 15.0  ;;  %v4388_v5 = vunpack.i.h.bf16 %v4386_v41  ;;  %v4387_v36 = vunpack.i.l.bf16 %v4386_v41 }
 0x1f3   :  { %v1888_v44 = vmin.f32 %v1824_v53, 15.0  ;;  %v1886_v7 = vmin.f32 %v1822_v6, 15.0 }
 0x1f4   :  { %v1949_v46 = vmul.f32 0.13333334, %v1885_v43  ;;  %v2208_v0 = vsel %vm2206_vm5, 0.0, %v4388_v5  ;;  %v2207_v27 = vsel %vm2206_vm5, 0.0, %v4387_v36 }
 0x1f5   :  { %v1952_v13 = vmul.f32 0.13333334, %v1888_v44  ;;  %v1950_v32 = vmul.f32 0.13333334, %v1886_v7 }
 0x1f6   :  { %v4396_v28 = vpop.permute.xlu0 %4395  ;;  %v1983_v63 = vmax.f32 %v1949_v46, %v1951_v15  ;;  %v4391_v33 = vpop.permute.xlu1 %4390 }
 0x1f7   :  { %v4398_v23 = vunpack.i.h.bf16 %v4396_v28  ;;  %v4397_v62 = vunpack.i.l.bf16 %v4396_v28  ;;  %v1984_v42 = vmax.f32 %v1950_v32, %v1952_v13  ;;  %v4393_v52 = vunpack.i.h.bf16 %v4391_v33 }
 0x1f8   :  { %v4392_v59 = vunpack.i.l.bf16 %v4391_v33 }
 0x1f9   :  { %v2240_v3 = vsel %vm2239_vm6, %v2207_v27, %v4397_v62  ;;  %v2241_v39 = vsel %vm2239_vm6, %v2208_v0, %v4398_v23  ;;  %v4529_v37 = vpack.i.bf16 %v1984_v42, %v1983_v63  ;;  %v2210_v17 = vsel %vm2206_vm5, %v5448_v48, %v4393_v52 }
 0x1fa   :  { %v2272_v40 = vpack.c.bf16 %v2241_v39, %v2240_v3  ;;  %v2209_v35 = vsel %vm2206_vm5, %v5444_v14, %v4392_v59 }
 0x1fb   :  { %4530 = vrot.lane.b32.xlu1 %v4529_v37, %s4671_s17  ;;  %4535 = vrot.lane.b32.xlu0 %v4529_v37, %s4672_s29 }
 0x1fc   :  { %3969 = vmatprep.mubr.msk.bf16.mxu1 %vm2307_vm7, %v2272_v40 }
 0x1ff   :  { %2173 = vrot.lane.b32.xlu1 %v6111_v50, %s4672_s29 }
 0x201   :  { %v4401_v29 = vpop.permute.xlu1 %4400  ;;  %v4406_v53 = vpop.permute.xlu0 %4405 }
 0x202   :  { %v4403_v57 = vunpack.i.h.bf16 %v4401_v29  ;;  %v4402_v45 = vunpack.i.l.bf16 %v4401_v29  ;;  %v4408_v6 = vunpack.i.h.bf16 %v4406_v53  ;;  %v4407_v15 = vunpack.i.l.bf16 %v4406_v53 }
 0x204   :  { %v2242_v41 = vsel %vm2239_vm6, %v2209_v35, %v4402_v45  ;;  %v2243_v8 = vsel %vm2239_vm6, %v2210_v17, %v4403_v57  ;;  %v2212_v44 = vsel %vm2206_vm5, %v5446_v11, %v4408_v6  ;;  %v2211_v14 = vsel %vm2206_vm5, %v5442_v34, %v4407_v15 }
 0x205   :  { %v2273_v9 = vpack.c.bf16 %v2243_v8, %v2242_v41 }
 0x207   :  { %3970 = vmatmul.mubr.msk.bf16.vlgmr.msra.gmra.mrb[0].mxu1 %vm2307_vm7, %v2273_v9 }
 0x208   :  { %v4416_v43 = vpop.permute.xlu0 %4415  ;;  %v4411_v28 = vpop.permute.xlu1 %4410 }
 0x209   :  { %v4418_v5 = vunpack.i.h.bf16 %v4416_v43  ;;  %v4417_v36 = vunpack.i.l.bf16 %v4416_v43  ;;  %v4413_v13 = vunpack.i.h.bf16 %v4411_v28  ;;  %v4412_v32 = vunpack.i.l.bf16 %v4411_v28 }
 0x20b   :  { %v2244_v48 = vsel %vm2239_vm6, %v2211_v14, %v4417_v36  ;;  %v2245_v7 = vsel %vm2239_vm6, %v2212_v44, %v4418_v5  ;;  %v2214_v27 = vsel %vm2206_vm5, %v5461_v30, %v4413_v13  ;;  %v2213_v11 = vsel %vm2206_vm5, %v5457_v47, %v4412_v32 }
 0x20c   :  { %v2274_v46 = vpack.c.bf16 %v2245_v7, %v2244_v48 }
 0x20e   :  { %3973 = vmatprep.mubr.msk.bf16.mxu1 %vm2307_vm7, %v2274_v46 }
 0x213   :  { %v4421_v23 = vpop.permute.xlu1 %4420  ;;  %v4426_v42 = vpop.permute.xlu0 %4425 }
 0x214   :  { %v4423_v62 = vunpack.i.h.bf16 %v4421_v23  ;;  %v4422_v0 = vunpack.i.l.bf16 %v4421_v23  ;;  %v4428_v39 = vunpack.i.h.bf16 %v4426_v42  ;;  %v4427_v40 = vunpack.i.l.bf16 %v4426_v42 }
 0x216   :  { %v2246_v34 = vsel %vm2239_vm6, %v2213_v11, %v4422_v0  ;;  %v2247_v63 = vsel %vm2239_vm6, %v2214_v27, %v4423_v62  ;;  %v2216_v59 = vsel %vm2206_vm5, %v5476_v31, %v4428_v39  ;;  %v2215_v30 = vsel %vm2206_vm5, %v5472_v22, %v4427_v40 }
 0x217   :  { %v2275_v3 = vpack.c.bf16 %v2247_v63, %v2246_v34 }
 0x219   :  { %3974 = vmatmul.mubr.msk.bf16.gmra.mrb[4].mxu1 %vm2307_vm7, %v2275_v3 }
 0x21a   :  { %v4436_v37 = vpop.permute.xlu0 %4435  ;;  %v4431_v45 = vpop.permute.xlu1 %4430 }
 0x21b   :  { %v4438_v33 = vunpack.i.h.bf16 %v4436_v37  ;;  %v4437_v52 = vunpack.i.l.bf16 %v4436_v37  ;;  %v4433_v35 = vunpack.i.h.bf16 %v4431_v45  ;;  %v4432_v17 = vunpack.i.l.bf16 %v4431_v45 }
 0x21d   :  { %v2248_v47 = vsel %vm2239_vm6, %v2215_v30, %v4437_v52  ;;  %v2249_v29 = vsel %vm2239_vm6, %v2216_v59, %v4438_v33  ;;  %v2218_v53 = vsel %vm2206_vm5, %v5486_v2, %v4433_v35  ;;  %v2217_v31 = vsel %vm2206_vm5, %v5484_v12, %v4432_v17 }
 0x21e   :  { %v2276_v57 = vpack.c.bf16 %v2249_v29, %v2248_v47 }
 0x220   :  { %3977 = vmatprep.mubr.msk.bf16.mxu1 %vm2307_vm7, %v2276_v57 }
 0x225   :  { %v4441_v41 = vpop.permute.xlu1 %4440  ;;  %v4446_v15 = vpop.permute.xlu0 %4445 }
 0x226   :  { %v4443_v8 = vunpack.i.h.bf16 %v4441_v41  ;;  %v4442_v9 = vunpack.i.l.bf16 %v4441_v41  ;;  %v4448_v5 = vunpack.i.h.bf16 %v4446_v15  ;;  %v4447_v36 = vunpack.i.l.bf16 %v4446_v15 }
 0x228   :  { %v2250_v22 = vsel %vm2239_vm6, %v2217_v31, %v4442_v9  ;;  %v2251_v6 = vsel %vm2239_vm6, %v2218_v53, %v4443_v8  ;;  %v2220_v7 = vsel %vm2206_vm5, %v5498_v4, %v4448_v5  ;;  %v2219_v2 = vsel %vm2206_vm5, %v5496_v49, %v4447_v36 }
 0x229   :  { %v2277_v43 = vpack.c.bf16 %v2251_v6, %v2250_v22 }
 0x22b   :  { %3978 = vmatmul.mubr.msk.bf16.gmra.mrb[8].mxu1 %vm2307_vm7, %v2277_v43 }
 0x22c   :  { %v4456_v44 = vpop.permute.xlu0 %4455  ;;  %v4451_v13 = vpop.permute.xlu1 %4450 }
 0x22d   :  { %v4458_v14 = vunpack.i.h.bf16 %v4456_v44  ;;  %v4457_v48 = vunpack.i.l.bf16 %v4456_v44  ;;  %v4453_v32 = vunpack.i.h.bf16 %v4451_v13  ;;  %v4452_v23 = vunpack.i.l.bf16 %v4451_v13 }
 0x22f   :  { %v2252_v12 = vsel %vm2239_vm6, %v2219_v2, %v4457_v48  ;;  %v2253_v46 = vsel %vm2239_vm6, %v2220_v7, %v4458_v14  ;;  %v2222_v11 = vsel %vm2206_vm5, %v5512_v24, %v4453_v32  ;;  %v2221_v4 = vsel %vm2206_vm5, %v5508_v20, %v4452_v23 }
 0x230   :  { %v2278_v28 = vpack.c.bf16 %v2253_v46, %v2252_v12 }
 0x232   :  { %3981 = vmatprep.mubr.msk.bf16.mxu1 %vm2307_vm7, %v2278_v28 }
 0x234   :  { %v4461_v62 = vpop.permute.xlu1 %4460  ;;  %v4466_v63 = vpop.permute.xlu0 %4465 }
 0x235   :  { %v4463_v0 = vunpack.i.h.bf16 %v4461_v62  ;;  %v4462_v27 = vunpack.i.l.bf16 %v4461_v62  ;;  %v4468_v3 = vunpack.i.h.bf16 %v4466_v63  ;;  %v4467_v39 = vunpack.i.l.bf16 %v4466_v63 }
 0x237   :  { %v2254_v49 = vsel %vm2239_vm6, %v2221_v4, %v4462_v27  ;;  %v2255_v34 = vsel %vm2239_vm6, %v2222_v11, %v4463_v0  ;;  %v2224_v52 = vsel %vm2206_vm5, %v5522_v19, %v4468_v3  ;;  %v2223_v24 = vsel %vm2206_vm5, %v5520_v56, %v4467_v39 }
 0x238   :  { %v2279_v42 = vpack.c.bf16 %v2255_v34, %v2254_v49 }
 0x23a   :  { %3982 = vmatmul.mubr.msk.bf16.gmra.mrb[12].mxu1 %vm2307_vm7, %v2279_v42 }
 0x23c   :  { %v4476_v40 = vpop.permute.xlu0 %4475  ;;  %v4471_v47 = vpop.permute.xlu1 %4470 }
 0x23d   :  { %v4478_v37 = vunpack.i.h.bf16 %v4476_v40  ;;  %v4477_v33 = vunpack.i.l.bf16 %v4476_v40  ;;  %v4473_v29 = vunpack.i.h.bf16 %v4471_v47  ;;  %v4472_v57 = vunpack.i.l.bf16 %v4471_v47 }
 0x23f   :  { %v2256_v20 = vsel %vm2239_vm6, %v2223_v24, %v4477_v33  ;;  %v2257_v59 = vsel %vm2239_vm6, %v2224_v52, %v4478_v37  ;;  %v2226_v41 = vsel %vm2206_vm5, %v5536_v16, %v4473_v29  ;;  %v2225_v19 = vsel %vm2206_vm5, %v5532_v25, %v4472_v57 }
 0x240   :  { %v2280_v30 = vpack.c.bf16 %v2257_v59, %v2256_v20 }
 0x242   :  { %3985 = vmatprep.mubr.msk.bf16.mxu1 %vm2307_vm7, %v2280_v30 }
 0x248   :  { %v4481_v45 = vpop.permute.xlu1 %4480  ;;  %v4486_v9 = vpop.permute.xlu0 %4485 }
 0x249   :  { %v4483_v35 = vunpack.i.h.bf16 %v4481_v45  ;;  %v4482_v17 = vunpack.i.l.bf16 %v4481_v45  ;;  %v4488_v31 = vunpack.i.h.bf16 %v4486_v9  ;;  %v4487_v22 = vunpack.i.l.bf16 %v4486_v9 }
 0x24b   :  { %v2258_v56 = vsel %vm2239_vm6, %v2225_v19, %v4482_v17  ;;  %v2259_v8 = vsel %vm2239_vm6, %v2226_v41, %v4483_v35  ;;  %v2228_v5 = vsel %vm2206_vm5, %v5546_v21, %v4488_v31  ;;  %v2227_v16 = vsel %vm2206_vm5, %v5544_v26, %v4487_v22 }
 0x24c   :  { %v2281_v53 = vpack.c.bf16 %v2259_v8, %v2258_v56 }
 0x24d   :  { %v4496_v6 = vpop.permute.xlu0 %4495  ;;  %v4491_v14 = vpop.permute.xlu1 %4490 }
 0x24e   :  { %3986 = vmatmul.mubr.msk.bf16.gmra.mrb[16].mxu1 %vm2307_vm7, %v2281_v53  ;;  %v4498_v15 = vunpack.i.h.bf16 %v4496_v6  ;;  %v4497_v43 = vunpack.i.l.bf16 %v4496_v6  ;;  %v4493_v48 = vunpack.i.h.bf16 %v4491_v14  ;;  %v4492_v7 = vunpack.i.l.bf16 %v4491_v14 }
 0x250   :  { %v2260_v25 = vsel %vm2239_vm6, %v2227_v16, %v4497_v43  ;;  %v2261_v36 = vsel %vm2239_vm6, %v2228_v5, %v4498_v15  ;;  %v2230_v21 = vsel %vm2206_vm5, %v5562_v60, %v4493_v48  ;;  %v2229_v26 = vsel %vm2206_vm5, %v5558_v55, %v4492_v7 }
 0x251   :  { %v2282_v44 = vpack.c.bf16 %v2261_v36, %v2260_v25 }
 0x253   :  { %3989 = vmatprep.mubr.msk.bf16.mxu1 %vm2307_vm7, %v2282_v44 }
 0x259   :  { %v4501_v2 = vpop.permute.xlu1 %4500  ;;  %v4506_v28 = vpop.permute.xlu0 %4505 }
 0x25a   :  { %v4503_v12 = vunpack.i.h.bf16 %v4501_v2  ;;  %v4502_v46 = vunpack.i.l.bf16 %v4501_v2  ;;  %v4508_v23 = vunpack.i.h.bf16 %v4506_v28  ;;  %v4507_v62 = vunpack.i.l.bf16 %v4506_v28 }
 0x25c   :  { %v2262_v13 = vsel %vm2239_vm6, %v2229_v26, %v4502_v46  ;;  %v2263_v32 = vsel %vm2239_vm6, %v2230_v21, %v4503_v12  ;;  %v2232_v34 = vsel %vm2206_vm5, %v5576_v1, %v4508_v23  ;;  %v2231_v60 = vsel %vm2206_vm5, %v5574_v61, %v4507_v62 }
 0x25d   :  { %v2283_v0 = vpack.c.bf16 %v2263_v32, %v2262_v13  ;;  %v4511_v27 = vpop.permute.xlu1 %4510  ;;  %v4516_v11 = vpop.permute.xlu0 %4515 }
 0x25e   :  { %v4518_v4 = vunpack.i.h.bf16 %v4516_v11  ;;  %v4517_v49 = vunpack.i.l.bf16 %v4516_v11  ;;  %v4513_v55 = vunpack.i.h.bf16 %v4511_v27  ;;  %v4512_v63 = vunpack.i.l.bf16 %v4511_v27 }
 0x25f   :  { %3990 = vmatmul.mubr.msk.bf16.gmra.mrb[20].mxu1 %vm2307_vm7, %v2283_v0 }
 0x260   :  { %v2264_v42 = vsel %vm2239_vm6, %v2231_v60, %v4517_v49  ;;  %v2265_v3 = vsel %vm2239_vm6, %v2232_v34, %v4518_v4  ;;  %v2234_v52 = vsel %vm2206_vm5, %v5602_v10, %v4513_v55  ;;  %v2233_v1 = vsel %vm2206_vm5, %v5598_v51, %v4512_v63 }
 0x261   :  { %v2284_v39 = vpack.c.bf16 %v2265_v3, %v2264_v42 }
 0x263   :  { %v4521_v40 = vpop.permute.xlu1 %4520  ;;  %3993 = vmatprep.mubr.msk.bf16.mxu1 %vm2307_vm7, %v2284_v39  ;;  %v4526_v59 = vpop.permute.xlu0 %4525 }
 0x264   :  { %v4523_v37 = vunpack.i.h.bf16 %v4521_v40  ;;  %v4522_v33 = vunpack.i.l.bf16 %v4521_v40  ;;  %v4528_v30 = vunpack.i.h.bf16 %v4526_v59  ;;  %v4527_v47 = vunpack.i.l.bf16 %v4526_v59 }
 0x266   :  { %v2266_v61 = vsel %vm2239_vm6, %v2233_v1, %v4522_v33  ;;  %v2267_v24 = vsel %vm2239_vm6, %v2234_v52, %v4523_v37  ;;  %v2236_v10 = vsel %vm2206_vm5, %v5614_v38, %v4528_v30  ;;  %v2235_v51 = vsel %vm2206_vm5, %v5612_v18, %v4527_v47 }
 0x267   :  { %v2285_v20 = vpack.c.bf16 %v2267_v24, %v2266_v61 }
 0x269   :  { %3994 = vmatmul.mubr.msk.bf16.gmra.mrb[24].mxu1 %vm2307_vm7, %v2285_v20 }
 0x26d   :  { %v4531_v29 = vpop.permute.xlu1 %4530  ;;  %v4536_v57 = vpop.permute.xlu0 %4535 }
 0x26e   :  { %v4533_v45 = vunpack.i.h.bf16 %v4531_v29  ;;  %v4532_v35 = vunpack.i.l.bf16 %v4531_v29  ;;  %v4538_v17 = vunpack.i.h.bf16 %v4536_v57  ;;  %v4537_v41 = vunpack.i.l.bf16 %v4536_v57 }
 0x270   :  { %v2238_v19 = vsel %vm2206_vm5, %v5635_v54, %v4533_v45  ;;  %v2237_v56 = vsel %vm2206_vm5, %v5632_v58, %v4532_v35  ;;  %v2268_v8 = vsel %vm2239_vm6, %v2235_v51, %v4537_v41  ;;  %v2269_v9 = vsel %vm2239_vm6, %v2236_v10, %v4538_v17  ;;  %v5764_v58 = vld [vmem:[%s6061_s4] ss:$0 sm:$0xff] }
 0x271   :  { %v2286_v53 = vpack.c.bf16 %v2269_v9, %v2268_v8  ;;  %v5753_v31 = vpop.permute.xlu1 %2173 }
 0x272   :  { %v2270_v22 = vsel %vm2239_vm6, %v2237_v56, %v5753_v31  ;;  %v2271_v38 = vsel %vm2239_vm6, %v2238_v19, %v5753_v31 }
 0x273   :  { %v2287_v18 = vpack.c.bf16 %v2271_v38, %v2270_v22  ;;  %3997 = vmatprep.mubr.msk.bf16.mxu1 %vm2307_vm7, %v2286_v53 }
 0x275   :  { %3998 = vmatmul.mubr.msk.bf16.gmra.mrb[28].mxu1 %vm2307_vm7, %v2287_v18 }
 0x2da   :  { %v3971_v54 = vpop.f32.mrb[0].mxu1 }
 0x2db   :  { %v2403_v6 = vadd.f32 %v3971_v54, %v5764_v58  ;;  %v2394_v15 = vpop.f32.mrb[1].mxu1 }
 0x2dc   :  { %v2395_v43 = vadd.f32 %v5764_v58, %v2394_v15  ;;  %v3972_v5 = vpop.f32.mrb[2].mxu1 }
 0x2dd   :  { %v2523_v16 = vmax.f32 %v2403_v6, 0.0  ;;  %v2406_v25 = vadd.f32 %v3972_v5, %v5764_v58  ;;  %v2397_v36 = vpop.f32.mrb[3].mxu1 }
 0x2de   :  { %v2521_v44 = vmax.f32 %v2395_v43, 0.0  ;;  %v2398_v14 = vadd.f32 %v5764_v58, %v2397_v36 }
 0x2df   :  { %v2555_v48 = vmul.f32 7.5, %v2523_v16  ;;  %v2524_v7 = vmax.f32 %v2406_v25, 0.0 }
 0x2e0   :  { %v2553_v2 = vmul.f32 7.5, %v2521_v44  ;;  %v2522_v12 = vmax.f32 %v2398_v14, 0.0 }
 0x2e1   :  { %v2587_v46 = vadd.f32 0.5, %v2555_v48  ;;  %v2556_v28 = vmul.f32 7.5, %v2524_v7 }
 0x2e2   :  { %v2585_v21 = vadd.f32 0.5, %v2553_v2  ;;  %v2554_v26 = vmul.f32 7.5, %v2522_v12 }
 0x2e3   :  { %v2619_v13 = vfloor.f32 %v2587_v46  ;;  %v2588_v32 = vadd.f32 0.5, %v2556_v28 }
 0x2e4   :  { %v2617_v23 = vfloor.f32 %v2585_v21  ;;  %v2586_v62 = vadd.f32 0.5, %v2554_v26  ;;  %v4656_v21 = vld [vmem:[%s6062_s5] sm:$0xff]  }
 0x2e5   :  { %v2651_v0 = vmax.f32 %v2619_v13, 0.0  ;;  %v2620_v27 = vfloor.f32 %v2588_v32  ;;  %4001 = vmatprep.subr.bf16.mxu1 %v4656_v21 }
 0x2e6   :  { %v2649_v11 = vmax.f32 %v2617_v23, 0.0  ;;  %v2618_v4 = vfloor.f32 %v2586_v62  ;;  %4002 = vmatpush3.bf16.msra.mxu1 %v4656_v21 }
 0x2e7   :  { %v2683_v49 = vmin.f32 %v2651_v0, 15.0  ;;  %v2652_v34 = vmax.f32 %v2620_v27, 0.0 }
 0x2e8   :  { %v2681_v60 = vmin.f32 %v2649_v11, 15.0  ;;  %v2650_v55 = vmax.f32 %v2618_v4, 0.0 }
 0x2e9   :  { %v2715_v63 = vmul.f32 0.13333334, %v2683_v49  ;;  %v2684_v42 = vmin.f32 %v2652_v34, 15.0 }
 0x2ea   :  { %v2713_v3 = vmul.f32 0.13333334, %v2681_v60  ;;  %v2682_v39 = vmin.f32 %v2650_v55, 15.0 }
 0x2eb   :  { %v2716_v40 = vmul.f32 0.13333334, %v2684_v42 }
 0x2ec   :  { %v2714_v37 = vmul.f32 0.13333334, %v2682_v39  ;;  %v5770_v33 = vmax.f32 %v2713_v3, %v2715_v63  ;;  %v3975_v52 = vpop.f32.mrb[4].mxu1 }
 0x2ed   :  { %v2419_v1 = vadd.f32 %v3975_v52, %v5764_v58  ;;  %v2410_v61 = vpop.f32.mrb[5].mxu1 }
 0x2ee   :  { %v5773_v24 = vmax.f32 %v2714_v37, %v2716_v40  ;;  %v2411_v20 = vadd.f32 %v5764_v58, %v2410_v61  ;;  %v3976_v59 = vpop.f32.mrb[6].mxu1 }
 0x2ef   :  { %v2527_v30 = vmax.f32 %v2419_v1, 0.0  ;;  %v2422_v47 = vadd.f32 %v3976_v59, %v5764_v58  ;;  %v2413_v29 = vpop.f32.mrb[7].mxu1 }
 0x2f0   :  { %v4539_v57 = vpack.i.bf16 %v5773_v24, %v5770_v33  ;;  %v2525_v45 = vmax.f32 %v2411_v20, 0.0  ;;  %v2414_v35 = vadd.f32 %v5764_v58, %v2413_v29 }
 0x2f1   :  { %v2559_v17 = vmul.f32 7.5, %v2527_v30  ;;  %v2528_v41 = vmax.f32 %v2422_v47, 0.0 }
 0x2f2   :  { %4540 = vrot.lane.b32.xlu0 %v4539_v57, %s4671_s17  ;;  %v2557_v10 = vmul.f32 7.5, %v2525_v45  ;;  %v2526_v51 = vmax.f32 %v2414_v35, 0.0 }
 0x2f3   :  { %v2591_v19 = vadd.f32 0.5, %v2559_v17  ;;  %v2560_v56 = vmul.f32 7.5, %v2528_v41  ;;  %v4657_v41 = vld [vmem:[%s6062_s5 + $0x8] ss:$0 sps:$4 sm:$0xff]  }
 0x2f4   :  { %v2589_v8 = vadd.f32 0.5, %v2557_v10  ;;  %v2558_v9 = vmul.f32 7.5, %v2526_v51  ;;  %4061 = vmatprep.subr.msk.bf16.mxu1 %vm2356_vm4, %v4657_v41 }
 0x2f5   :  { %v2623_v53 = vfloor.f32 %v2591_v19  ;;  %v2592_v22 = vadd.f32 0.5, %v2560_v56 }
 0x2f6   :  { %v2621_v38 = vfloor.f32 %v2589_v8  ;;  %v2590_v18 = vadd.f32 0.5, %v2558_v9  ;;  %v2951_v8 = vsel %vm2356_vm4, %v4657_v41, 0 }
 0x2f7   :  { %v2655_v54 = vmax.f32 %v2623_v53, 0.0  ;;  %v2624_v6 = vfloor.f32 %v2592_v22  ;;  %4004 = vmatpush3.bf16.msra.mxu1 %v2951_v8 }
 0x2f8   :  { %v2653_v15 = vmax.f32 %v2621_v38, 0.0  ;;  %v2622_v43 = vfloor.f32 %v2590_v18 }
 0x2f9   :  { %v2687_v5 = vmin.f32 %v2655_v54, 15.0  ;;  %v2656_v16 = vmax.f32 %v2624_v6, 0.0 }
 0x2fa   :  { %v2685_v25 = vmin.f32 %v2653_v15, 15.0  ;;  %v2654_v36 = vmax.f32 %v2622_v43, 0.0 }
 0x2fb   :  { %v2719_v44 = vmul.f32 0.13333334, %v2687_v5  ;;  %v2688_v14 = vmin.f32 %v2656_v16, 15.0 }
 0x2fc   :  { %v2717_v48 = vmul.f32 0.13333334, %v2685_v25  ;;  %v2686_v7 = vmin.f32 %v2654_v36, 15.0 }
 0x2fd   :  { %v2720_v2 = vmul.f32 0.13333334, %v2688_v14 }
 0x2fe   :  { %v5781_v12 = vmax.f32 %v2717_v48, %v2719_v44  ;;  %v2718_v46 = vmul.f32 0.13333334, %v2686_v7  ;;  %v3979_v28 = vpop.f32.mrb[8].mxu1 }
 0x2ff   :  { %v2435_v26 = vadd.f32 %v3979_v28, %v5764_v58  ;;  %v2426_v13 = vpop.f32.mrb[9].mxu1 }
 0x300   :  { %v5787_v32 = vmax.f32 %v2718_v46, %v2720_v2  ;;  %v2427_v23 = vadd.f32 %v5764_v58, %v2426_v13  ;;  %v3980_v62 = vpop.f32.mrb[10].mxu1 }
 0x301   :  { %v2531_v0 = vmax.f32 %v2435_v26, 0.0  ;;  %v2438_v27 = vadd.f32 %v3980_v62, %v5764_v58  ;;  %v2429_v11 = vpop.f32.mrb[11].mxu1 }
 0x302   :  { %v2529_v4 = vmax.f32 %v2427_v23, 0.0  ;;  %v2430_v49 = vadd.f32 %v5764_v58, %v2429_v11  ;;  %v4544_v34 = vpack.i.bf16 %v5787_v32, %v5781_v12 }
 0x303   :  { %v2563_v60 = vmul.f32 7.5, %v2531_v0  ;;  %v2532_v55 = vmax.f32 %v2438_v27, 0.0 }
 0x304   :  { %v2561_v63 = vmul.f32 7.5, %v2529_v4  ;;  %v2530_v42 = vmax.f32 %v2430_v49, 0.0  ;;  %4545 = vrot.lane.b32.xlu1 %v4544_v34, %s4671_s17  ;;  %4550 = vrot.lane.b32.xlu0 %v4544_v34, %s4672_s29 }
 0x305   :  { %v2595_v3 = vadd.f32 0.5, %v2563_v60  ;;  %v2564_v39 = vmul.f32 7.5, %v2532_v55 }
 0x306   :  { %v2593_v40 = vadd.f32 0.5, %v2561_v63  ;;  %v2562_v37 = vmul.f32 7.5, %v2530_v42 }
 0x307   :  { %v2627_v52 = vfloor.f32 %v2595_v3  ;;  %v2596_v1 = vadd.f32 0.5, %v2564_v39 }
 0x308   :  { %v2625_v61 = vfloor.f32 %v2593_v40  ;;  %v2594_v20 = vadd.f32 0.5, %v2562_v37 }
 0x309   :  { %v2659_v59 = vmax.f32 %v2627_v52, 0.0  ;;  %v2628_v30 = vfloor.f32 %v2596_v1 }
 0x30a   :  { %v2657_v47 = vmax.f32 %v2625_v61, 0.0  ;;  %v2626_v29 = vfloor.f32 %v2594_v20 }
 0x30b   :  { %v2691_v57 = vmin.f32 %v2659_v59, 15.0  ;;  %v2660_v45 = vmax.f32 %v2628_v30, 0.0 }
 0x30c   :  { %v2689_v35 = vmin.f32 %v2657_v47, 15.0  ;;  %v2658_v17 = vmax.f32 %v2626_v29, 0.0 }
 0x30d   :  { %v2723_v10 = vmul.f32 0.13333334, %v2691_v57  ;;  %v2692_v51 = vmin.f32 %v2660_v45, 15.0  ;;  %v3983_v38 = vpop.f32.mrb[12].mxu1 }
 0x30e   :  { %v2721_v19 = vmul.f32 0.13333334, %v2689_v35  ;;  %v2690_v56 = vmin.f32 %v2658_v17, 15.0  ;;  %v2451_v18 = vadd.f32 %v3983_v38, %v5764_v58  ;;  %v2442_v54 = vpop.f32.mrb[13].mxu1 }
 0x30f   :  { %v2724_v9 = vmul.f32 0.13333334, %v2692_v51  ;;  %v2443_v15 = vadd.f32 %v5764_v58, %v2442_v54  ;;  %v3984_v43 = vpop.f32.mrb[14].mxu1 }
 0x310   :  { %v5801_v53 = vmax.f32 %v2721_v19, %v2723_v10  ;;  %v2722_v22 = vmul.f32 0.13333334, %v2690_v56  ;;  %v2535_v5 = vmax.f32 %v2451_v18, 0.0  ;;  %v2454_v16 = vadd.f32 %v3984_v43, %v5764_v58  ;;  %v2445_v25 = vpop.f32.mrb[15].mxu1 }
 0x311   :  { %v2533_v36 = vmax.f32 %v2443_v15, 0.0  ;;  %v2446_v44 = vadd.f32 %v5764_v58, %v2445_v25 }
 0x312   :  { %v5804_v6 = vmax.f32 %v2722_v22, %v2724_v9  ;;  %v2567_v48 = vmul.f32 7.5, %v2535_v5  ;;  %v2536_v7 = vmax.f32 %v2454_v16, 0.0 }
 0x313   :  { %v2565_v2 = vmul.f32 7.5, %v2533_v36  ;;  %v2534_v46 = vmax.f32 %v2446_v44, 0.0 }
 0x314   :  { %v4554_v14 = vpack.i.bf16 %v5804_v6, %v5801_v53  ;;  %v2599_v28 = vadd.f32 0.5, %v2567_v48  ;;  %v2568_v21 = vmul.f32 7.5, %v2536_v7 }
 0x315   :  { %v2597_v26 = vadd.f32 0.5, %v2565_v2  ;;  %v2566_v13 = vmul.f32 7.5, %v2534_v46 }
 0x316   :  { %4555 = vrot.lane.b32.xlu1 %v4554_v14, %s4672_s29  ;;  %4560 = vrot.lane.b32.xlu0 %v4554_v14, %s4671_s17  ;;  %v2631_v23 = vfloor.f32 %v2599_v28  ;;  %v2600_v62 = vadd.f32 0.5, %v2568_v21 }
 0x317   :  { %v2629_v0 = vfloor.f32 %v2597_v26  ;;  %v2598_v27 = vadd.f32 0.5, %v2566_v13 }
 0x318   :  { %v2663_v11 = vmax.f32 %v2631_v23, 0.0  ;;  %v2632_v4 = vfloor.f32 %v2600_v62 }
 0x319   :  { %v2661_v49 = vmax.f32 %v2629_v0, 0.0  ;;  %v2630_v34 = vfloor.f32 %v2598_v27 }
 0x31a   :  { %v2695_v60 = vmin.f32 %v2663_v11, 15.0  ;;  %v2664_v55 = vmax.f32 %v2632_v4, 0.0 }
 0x31b   :  { %v2693_v63 = vmin.f32 %v2661_v49, 15.0  ;;  %v2662_v42 = vmax.f32 %v2630_v34, 0.0 }
 0x31c   :  { %v2727_v3 = vmul.f32 0.13333334, %v2695_v60  ;;  %v2696_v39 = vmin.f32 %v2664_v55, 15.0 }
 0x31d   :  { %v2725_v40 = vmul.f32 0.13333334, %v2693_v63  ;;  %v2694_v37 = vmin.f32 %v2662_v42, 15.0 }
 0x31e   :  { %v2728_v52 = vmul.f32 0.13333334, %v2696_v39 }
 0x31f   :  { %v5813_v1 = vmax.f32 %v2725_v40, %v2727_v3  ;;  %v2726_v61 = vmul.f32 0.13333334, %v2694_v37 }
 0x321   :  { %v3987_v20 = vpop.f32.mrb[16].mxu1  ;;  %v5816_v47 = vmax.f32 %v2726_v61, %v2728_v52 }
 0x322   :  { %v2467_v59 = vadd.f32 %v3987_v20, %v5764_v58  ;;  %v2458_v30 = vpop.f32.mrb[17].mxu1 }
 0x323   :  { %v2459_v29 = vadd.f32 %v5764_v58, %v2458_v30  ;;  %v3988_v57 = vpop.f32.mrb[18].mxu1  ;;  %v4564_v51 = vpack.i.bf16 %v5816_v47, %v5813_v1 }
 0x324   :  { %v2539_v45 = vmax.f32 %v2467_v59, 0.0  ;;  %v2470_v35 = vadd.f32 %v3988_v57, %v5764_v58  ;;  %v2461_v17 = vpop.f32.mrb[19].mxu1 }
 0x325   :  { %v2537_v41 = vmax.f32 %v2459_v29, 0.0  ;;  %v2462_v10 = vadd.f32 %v5764_v58, %v2461_v17  ;;  %4565 = vrot.lane.b32.xlu1 %v4564_v51, %s4671_s17  ;;  %4570 = vrot.lane.b32.xlu0 %v4564_v51, %s4672_s29 }
 0x326   :  { %v2571_v19 = vmul.f32 7.5, %v2539_v45  ;;  %v2540_v56 = vmax.f32 %v2470_v35, 0.0 }
 0x327   :  { %v2569_v8 = vmul.f32 7.5, %v2537_v41  ;;  %v2538_v9 = vmax.f32 %v2462_v10, 0.0 }
 0x328   :  { %v2603_v22 = vadd.f32 0.5, %v2571_v19  ;;  %v2572_v38 = vmul.f32 7.5, %v2540_v56 }
 0x329   :  { %v2601_v18 = vadd.f32 0.5, %v2569_v8  ;;  %v2570_v54 = vmul.f32 7.5, %v2538_v9 }
 0x32a   :  { %v2635_v15 = vfloor.f32 %v2603_v22  ;;  %v2604_v43 = vadd.f32 0.5, %v2572_v38 }
 0x32b   :  { %v2633_v5 = vfloor.f32 %v2601_v18  ;;  %v2602_v16 = vadd.f32 0.5, %v2570_v54 }
 0x32c   :  { %v2667_v25 = vmax.f32 %v2635_v15, 0.0  ;;  %v2636_v36 = vfloor.f32 %v2604_v43 }
 0x32d   :  { %v2665_v44 = vmax.f32 %v2633_v5, 0.0  ;;  %v2634_v14 = vfloor.f32 %v2602_v16 }
 0x32e   :  { %v2699_v48 = vmin.f32 %v2667_v25, 15.0  ;;  %v2668_v7 = vmax.f32 %v2636_v36, 0.0 }
 0x32f   :  { %v2697_v2 = vmin.f32 %v2665_v44, 15.0  ;;  %v2666_v46 = vmax.f32 %v2634_v14, 0.0 }
 0x330   :  { %v2731_v28 = vmul.f32 0.13333334, %v2699_v48  ;;  %v2700_v21 = vmin.f32 %v2668_v7, 15.0 }
 0x331   :  { %v2729_v26 = vmul.f32 0.13333334, %v2697_v2  ;;  %v2698_v13 = vmin.f32 %v2666_v46, 15.0 }
 0x332   :  { %v2732_v23 = vmul.f32 0.13333334, %v2700_v21  ;;  %v3991_v27 = vpop.f32.mrb[20].mxu1 }
 0x333   :  { %v5825_v62 = vmax.f32 %v2729_v26, %v2731_v28  ;;  %v2730_v0 = vmul.f32 0.13333334, %v2698_v13  ;;  %v2483_v11 = vadd.f32 %v3991_v27, %v5764_v58  ;;  %v2474_v4 = vpop.f32.mrb[21].mxu1 }
 0x334   :  { %v2475_v34 = vadd.f32 %v5764_v58, %v2474_v4  ;;  %v3992_v60 = vpop.f32.mrb[22].mxu1 }
 0x335   :  { %v5828_v49 = vmax.f32 %v2730_v0, %v2732_v23  ;;  %v2543_v55 = vmax.f32 %v2483_v11, 0.0  ;;  %v2486_v63 = vadd.f32 %v3992_v60, %v5764_v58  ;;  %v2477_v42 = vpop.f32.mrb[23].mxu1 }
 0x336   :  { %v2541_v3 = vmax.f32 %v2475_v34, 0.0  ;;  %v2478_v39 = vadd.f32 %v5764_v58, %v2477_v42 }
 0x337   :  { %v4574_v40 = vpack.i.bf16 %v5828_v49, %v5825_v62  ;;  %v2575_v37 = vmul.f32 7.5, %v2543_v55  ;;  %v2544_v52 = vmax.f32 %v2486_v63, 0.0 }
 0x338   :  { %v2573_v61 = vmul.f32 7.5, %v2541_v3  ;;  %v2542_v20 = vmax.f32 %v2478_v39, 0.0 }
 0x339   :  { %4575 = vrot.lane.b32.xlu1 %v4574_v40, %s4672_s29  ;;  %4580 = vrot.lane.b32.xlu0 %v4574_v40, %s4671_s17  ;;  %v2607_v59 = vadd.f32 0.5, %v2575_v37  ;;  %v2576_v30 = vmul.f32 7.5, %v2544_v52 }
 0x33a   :  { %v2605_v29 = vadd.f32 0.5, %v2573_v61  ;;  %v2574_v57 = vmul.f32 7.5, %v2542_v20 }
 0x33b   :  { %v2639_v45 = vfloor.f32 %v2607_v59  ;;  %v2608_v35 = vadd.f32 0.5, %v2576_v30 }
 0x33c   :  { %v2637_v17 = vfloor.f32 %v2605_v29  ;;  %v2606_v41 = vadd.f32 0.5, %v2574_v57  ;;  %v3995_v10 = vpop.f32.mrb[24].mxu1 }
 0x33d   :  { %v2671_v51 = vmax.f32 %v2639_v45, 0.0  ;;  %v2640_v19 = vfloor.f32 %v2608_v35  ;;  %v2499_v56 = vadd.f32 %v3995_v10, %v5764_v58  ;;  %v2490_v8 = vpop.f32.mrb[25].mxu1 }
 0x33e   :  { %v2669_v9 = vmax.f32 %v2637_v17, 0.0  ;;  %v2638_v22 = vfloor.f32 %v2606_v41  ;;  %v2491_v38 = vadd.f32 %v5764_v58, %v2490_v8  ;;  %v3996_v18 = vpop.f32.mrb[26].mxu1 }
 0x33f   :  { %v2703_v54 = vmin.f32 %v2671_v51, 15.0  ;;  %v2672_v15 = vmax.f32 %v2640_v19, 0.0  ;;  %v2547_v43 = vmax.f32 %v2499_v56, 0.0  ;;  %v2502_v5 = vadd.f32 %v3996_v18, %v5764_v58  ;;  %v2493_v16 = vpop.f32.mrb[27].mxu1 }
 0x340   :  { %v2701_v25 = vmin.f32 %v2669_v9, 15.0  ;;  %v2670_v36 = vmax.f32 %v2638_v22, 0.0  ;;  %v2545_v44 = vmax.f32 %v2491_v38, 0.0  ;;  %v2494_v14 = vadd.f32 %v5764_v58, %v2493_v16 }
 0x341   :  { %v2735_v48 = vmul.f32 0.13333334, %v2703_v54  ;;  %v2704_v7 = vmin.f32 %v2672_v15, 15.0  ;;  %v2579_v2 = vmul.f32 7.5, %v2547_v43  ;;  %v2548_v46 = vmax.f32 %v2502_v5, 0.0 }
 0x342   :  { %v2733_v28 = vmul.f32 0.13333334, %v2701_v25  ;;  %v2702_v21 = vmin.f32 %v2670_v36, 15.0  ;;  %v2577_v26 = vmul.f32 7.5, %v2545_v44  ;;  %v2546_v13 = vmax.f32 %v2494_v14, 0.0 }
 0x343   :  { %v2736_v23 = vmul.f32 0.13333334, %v2704_v7  ;;  %v2611_v0 = vadd.f32 0.5, %v2579_v2  ;;  %v2580_v27 = vmul.f32 7.5, %v2548_v46 }
 0x344   :  { %v5841_v11 = vmax.f32 %v2733_v28, %v2735_v48  ;;  %v2734_v4 = vmul.f32 0.13333334, %v2702_v21  ;;  %v2609_v34 = vadd.f32 0.5, %v2577_v26  ;;  %v2578_v60 = vmul.f32 7.5, %v2546_v13 }
 0x345   :  { %v2643_v55 = vfloor.f32 %v2611_v0  ;;  %v2612_v63 = vadd.f32 0.5, %v2580_v27 }
 0x346   :  { %v5843_v42 = vmax.f32 %v2734_v4, %v2736_v23  ;;  %v2641_v3 = vfloor.f32 %v2609_v34  ;;  %v2610_v39 = vadd.f32 0.5, %v2578_v60 }
 0x347   :  { %v2675_v40 = vmax.f32 %v2643_v55, 0.0  ;;  %v2644_v37 = vfloor.f32 %v2612_v63 }
 0x348   :  { %v2673_v52 = vmax.f32 %v2641_v3, 0.0  ;;  %v2642_v61 = vfloor.f32 %v2610_v39  ;;  %v4584_v20 = vpack.i.bf16 %v5843_v42, %v5841_v11  ;;  %v3999_v59 = vpop.f32.mrb[28].mxu1 }
 0x349   :  { %v2707_v30 = vmin.f32 %v2675_v40, 15.0  ;;  %v2676_v29 = vmax.f32 %v2644_v37, 0.0  ;;  %v2515_v57 = vadd.f32 %v3999_v59, %v5764_v58  ;;  %v2506_v45 = vpop.f32.mrb[29].mxu1 }
 0x34a   :  { %v2705_v35 = vmin.f32 %v2673_v52, 15.0  ;;  %v2674_v17 = vmax.f32 %v2642_v61, 0.0  ;;  %4585 = vrot.lane.b32.xlu1 %v4584_v20, %s4671_s17  ;;  %4590 = vrot.lane.b32.xlu0 %v4584_v20, %s4672_s29  ;;  %v2507_v41 = vadd.f32 %v5764_v58, %v2506_v45  ;;  %v4000_v10 = vpop.f32.mrb[30].mxu1 }
 0x34b   :  { %v2739_v51 = vmul.f32 0.13333334, %v2707_v30  ;;  %v2708_v19 = vmin.f32 %v2676_v29, 15.0  ;;  %v2551_v56 = vmax.f32 %v2515_v57, 0.0  ;;  %v2518_v8 = vadd.f32 %v4000_v10, %v5764_v58  ;;  %v2509_v9 = vpop.f32.mrb[31].mxu1 }
 0x34c   :  { %v2737_v22 = vmul.f32 0.13333334, %v2705_v35  ;;  %v2706_v38 = vmin.f32 %v2674_v17, 15.0  ;;  %v2549_v18 = vmax.f32 %v2507_v41, 0.0  ;;  %v2510_v54 = vadd.f32 %v5764_v58, %v2509_v9 }
 0x34d   :  { %v2740_v15 = vmul.f32 0.13333334, %v2708_v19  ;;  %v2583_v43 = vmul.f32 7.5, %v2551_v56  ;;  %v2552_v5 = vmax.f32 %v2518_v8, 0.0 }
 0x34e   :  { %v5853_v16 = vmax.f32 %v2737_v22, %v2739_v51  ;;  %v2738_v25 = vmul.f32 0.13333334, %v2706_v38  ;;  %v2581_v36 = vmul.f32 7.5, %v2549_v18  ;;  %v2550_v44 = vmax.f32 %v2510_v54, 0.0 }
 0x34f   :  { %v2615_v14 = vadd.f32 0.5, %v2583_v43  ;;  %v2584_v48 = vmul.f32 7.5, %v2552_v5 }
 0x350   :  { %v5855_v7 = vmax.f32 %v2738_v25, %v2740_v15  ;;  %v2613_v2 = vadd.f32 0.5, %v2581_v36  ;;  %v2582_v46 = vmul.f32 7.5, %v2550_v44 }
 0x351   :  { %v2647_v28 = vfloor.f32 %v2615_v14  ;;  %v2616_v21 = vadd.f32 0.5, %v2584_v48 }
 0x352   :  { %v2645_v26 = vfloor.f32 %v2613_v2  ;;  %v2614_v13 = vadd.f32 0.5, %v2582_v46  ;;  %v4594_v58 = vpack.i.bf16 %v5855_v7, %v5853_v16 }
 0x353   :  { %v2679_v23 = vmax.f32 %v2647_v28, 0.0  ;;  %v2648_v0 = vfloor.f32 %v2616_v21 }
 0x354   :  { %v2677_v27 = vmax.f32 %v2645_v26, 0.0  ;;  %v2646_v4 = vfloor.f32 %v2614_v13  ;;  %4595 = vrot.lane.b32.xlu1 %v4594_v58, %s4672_s29  ;;  %4600 = vrot.lane.b32.xlu0 %v4594_v58, %s4671_s17 }
 0x355   :  { %v2711_v34 = vmin.f32 %v2679_v23, 15.0  ;;  %v2680_v60 = vmax.f32 %v2648_v0, 0.0 }
 0x356   :  { %v2709_v55 = vmin.f32 %v2677_v27, 15.0  ;;  %v2678_v63 = vmax.f32 %v2646_v4, 0.0 }
 0x357   :  { %v2743_v3 = vmul.f32 0.13333334, %v2711_v34  ;;  %v2712_v39 = vmin.f32 %v2680_v60, 15.0 }
 0x358   :  { %v2741_v40 = vmul.f32 0.13333334, %v2709_v55  ;;  %v2710_v37 = vmin.f32 %v2678_v63, 15.0 }
 0x359   :  { %v2744_v52 = vmul.f32 0.13333334, %v2712_v39 }
 0x35a   :  { %v2759_v61 = vmax.f32 %v2741_v40, %v2743_v3  ;;  %v2742_v20 = vmul.f32 0.13333334, %v2710_v37 }
 0x35c   :  { %v2760_v59 = vmax.f32 %v2742_v20, %v2744_v52 }
 0x35e   :  { %v4604_v30 = vpack.i.bf16 %v2760_v59, %v2759_v61 }
 0x360   :  { %4605 = vrot.lane.b32.xlu1 %v4604_v30, %s4671_s17  ;;  %4610 = vrot.lane.b32.xlu0 %v4604_v30, %s4672_s29  ;;  %s4673_s17 = smov 32  }
 0x364   :  { %v4541_v29 = vpop.permute.xlu0 %4540 }
 0x365   :  { %v4543_v57 = vunpack.i.h.bf16 %v4541_v29  ;;  %v4542_v45 = vunpack.i.l.bf16 %v4541_v29 }
 0x367   :  { %v2868_v10 = vsel %vm2206_vm5, 0.0, %v4543_v57  ;;  %v2867_v51 = vsel %vm2206_vm5, 0.0, %v4542_v45 }
 0x376   :  { %v4551_v35 = vpop.permute.xlu0 %4550  ;;  %v4546_v9 = vpop.permute.xlu1 %4545 }
 0x377   :  { %v4553_v17 = vunpack.i.h.bf16 %v4551_v35  ;;  %v4552_v41 = vunpack.i.l.bf16 %v4551_v35  ;;  %v4548_v22 = vunpack.i.h.bf16 %v4546_v9  ;;  %v4547_v38 = vunpack.i.l.bf16 %v4546_v9 }
 0x379   :  { %v2883_v19 = vsel %vm2239_vm6, %v2867_v51, %v4552_v41  ;;  %v2884_v56 = vsel %vm2239_vm6, %v2868_v10, %v4553_v17  ;;  %v2869_v43 = vsel %vm2206_vm5, %v5770_v33, %v4547_v38  ;;  %v2870_v5 = vsel %vm2206_vm5, %v5773_v24, %v4548_v22 }
 0x37a   :  { %v2899_v8 = vpack.c.bf16 %v2884_v56, %v2883_v19 }
 0x37c   :  { %4005 = vmatprep.mubr.msk.bf16.mxu1 %vm2307_vm7, %v2899_v8 }
 0x388   :  { %v4556_v18 = vpop.permute.xlu1 %4555  ;;  %v4561_v14 = vpop.permute.xlu0 %4560 }
 0x389   :  { %v4558_v54 = vunpack.i.h.bf16 %v4556_v18  ;;  %v4557_v15 = vunpack.i.l.bf16 %v4556_v18  ;;  %v4563_v48 = vunpack.i.h.bf16 %v4561_v14  ;;  %v4562_v2 = vunpack.i.l.bf16 %v4561_v14 }
 0x38b   :  { %v2885_v25 = vsel %vm2239_vm6, %v2869_v43, %v4557_v15  ;;  %v2886_v36 = vsel %vm2239_vm6, %v2870_v5, %v4558_v54  ;;  %v2872_v26 = vsel %vm2206_vm5, %v5787_v32, %v4563_v48  ;;  %v2871_v33 = vsel %vm2206_vm5, %v5781_v12, %v4562_v2 }
 0x38c   :  { %v2900_v44 = vpack.c.bf16 %v2886_v36, %v2885_v25 }
 0x38e   :  { %4006 = vmatmul.mubr.msk.bf16.vlgmr.msra.gmra.mrb[32].mxu1 %vm2307_vm7, %v2900_v44 }
 0x397   :  { %v4571_v46 = vpop.permute.xlu0 %4570  ;;  %v4566_v23 = vpop.permute.xlu1 %4565 }
 0x398   :  { %v4573_v28 = vunpack.i.h.bf16 %v4571_v46  ;;  %v4572_v21 = vunpack.i.l.bf16 %v4571_v46  ;;  %v4568_v0 = vunpack.i.h.bf16 %v4566_v23  ;;  %v4567_v27 = vunpack.i.l.bf16 %v4566_v23 }
 0x39a   :  { %v2887_v24 = vsel %vm2239_vm6, %v2871_v33, %v4572_v21  ;;  %v2888_v13 = vsel %vm2239_vm6, %v2872_v26, %v4573_v28  ;;  %v2874_v55 = vsel %vm2206_vm5, %v5804_v6, %v4568_v0  ;;  %v2873_v32 = vsel %vm2206_vm5, %v5801_v53, %v4567_v27 }
 0x39b   :  { %v2901_v58 = vpack.c.bf16 %v2888_v13, %v2887_v24 }
 0x39d   :  { %4009 = vmatprep.mubr.msk.bf16.mxu1 %vm2307_vm7, %v2901_v58 }
 0x3ab   :  { %v4576_v4 = vpop.permute.xlu1 %4575  ;;  %v4581_v39 = vpop.permute.xlu0 %4580 }
 0x3ac   :  { %v4578_v34 = vunpack.i.h.bf16 %v4576_v4  ;;  %v4577_v60 = vunpack.i.l.bf16 %v4576_v4  ;;  %v4583_v40 = vunpack.i.h.bf16 %v4581_v39  ;;  %v4582_v37 = vunpack.i.l.bf16 %v4581_v39 }
 0x3ae   :  { %v2889_v12 = vsel %vm2239_vm6, %v2873_v32, %v4577_v60  ;;  %v2890_v63 = vsel %vm2239_vm6, %v2874_v55, %v4578_v34  ;;  %v2876_v59 = vsel %vm2206_vm5, %v5816_v47, %v4583_v40  ;;  %v2875_v6 = vsel %vm2206_vm5, %v5813_v1, %v4582_v37 }
 0x3af   :  { %v2902_v3 = vpack.c.bf16 %v2890_v63, %v2889_v12 }
 0x3b1   :  { %4010 = vmatmul.mubr.msk.bf16.gmra.mrb[36].mxu1 %vm2307_vm7, %v2902_v3 }
 0x3bc   :  { %v4591_v52 = vpop.permute.xlu0 %4590  ;;  %v4586_v57 = vpop.permute.xlu1 %4585 }
 0x3bd   :  { %v4593_v61 = vunpack.i.h.bf16 %v4591_v52  ;;  %v4592_v20 = vunpack.i.l.bf16 %v4591_v52  ;;  %v4588_v45 = vunpack.i.h.bf16 %v4586_v57  ;;  %v4587_v35 = vunpack.i.l.bf16 %v4586_v57 }
 0x3bf   :  { %v2891_v53 = vsel %vm2239_vm6, %v2875_v6, %v4592_v20  ;;  %v2892_v30 = vsel %vm2239_vm6, %v2876_v59, %v4593_v61  ;;  %v2878_v51 = vsel %vm2206_vm5, %v5828_v49, %v4588_v45  ;;  %v2877_v47 = vsel %vm2206_vm5, %v5825_v62, %v4587_v35 }
 0x3c0   :  { %v2903_v29 = vpack.c.bf16 %v2892_v30, %v2891_v53 }
 0x3c2   :  { %4013 = vmatprep.mubr.msk.bf16.mxu1 %vm2307_vm7, %v2903_v29 }
 0x3c6   :  { %v4596_v17 = vpop.permute.xlu1 %4595  ;;  %v4601_v8 = vpop.permute.xlu0 %4600 }
 0x3c7   :  { %v4598_v41 = vunpack.i.h.bf16 %v4596_v17  ;;  %v4597_v10 = vunpack.i.l.bf16 %v4596_v17  ;;  %v4603_v9 = vunpack.i.h.bf16 %v4601_v8  ;;  %v4602_v22 = vunpack.i.l.bf16 %v4601_v8 }
 0x3c9   :  { %v2893_v1 = vsel %vm2239_vm6, %v2877_v47, %v4597_v10  ;;  %v2894_v19 = vsel %vm2239_vm6, %v2878_v51, %v4598_v41  ;;  %v2880_v49 = vsel %vm2206_vm5, %v5843_v42, %v4603_v9  ;;  %v2879_v62 = vsel %vm2206_vm5, %v5841_v11, %v4602_v22  ;;  %v5922_v11 = vld [vmem:[%s6063_s6] ss:$0 sm:$0xff] }
 0x3ca   :  { %v2904_v56 = vpack.c.bf16 %v2894_v19, %v2893_v1 }
 0x3cc   :  { %4014 = vmatmul.mubr.msk.bf16.gmra.mrb[40].mxu1 %vm2307_vm7, %v2904_v56 }
 0x3d2   :  { %v4606_v38 = vpop.permute.xlu1 %4605  ;;  %v4611_v18 = vpop.permute.xlu0 %4610 }
 0x3d3   :  { %v4608_v54 = vunpack.i.h.bf16 %v4606_v38  ;;  %v4607_v15 = vunpack.i.l.bf16 %v4606_v38  ;;  %v4613_v43 = vunpack.i.h.bf16 %v4611_v18  ;;  %v4612_v5 = vunpack.i.l.bf16 %v4611_v18 }
 0x3d5   :  { %v2882_v25 = vsel %vm2206_vm5, %v5855_v7, %v4608_v54  ;;  %v2881_v36 = vsel %vm2206_vm5, %v5853_v16, %v4607_v15  ;;  %v2895_v44 = vsel %vm2239_vm6, %v2879_v62, %v4612_v5  ;;  %v2896_v14 = vsel %vm2239_vm6, %v2880_v49, %v4613_v43 }
 0x3d6   :  { %v2905_v48 = vpack.c.bf16 %v2896_v14, %v2895_v44  ;;  %v2897_v2 = vsel %vm2239_vm6, %v2881_v36, %v5753_v31  ;;  %v2898_v42 = vsel %vm2239_vm6, %v2882_v25, %v5753_v31 }
 0x3d7   :  { %v2906_v46 = vpack.c.bf16 %v2898_v42, %v2897_v2 }
 0x3d8   :  { %4017 = vmatprep.mubr.msk.bf16.mxu1 %vm2307_vm7, %v2905_v48 }
 0x3d9   :  { %4018 = vmatmul.mubr.msk.bf16.gmra.mrb[44].mxu1 %vm2307_vm7, %v2906_v46 }
 0x461   :  { %v4007_v16 = vpop.f32.mrb[32].mxu1 }
 0x462   :  { %v2996_v7 = vadd.f32 %v4007_v16, %v5922_v11  ;;  %v2987_v28 = vpop.f32.mrb[33].mxu1 }
 0x463   :  { %v2988_v21 = vadd.f32 %v5922_v11, %v2987_v28  ;;  %v4008_v26 = vpop.f32.mrb[34].mxu1 }
 0x464   :  { %v3052_v33 = vmax.f32 %v2996_v7, 0.0  ;;  %v2999_v31 = vadd.f32 %v4008_v26, %v5922_v11  ;;  %v2990_v24 = vpop.f32.mrb[35].mxu1 }
 0x465   :  { %v3050_v13 = vmax.f32 %v2988_v21, 0.0  ;;  %v2991_v58 = vadd.f32 %v5922_v11, %v2990_v24 }
 0x466   :  { %v3068_v23 = vmul.f32 7.5, %v3052_v33  ;;  %v3053_v0 = vmax.f32 %v2999_v31, 0.0 }
 0x467   :  { %v3066_v27 = vmul.f32 7.5, %v3050_v13  ;;  %v3051_v4 = vmax.f32 %v2991_v58, 0.0 }
 0x468   :  { %v3084_v34 = vadd.f32 0.5, %v3068_v23  ;;  %v3069_v60 = vmul.f32 7.5, %v3053_v0 }
 0x469   :  { %v3082_v55 = vadd.f32 0.5, %v3066_v27  ;;  %v3067_v32 = vmul.f32 7.5, %v3051_v4 }
 0x46a   :  { %v3100_v12 = vfloor.f32 %v3084_v34  ;;  %v3085_v63 = vadd.f32 0.5, %v3069_v60  ;;  %v4658_v34 = vld [vmem:[%s6064_s7] sm:$0xff]   ;;  %v4659_v60 = vld [vmem:[%s6064_s7 + $0x8] sm:$0xff]  }
 0x46b   :  { %v3098_v3 = vfloor.f32 %v3082_v55  ;;  %v3083_v39 = vadd.f32 0.5, %v3067_v32  ;;  %4021 = vmatprep.subr.bf16.mxu1 %v4658_v34 }
 0x46c   :  { %v3116_v40 = vmax.f32 %v3100_v12, 0.0  ;;  %v3101_v37 = vfloor.f32 %v3085_v63  ;;  %4022 = vmatpush3.bf16.msra.mxu1 %v4658_v34  ;;  %v4660_v12 = vld [vmem:[%s6064_s7 + $0x10] sm:$0xff]  }
 0x46d   :  { %v3114_v52 = vmax.f32 %v3098_v3, 0.0  ;;  %v3099_v61 = vfloor.f32 %v3083_v39  ;;  %4023 = vmatprep.subr.bf16.mxu1 %v4659_v60 }
 0x46e   :  { %v3132_v20 = vmin.f32 %v3116_v40, 15.0  ;;  %v3117_v59 = vmax.f32 %v3101_v37, 0.0 }
 0x46f   :  { %v3130_v6 = vmin.f32 %v3114_v52, 15.0  ;;  %v3115_v53 = vmax.f32 %v3099_v61, 0.0 }
 0x470   :  { %v3148_v30 = vmul.f32 0.13333334, %v3132_v20  ;;  %v3133_v29 = vmin.f32 %v3117_v59, 15.0  ;;  %4024 = vmatpush3.bf16.msra.mxu1 %v4659_v60 }
 0x471   :  { %v3146_v57 = vmul.f32 0.13333334, %v3130_v6  ;;  %v3131_v45 = vmin.f32 %v3115_v53, 15.0  ;;  %4025 = vmatprep.subr.bf16.mxu1 %v4660_v12 }
 0x472   :  { %v3149_v35 = vmul.f32 0.13333334, %v3133_v29 }
 0x473   :  { %v5928_v17 = vmax.f32 %v3146_v57, %v3148_v30  ;;  %v3147_v41 = vmul.f32 0.13333334, %v3131_v45 }
 0x474   :  { %4026 = vmatpush3.bf16.msra.mxu1 %v4660_v12 }
 0x475   :  { %v5930_v10 = vmax.f32 %v3147_v41, %v3149_v35  ;;  %4035 = vmatprep.subr.bf16.mxu1 %v6111_v50 }
 0x477   :  { %v4614_v51 = vpack.i.bf16 %v5930_v10, %v5928_v17 }
 0x479   :  { %4615 = vrot.lane.b32.xlu1 %v4614_v51, %s4672_s29 }
 0x484   :  { %v4011_v47 = vpop.f32.mrb[36].mxu1 }
 0x485   :  { %v3012_v1 = vadd.f32 %v4011_v47, %v5922_v11  ;;  %v3003_v19 = vpop.f32.mrb[37].mxu1 }
 0x486   :  { %v3004_v56 = vadd.f32 %v5922_v11, %v3003_v19  ;;  %v4012_v8 = vpop.f32.mrb[38].mxu1 }
 0x487   :  { %v3056_v9 = vmax.f32 %v3012_v1, 0.0  ;;  %v3015_v22 = vadd.f32 %v4012_v8, %v5922_v11  ;;  %v3006_v38 = vpop.f32.mrb[39].mxu1 }
 0x488   :  { %v3054_v18 = vmax.f32 %v3004_v56, 0.0  ;;  %v3007_v54 = vadd.f32 %v5922_v11, %v3006_v38 }
 0x489   :  { %v3072_v15 = vmul.f32 7.5, %v3056_v9  ;;  %v3057_v43 = vmax.f32 %v3015_v22, 0.0 }
 0x48a   :  { %v3070_v5 = vmul.f32 7.5, %v3054_v18  ;;  %v3055_v49 = vmax.f32 %v3007_v54, 0.0 }
 0x48b   :  { %v3088_v62 = vadd.f32 0.5, %v3072_v15  ;;  %v3073_v25 = vmul.f32 7.5, %v3057_v43 }
 0x48c   :  { %v3086_v36 = vadd.f32 0.5, %v3070_v5  ;;  %v3071_v44 = vmul.f32 7.5, %v3055_v49 }
 0x48d   :  { %v3104_v14 = vfloor.f32 %v3088_v62  ;;  %v3089_v48 = vadd.f32 0.5, %v3073_v25 }
 0x48e   :  { %v3102_v2 = vfloor.f32 %v3086_v36  ;;  %v3087_v42 = vadd.f32 0.5, %v3071_v44 }
 0x48f   :  { %v3120_v46 = vmax.f32 %v3104_v14, 0.0  ;;  %v3105_v16 = vfloor.f32 %v3089_v48 }
 0x490   :  { %v3118_v7 = vmax.f32 %v3102_v2, 0.0  ;;  %v3103_v28 = vfloor.f32 %v3087_v42 }
 0x491   :  { %v3136_v21 = vmin.f32 %v3120_v46, 15.0  ;;  %v3121_v26 = vmax.f32 %v3105_v16, 0.0 }
 0x492   :  { %v3134_v33 = vmin.f32 %v3118_v7, 15.0  ;;  %v3119_v31 = vmax.f32 %v3103_v28, 0.0 }
 0x493   :  { %v3152_v24 = vmul.f32 0.13333334, %v3136_v21  ;;  %v3137_v13 = vmin.f32 %v3121_v26, 15.0 }
 0x494   :  { %v3150_v58 = vmul.f32 0.13333334, %v3134_v33  ;;  %v3135_v23 = vmin.f32 %v3119_v31, 15.0 }
 0x495   :  { %v3153_v0 = vmul.f32 0.13333334, %v3137_v13 }
 0x496   :  { %v5939_v27 = vmax.f32 %v3150_v58, %v3152_v24  ;;  %v3151_v4 = vmul.f32 0.13333334, %v3135_v23 }
 0x498   :  { %v5947_v55 = vmax.f32 %v3151_v4, %v3153_v0 }
 0x49a   :  { %v4619_v32 = vpack.i.bf16 %v5947_v55, %v5939_v27 }
 0x49c   :  { %4620 = vrot.lane.b32.xlu0 %v4619_v32, %s4672_s29  ;;  %4625 = vrot.lane.b32.xlu1 %v4619_v32, %s4673_s17 }
 0x49f   :  { %v4015_v63 = vpop.f32.mrb[40].mxu1 }
 0x4a0   :  { %v3028_v3 = vadd.f32 %v4015_v63, %v5922_v11  ;;  %v3019_v39 = vpop.f32.mrb[41].mxu1 }
 0x4a1   :  { %v3020_v40 = vadd.f32 %v5922_v11, %v3019_v39  ;;  %v4016_v37 = vpop.f32.mrb[42].mxu1 }
 0x4a2   :  { %v3060_v52 = vmax.f32 %v3028_v3, 0.0  ;;  %v3031_v61 = vadd.f32 %v4016_v37, %v5922_v11  ;;  %v3022_v20 = vpop.f32.mrb[43].mxu1 }
 0x4a3   :  { %v3058_v59 = vmax.f32 %v3020_v40, 0.0  ;;  %v3023_v6 = vadd.f32 %v5922_v11, %v3022_v20 }
 0x4a4   :  { %v3076_v53 = vmul.f32 7.5, %v3060_v52  ;;  %v3061_v30 = vmax.f32 %v3031_v61, 0.0 }
 0x4a5   :  { %v3074_v29 = vmul.f32 7.5, %v3058_v59  ;;  %v3059_v57 = vmax.f32 %v3023_v6, 0.0 }
 0x4a6   :  { %v3092_v45 = vadd.f32 0.5, %v3076_v53  ;;  %v3077_v35 = vmul.f32 7.5, %v3061_v30 }
 0x4a7   :  { %v3090_v41 = vadd.f32 0.5, %v3074_v29  ;;  %v3075_v51 = vmul.f32 7.5, %v3059_v57 }
 0x4a8   :  { %v3108_v47 = vfloor.f32 %v3092_v45  ;;  %v3093_v1 = vadd.f32 0.5, %v3077_v35 }
 0x4a9   :  { %v3106_v19 = vfloor.f32 %v3090_v41  ;;  %v3091_v56 = vadd.f32 0.5, %v3075_v51 }
 0x4aa   :  { %v3124_v8 = vmax.f32 %v3108_v47, 0.0  ;;  %v3109_v9 = vfloor.f32 %v3093_v1 }
 0x4ab   :  { %v3122_v22 = vmax.f32 %v3106_v19, 0.0  ;;  %v3107_v38 = vfloor.f32 %v3091_v56 }
 0x4ac   :  { %v3140_v18 = vmin.f32 %v3124_v8, 15.0  ;;  %v3125_v54 = vmax.f32 %v3109_v9, 0.0  ;;  %v4019_v15 = vpop.f32.mrb[44].mxu1 }
 0x4ad   :  { %v3138_v43 = vmin.f32 %v3122_v22, 15.0  ;;  %v3123_v5 = vmax.f32 %v3107_v38, 0.0  ;;  %v3044_v49 = vadd.f32 %v4019_v15, %v5922_v11  ;;  %v3035_v62 = vpop.f32.mrb[45].mxu1 }
 0x4ae   :  { %v3156_v25 = vmul.f32 0.13333334, %v3140_v18  ;;  %v3141_v36 = vmin.f32 %v3125_v54, 15.0  ;;  %v3036_v44 = vadd.f32 %v5922_v11, %v3035_v62  ;;  %v4020_v14 = vpop.f32.mrb[46].mxu1 }
 0x4af   :  { %v3154_v48 = vmul.f32 0.13333334, %v3138_v43  ;;  %v3139_v2 = vmin.f32 %v3123_v5, 15.0  ;;  %v3064_v42 = vmax.f32 %v3044_v49, 0.0  ;;  %v3047_v46 = vadd.f32 %v4020_v14, %v5922_v11  ;;  %v3038_v16 = vpop.f32.mrb[47].mxu1 }
 0x4b0   :  { %v3157_v7 = vmul.f32 0.13333334, %v3141_v36  ;;  %v3062_v28 = vmax.f32 %v3036_v44, 0.0  ;;  %v3039_v21 = vadd.f32 %v5922_v11, %v3038_v16 }
 0x4b1   :  { %v5965_v26 = vmax.f32 %v3154_v48, %v3156_v25  ;;  %v3155_v33 = vmul.f32 0.13333334, %v3139_v2  ;;  %v3080_v31 = vmul.f32 7.5, %v3064_v42  ;;  %v3065_v24 = vmax.f32 %v3047_v46, 0.0 }
 0x4b2   :  { %v3078_v13 = vmul.f32 7.5, %v3062_v28  ;;  %v3063_v58 = vmax.f32 %v3039_v21, 0.0 }
 0x4b3   :  { %v5967_v23 = vmax.f32 %v3155_v33, %v3157_v7  ;;  %v3096_v0 = vadd.f32 0.5, %v3080_v31  ;;  %v3081_v4 = vmul.f32 7.5, %v3065_v24 }
 0x4b4   :  { %v3094_v34 = vadd.f32 0.5, %v3078_v13  ;;  %v3079_v60 = vmul.f32 7.5, %v3063_v58 }
 0x4b5   :  { %v3112_v32 = vfloor.f32 %v3096_v0  ;;  %v3097_v12 = vadd.f32 0.5, %v3081_v4  ;;  %v4629_v63 = vpack.i.bf16 %v5967_v23, %v5965_v26 }
 0x4b6   :  { %v3110_v3 = vfloor.f32 %v3094_v34  ;;  %v3095_v11 = vadd.f32 0.5, %v3079_v60 }
 0x4b7   :  { %v3128_v39 = vmax.f32 %v3112_v32, 0.0  ;;  %v3113_v40 = vfloor.f32 %v3097_v12  ;;  %4630 = vrot.lane.b32.xlu0 %v4629_v63, %s4673_s17  ;;  %4635 = vrot.lane.b32.xlu1 %v4629_v63, %s4672_s29 }
 0x4b8   :  { %v3126_v37 = vmax.f32 %v3110_v3, 0.0  ;;  %v3111_v52 = vfloor.f32 %v3095_v11 }
 0x4b9   :  { %v3144_v61 = vmin.f32 %v3128_v39, 15.0  ;;  %v3129_v20 = vmax.f32 %v3113_v40, 0.0 }
 0x4ba   :  { %v3142_v59 = vmin.f32 %v3126_v37, 15.0  ;;  %v3127_v6 = vmax.f32 %v3111_v52, 0.0 }
 0x4bb   :  { %v3160_v53 = vmul.f32 0.13333334, %v3144_v61  ;;  %v3145_v30 = vmin.f32 %v3129_v20, 15.0 }
 0x4bc   :  { %v3158_v29 = vmul.f32 0.13333334, %v3142_v59  ;;  %v3143_v57 = vmin.f32 %v3127_v6, 15.0 }
 0x4bd   :  { %v3161_v45 = vmul.f32 0.13333334, %v3145_v30 }
 0x4be   :  { %v3168_v35 = vmax.f32 %v3158_v29, %v3160_v53  ;;  %v3159_v41 = vmul.f32 0.13333334, %v3143_v57 }
 0x4c0   :  { %v3169_v51 = vmax.f32 %v3159_v41, %v3161_v45 }
 0x4c2   :  { %v4639_v47 = vpack.i.bf16 %v3169_v51, %v3168_v35 }
 0x4c4   :  { %4640 = vrot.lane.b32.xlu0 %v4639_v47, %s4672_s29  ;;  %4645 = vrot.lane.b32.xlu1 %v4639_v47, %s4673_s17 }
 0x4c8   :  { %3214 = vrot.lane.b32.xlu0 %v6111_v50, %s4673_s17 }
 0x4eb   :  { %v4616_v1 = vpop.permute.xlu1 %4615 }
 0x4ec   :  { %v4618_v19 = vunpack.i.h.bf16 %v4616_v1  ;;  %v4617_v56 = vunpack.i.l.bf16 %v4616_v1 }
 0x4ee   :  { %v3224_v38 = vsel %vm2239_vm6, 0.0, %v4618_v19  ;;  %v3223_v18 = vsel %vm2239_vm6, 0.0, %v4617_v56 }
 0x50e   :  { %v4626_v8 = vpop.permute.xlu1 %4625  ;;  %v4621_v5 = vpop.permute.xlu0 %4620 }
 0x50f   :  { %v4628_v9 = vunpack.i.h.bf16 %v4626_v8  ;;  %v4627_v22 = vunpack.i.l.bf16 %v4626_v8  ;;  %v4623_v49 = vunpack.i.h.bf16 %v4621_v5  ;;  %v4622_v62 = vunpack.i.l.bf16 %v4621_v5 }
 0x511   :  { %v3232_v54 = vsel %vm3231_vm8, %v3223_v18, %v4627_v22  ;;  %v3233_v15 = vsel %vm3231_vm8, %v3224_v38, %v4628_v9  ;;  %v3225_v14 = vsel %vm2239_vm6, %v5928_v17, %v4622_v62  ;;  %v3226_v48 = vsel %vm2239_vm6, %v5930_v10, %v4623_v49 }
 0x512   :  { %v3240_v43 = vpack.c.bf16 %v3233_v15, %v3232_v54 }
 0x514   :  { %4027 = vmatprep.mubr.msk.bf16.mxu1 %vm3275_vm9, %v3240_v43 }
 0x529   :  { %v4631_v25 = vpop.permute.xlu0 %4630  ;;  %v4636_v16 = vpop.permute.xlu1 %4635 }
 0x52a   :  { %v4633_v36 = vunpack.i.h.bf16 %v4631_v25  ;;  %v4632_v44 = vunpack.i.l.bf16 %v4631_v25  ;;  %v4638_v7 = vunpack.i.h.bf16 %v4636_v16  ;;  %v4637_v28 = vunpack.i.l.bf16 %v4636_v16 }
 0x52c   :  { %v3234_v2 = vsel %vm3231_vm8, %v3225_v14, %v4632_v44  ;;  %v3235_v42 = vsel %vm3231_vm8, %v3226_v48, %v4633_v36  ;;  %v3228_v17 = vsel %vm2239_vm6, %v5947_v55, %v4638_v7  ;;  %v3227_v10 = vsel %vm2239_vm6, %v5939_v27, %v4637_v28  ;;  %v4661_v27 = vld [vmem:[%s6065_s9] sm:$0xff]  }
 0x52d   :  { %v3241_v46 = vpack.c.bf16 %v3235_v42, %v3234_v2 }
 0x52f   :  { %4028 = vmatmul.mubr.msk.bf16.vlgmr.msra.gmra.mrb[48].mxu1 %vm3275_vm9, %v3241_v46 }
 0x530   :  { %4036 = vmatpush3.bf16.msra.mxu1 %v4661_v27 }
 0x531   :  { %4037 = vmatprep.subr.bf16.mxu1 %v6111_v50 }
 0x536   :  { %v4641_v21 = vpop.permute.xlu0 %4640  ;;  %v4646_v33 = vpop.permute.xlu1 %4645 }
 0x537   :  { %v4643_v31 = vunpack.i.h.bf16 %v4641_v21  ;;  %v4642_v24 = vunpack.i.l.bf16 %v4641_v21  ;;  %v4648_v13 = vunpack.i.h.bf16 %v4646_v33  ;;  %v4647_v58 = vunpack.i.l.bf16 %v4646_v33 }
 0x539   :  { %v3236_v0 = vsel %vm3231_vm8, %v3227_v10, %v4647_v58  ;;  %v3237_v4 = vsel %vm3231_vm8, %v3228_v17, %v4648_v13  ;;  %v3229_v34 = vsel %vm2239_vm6, %v5965_v26, %v4642_v24  ;;  %v3230_v60 = vsel %vm2239_vm6, %v5967_v23, %v4643_v31  ;;  %v4662_v26 = vld [vmem:[%s6065_s9 + $0x8] sm:$0xff]   ;;  %v3800_v23 = vld [vmem:[%s6066_s8] ss:$0 sm:$0xff] }
 0x53a   :  { %v3242_v32 = vpack.c.bf16 %v3237_v4, %v3236_v0  ;;  %v3215_v12 = vpop.permute.xlu0 %3214  ;;  %4038 = vmatpush3.bf16.msra.mxu1 %v4662_v26 }
 0x53b   :  { %v3238_v63 = vsel %vm3231_vm8, %v3229_v34, %v3215_v12  ;;  %v3239_v3 = vsel %vm3231_vm8, %v3230_v60, %v3215_v12  ;;  %4043 = vmatprep.subr.bf16.mxu1 %v6111_v50 }
 0x53c   :  { %v3243_v55 = vpack.c.bf16 %v3239_v3, %v3238_v63  ;;  %4031 = vmatprep.mubr.msk.bf16.mxu1 %vm3275_vm9, %v3242_v32 }
 0x53e   :  { %4032 = vmatmul.mubr.msk.bf16.gmra.mrb[52].mxu1 %vm3275_vm9, %v3243_v55 }
 0x53f   :  { %4039 = vmatprep.mubr.msk.bf16.mxu1 %vm4674_vm10, %v6111_v50 }
 0x602   :  { %v4029_v11 = vpop.f32.mrb[48].mxu1 }
 0x603   :  { %v3331_v39 = vadd.f32 %v4029_v11, %v3800_v23  ;;  %v3322_v40 = vpop.f32.mrb[49].mxu1 }
 0x604   :  { %v3323_v37 = vadd.f32 %v3800_v23, %v3322_v40  ;;  %v4030_v52 = vpop.f32.mrb[50].mxu1 }
 0x605   :  { %v3355_v61 = vmax.f32 %v3331_v39, 0.0  ;;  %v3334_v20 = vadd.f32 %v4030_v52, %v3800_v23  ;;  %v3325_v59 = vpop.f32.mrb[51].mxu1 }
 0x606   :  { %v3353_v6 = vmax.f32 %v3323_v37, 0.0  ;;  %v3326_v53 = vadd.f32 %v3800_v23, %v3325_v59 }
 0x607   :  { %v3363_v30 = vmul.f32 7.5, %v3355_v61  ;;  %v3356_v29 = vmax.f32 %v3334_v20, 0.0 }
 0x608   :  { %v3361_v57 = vmul.f32 7.5, %v3353_v6  ;;  %v3354_v45 = vmax.f32 %v3326_v53, 0.0 }
 0x609   :  { %v3371_v35 = vadd.f32 0.5, %v3363_v30  ;;  %v3364_v41 = vmul.f32 7.5, %v3356_v29 }
 0x60a   :  { %v3369_v51 = vadd.f32 0.5, %v3361_v57  ;;  %v3362_v47 = vmul.f32 7.5, %v3354_v45 }
 0x60b   :  { %v3379_v1 = vfloor.f32 %v3371_v35  ;;  %v3372_v19 = vadd.f32 0.5, %v3364_v41 }
 0x60c   :  { %v3377_v56 = vfloor.f32 %v3369_v51  ;;  %v3370_v8 = vadd.f32 0.5, %v3362_v47 }
 0x60d   :  { %v3387_v9 = vmax.f32 %v3379_v1, 0.0  ;;  %v3380_v22 = vfloor.f32 %v3372_v19 }
 0x60e   :  { %v3385_v38 = vmax.f32 %v3377_v56, 0.0  ;;  %v3378_v18 = vfloor.f32 %v3370_v8  ;;  %v4663_v56 = vld [vmem:[%s6067_s11] sm:$0xff]   ;;  %v4664_v8 = vld [vmem:[%s6067_s11 + $0x8] sm:$0xff]  }
 0x60f   :  { %v3395_v54 = vmin.f32 %v3387_v9, 15.0  ;;  %v3388_v15 = vmax.f32 %v3380_v22, 0.0  ;;  %v4665_v9 = vld [vmem:[%s6068_s13] sm:$0xff]   ;;  %v4666_v22 = vld [vmem:[%s6068_s13 + $0x8] sm:$0xff]  }
 0x610   :  { %v3393_v43 = vmin.f32 %v3385_v38, 15.0  ;;  %v3386_v5 = vmax.f32 %v3378_v18, 0.0  ;;  %4052 = vmatpush3.bf16.msra.mxu0 %v4665_v9  ;;  %v3808_v38 = vld [vmem:[%s6069_s10] ss:$0 sm:$0xff] }
 0x611   :  { %v3403_v49 = vmul.f32 0.13333334, %v3395_v54  ;;  %v3396_v62 = vmin.f32 %v3388_v15, 15.0  ;;  %v4033_v25 = vpop.f32.mrb[52].mxu1  ;;  %4053 = vmatprep.subr.bf16.mxu0 %v6111_v50 }
 0x612   :  { %v3401_v36 = vmul.f32 0.13333334, %v3393_v43  ;;  %v3394_v44 = vmin.f32 %v3386_v5, 15.0  ;;  %v3347_v14 = vadd.f32 %v4033_v25, %v3800_v23  ;;  %v3338_v48 = vpop.f32.mrb[53].mxu1 }
 0x613   :  { %v3404_v2 = vmul.f32 0.13333334, %v3396_v62  ;;  %v3339_v42 = vadd.f32 %v3800_v23, %v3338_v48  ;;  %v4034_v46 = vpop.f32.mrb[54].mxu1 }
 0x614   :  { %v3409_v16 = vmax.f32 %v3401_v36, %v3403_v49  ;;  %v3402_v7 = vmul.f32 0.13333334, %v3394_v44  ;;  %v3359_v28 = vmax.f32 %v3347_v14, 0.0  ;;  %v3350_v21 = vadd.f32 %v4034_v46, %v3800_v23  ;;  %v3341_v33 = vpop.f32.mrb[55].mxu1  ;;  %4054 = vmatpush3.bf16.msra.mxu0 %v4666_v22 }
 0x615   :  { %v3357_v31 = vmax.f32 %v3339_v42, 0.0  ;;  %v3342_v24 = vadd.f32 %v3800_v23, %v3341_v33 }
 0x616   :  { %v3410_v13 = vmax.f32 %v3402_v7, %v3404_v2  ;;  %v3367_v58 = vmul.f32 7.5, %v3359_v28  ;;  %v3360_v17 = vmax.f32 %v3350_v21, 0.0 }
 0x617   :  { %v3365_v10 = vmul.f32 7.5, %v3357_v31  ;;  %v3358_v0 = vmax.f32 %v3342_v24, 0.0  ;;  %v3812_v31 = vld [vmem:[%s6070_s12] ss:$0 sm:$0xff] }
 0x618   :  { %v3375_v4 = vadd.f32 0.5, %v3367_v58  ;;  %v3368_v34 = vmul.f32 7.5, %v3360_v17 }
 0x619   :  { %v3373_v60 = vadd.f32 0.5, %v3365_v10  ;;  %v3366_v32 = vmul.f32 7.5, %v3358_v0 }
 0x61a   :  { %v3383_v12 = vfloor.f32 %v3375_v4  ;;  %v3376_v63 = vadd.f32 0.5, %v3368_v34 }
 0x61b   :  { %v3381_v3 = vfloor.f32 %v3373_v60  ;;  %v3374_v55 = vadd.f32 0.5, %v3366_v32 }
 0x61c   :  { %v3391_v27 = vmax.f32 %v3383_v12, 0.0  ;;  %v3384_v26 = vfloor.f32 %v3376_v63 }
 0x61d   :  { %v3389_v11 = vmax.f32 %v3381_v3, 0.0  ;;  %v3382_v39 = vfloor.f32 %v3374_v55 }
 0x61e   :  { %v3399_v40 = vmin.f32 %v3391_v27, 15.0  ;;  %v3392_v37 = vmax.f32 %v3384_v26, 0.0 }
 0x61f   :  { %v3397_v23 = vmin.f32 %v3389_v11, 15.0  ;;  %v3390_v52 = vmax.f32 %v3382_v39, 0.0 }
 0x620   :  { %v3407_v61 = vmul.f32 0.13333334, %v3399_v40  ;;  %v3400_v20 = vmin.f32 %v3392_v37, 15.0 }
 0x621   :  { %v3405_v59 = vmul.f32 0.13333334, %v3397_v23  ;;  %v3398_v6 = vmin.f32 %v3390_v52, 15.0  ;;  %v3816_v52 = vld [vmem:[%s6071_s14] ss:$0 sm:$0xff] }
 0x622   :  { %v3408_v53 = vmul.f32 0.13333334, %v3400_v20 }
 0x623   :  { %v3411_v30 = vmax.f32 %v3405_v59, %v3407_v61  ;;  %v3406_v29 = vmul.f32 0.13333334, %v3398_v6 }
 0x625   :  { %v3412_v57 = vmax.f32 %v3406_v29, %v3408_v53 }
 0x627   :  { %v4649_v45 = vpack.i.bf16 %v3412_v57, %v3411_v30 }
 0x629   :  { %4650 = vrot.lane.b32.xlu1 %v4649_v45, %s4672_s29 }
 0x69b   :  { %v4651_v35 = vpop.permute.xlu1 %4650 }
 0x69c   :  { %v4653_v41 = vunpack.i.h.bf16 %v4651_v35  ;;  %v4652_v51 = vunpack.i.l.bf16 %v4651_v35 }
 0x69e   :  { %v3421_v47 = vsel %vm2239_vm6, %v3409_v16, %v4652_v51  ;;  %v3422_v1 = vsel %vm2239_vm6, %v3410_v13, %v4653_v41 }
 0x69f   :  { %v3423_v19 = vpack.c.bf16 %v3422_v1, %v3421_v47 }
 0x6a1   :  { %4040 = vmatmul.mubr.msk.bf16.vlgmr.msra.gmra.mrb[56].mxu1 %vm3231_vm8, %v3423_v19 }
 0x6a2   :  { %4047 = vmatprep.mubr.msk.bf16.mxu1 %vm4674_vm10, %v6111_v50  ;;  %4044 = vmatpush3.bf16.msra.mxu1 %v4663_v56 }
 0x6a3   :  { %4045 = vmatprep.subr.bf16.mxu1 %v6111_v50 }
 0x6a6   :  { %4046 = vmatpush3.bf16.msra.mxu1 %v4664_v8 }
 0x774   :  { %v3484_v18 = vpop.f32.mrb[56].mxu1 }
 0x775   :  { %v3485_v54 = vadd.f32 %v3808_v38, %v3484_v18  ;;  %v4041_v15 = vpop.f32.mrb[57].mxu1 }
 0x776   :  { %v3487_v43 = vpop.f32.mrb[58].mxu1 }
 0x777   :  { %v3491_v5 = vmax.f32 %v3485_v54, 0.0  ;;  %v3488_v49 = vadd.f32 %v3808_v38, %v3487_v43  ;;  %v4042_v62 = vpop.f32.mrb[59].mxu1 }
 0x779   :  { %v3493_v25 = vmul.f32 7.5, %v3491_v5  ;;  %v3492_v36 = vmax.f32 %v3488_v49, 0.0 }
 0x77b   :  { %v3495_v44 = vadd.f32 0.5, %v3493_v25  ;;  %v3494_v14 = vmul.f32 7.5, %v3492_v36 }
 0x77d   :  { %v3497_v48 = vfloor.f32 %v3495_v44  ;;  %v3496_v2 = vadd.f32 0.5, %v3494_v14 }
 0x77f   :  { %v3499_v42 = vmax.f32 %v3497_v48, 0.0  ;;  %v3498_v50 = vfloor.f32 %v3496_v2 }
 0x781   :  { %v3501_v46 = vmin.f32 %v3499_v42, 15.0  ;;  %v3500_v16 = vmax.f32 %v3498_v50, 0.0 }
 0x783   :  { %v3502_v7 = vmin.f32 %v3500_v16, 15.0  ;;  %v3503_v28 = vmul.f32 0.13333334, %v3501_v46 }
 0x785   :  { %v3504_v21 = vmul.f32 0.13333334, %v3502_v7 }
 0x787   :  { %v3505_v33 = vpack.c.bf16 %v3504_v21, %v3503_v28 }
 0x789   :  { %4048 = vmatmul.mubr.msk.bf16.vlgmr.msra.gmra.mrb[60].mxu1 %vm3231_vm8, %v3505_v33 }
 0x85c   :  { %v3566_v24 = vpop.f32.mrb[60].mxu1 }
 0x85d   :  { %v3567_v13 = vadd.f32 %v3812_v31, %v3566_v24  ;;  %v4049_v58 = vpop.f32.mrb[61].mxu1 }
 0x85e   :  { %v3569_v17 = vpop.f32.mrb[62].mxu1 }
 0x85f   :  { %v3573_v10 = vmax.f32 %v3567_v13, 0.0  ;;  %v3570_v0 = vadd.f32 %v3812_v31, %v3569_v17  ;;  %v4050_v4 = vpop.f32.mrb[63].mxu1 }
 0x861   :  { %v3575_v34 = vmul.f32 7.5, %v3573_v10  ;;  %v3574_v60 = vmax.f32 %v3570_v0, 0.0 }
 0x863   :  { %v3577_v32 = vadd.f32 0.5, %v3575_v34  ;;  %v3576_v12 = vmul.f32 7.5, %v3574_v60 }
 0x865   :  { %v3579_v63 = vfloor.f32 %v3577_v32  ;;  %v3578_v3 = vadd.f32 0.5, %v3576_v12 }
 0x867   :  { %v3581_v55 = vmax.f32 %v3579_v63, 0.0  ;;  %v3580_v27 = vfloor.f32 %v3578_v3 }
 0x869   :  { %v3583_v26 = vmin.f32 %v3581_v55, 15.0  ;;  %v3582_v11 = vmax.f32 %v3580_v27, 0.0 }
 0x86b   :  { %v3584_v39 = vmin.f32 %v3582_v11, 15.0  ;;  %v3585_v40 = vmul.f32 0.13333334, %v3583_v26 }
 0x86d   :  { %v3586_v37 = vmul.f32 0.13333334, %v3584_v39 }
 0x86f   :  { %v3587_v23 = vpack.c.bf16 %v3586_v37, %v3585_v40 }
 0x871   :  { %4056 = vmatmul.mubr.msk.bf16.vlgmr.msra.gmra.mrb[64].mxu0 %vm3231_vm8, %v3587_v23 }
 0x944   :  { %v3648_v61 = vpop.f32.mrb[64].mxu0 }
 0x945   :  { %v3649_v20 = vadd.f32 %v3816_v52, %v3648_v61  ;;  %v4057_v59 = vpop.f32.mrb[65].mxu0 }
 0x946   :  { %v3651_v6 = vpop.f32.mrb[66].mxu0 }
 0x947   :  { %v3655_v53 = vmul.f32 3.5, %v3649_v20  ;;  %v3652_v30 = vadd.f32 %v3816_v52, %v3651_v6  ;;  %v4058_v29 = vpop.f32.mrb[67].mxu0 }
 0x949   :  { %v3657_v57 = vadd.f32 0.5, %v3655_v53  ;;  %v3656_v45 = vmul.f32 3.5, %v3652_v30 }
 0x94b   :  { %v3659_v35 = vfloor.f32 %v3657_v57  ;;  %v3658_v41 = vadd.f32 0.5, %v3656_v45 }
 0x94d   :  { %v3820_v51 = vclamps-f32 %v3659_v35, 7.0  ;;  %v3660_v47 = vfloor.f32 %v3658_v41 }
 0x94f   :  { %v3665_v1 = vmul.f32 0.2857143, %v3820_v51  ;;  %v3821_v19 = vclamps-f32 %v3660_v47, 7.0 }
 0x951   :  { %3667 = vst.msk [vmem:[%s6072_s15] sm:$0xff] %vm2206_vm5, %v3665_v1  ;;  %v3666_v56 = vmul.f32 0.2857143, %v3821_v19 }
 0x953   :  { %3668 = vst.msk [vmem:[%s6072_s15 + $0x8] sm:$0xff] %vm2206_vm5, %v3666_v56 }

</bundles_post_ra>
